<compile_context>
chip_gen: v6e
topology: v6e:2x2x1
jax: 0.10.0
libtpu: 0.0.40
codegen_flags: <defaults>
</compile_context>

<pallas_src>
import functools

import jax
import jax.numpy as jnp
from jax.experimental import pallas as pl
from jax.experimental.pallas import tpu as pltpu


# ----------------------------- Pallas kernel ------------------------------- #
def lstm_net_kernel(x_ref, wih0_ref, whh0_ref, b0_ref, w1h0_ref, w1h1_ref,
                    b1_ref, wfc1_ref, bfc1_ref, wfc2_ref, bfc2_ref, out_ref):
    f32 = jnp.float32
    B, T = x_ref.shape
    Hp = whh0_ref.shape[0]          # padded hidden size (multiple of 128 lanes)
    w_dtype = whh0_ref.dtype        # MXU operand dtype (bf16)

    x = x_ref[...]                  # (B, T)    f32
    wih0 = wih0_ref[...]            # (1, 4Hp)  f32 (VPU-only, input_size == 1)
    whh0 = whh0_ref[...]            # (Hp, 4Hp) bf16
    b0 = b0_ref[...]                # (1, 4Hp)  f32
    w1h0 = w1h0_ref[...]            # (Hp, 4Hp) bf16  (applied to h0(t))
    w1h1 = w1h1_ref[...]            # (Hp, 4Hp) bf16  (applied to h1(t-1))
    b1 = b1_ref[...]                # (1, 4Hp)  f32

    def lstm_cell(pre, c):
        # PyTorch gate order (i, f, g, o); 128-lane-aligned static slices.
        i = jax.nn.sigmoid(pre[:, 0 * Hp:1 * Hp])
        f = jax.nn.sigmoid(pre[:, 1 * Hp:2 * Hp])
        g = jnp.tanh(pre[:, 2 * Hp:3 * Hp])
        o = jax.nn.sigmoid(pre[:, 3 * Hp:4 * Hp])
        c_new = f * c + i * g
        # h is only ever a matmul operand -> carry it in the MXU dtype.
        h_new = (o * jnp.tanh(c_new)).astype(w_dtype)
        return h_new, c_new

    # NOTE: the padded-lane-stays-zero invariant requires h == c == 0 initially.
    h0 = jnp.zeros((B, Hp), w_dtype)
    h1 = jnp.zeros((B, Hp), w_dtype)
    c0 = jnp.zeros((B, Hp), f32)
    c1 = jnp.zeros((B, Hp), f32)

    # Layer-1 pre-activation contribution that does NOT depend on h0(t):
    # dot(h1(t-1), w1h1) + b1.  Starts at b1 because h1(-1) == 0.
    pre1_part = b1

    # T is small and static -> fully unroll the recurrence.
    for t in range(T):
        # layer 0: input contribution (VPU, off-path) + single recurrent dot.
        pre0 = (x[:, t:t + 1] * wih0 + b0
                + jnp.dot(h0, whh0, preferred_element_type=f32))
        h0, c0 = lstm_cell(pre0, c0)

        # layer 1: only the h0(t)-dependent dot sits on the critical path.
        pre1 = jnp.dot(h0, w1h0, preferred_element_type=f32) + pre1_part
        h1, c1 = lstm_cell(pre1, c1)

        # Off-path partial for the NEXT step (depends only on h1(t)).
        if t + 1 < T:
            pre1_part = jnp.dot(h1, w1h1, preferred_element_type=f32) + b1

    # FC head on the last-timestep hidden of layer 1 (lane-dense padded shapes).
    z = jnp.tanh(jnp.dot(h1, wfc1_ref[...], preferred_element_type=f32)
                 + bfc1_ref[...])
    out_ref[...] = jnp.tanh(jnp.dot(z.astype(w_dtype), wfc2_ref[...],
                                    preferred_element_type=f32) + bfc2_ref[...])


# ------------------------------ wrapper ------------------------------------ #
@functools.partial(jax.jit, static_argnames=("output_size",))
def lstm_net_forward(x, params, *, output_size):
    B = x.shape[0]
    Op = params["bfc2"].shape[-1]   # padded output lanes (128)
    vmem = pl.BlockSpec(memory_space=pltpu.MemorySpace.VMEM)
    out_padded = pl.pallas_call(
        lstm_net_kernel,
        out_shape=jax.ShapeDtypeStruct((B, Op), jnp.float32),
        in_specs=[vmem] * 11,
        out_specs=vmem,
    )(x,
      params["wih0"], params["whh0"], params["b0"],
      params["w1h0"], params["w1h1"], params["b1"],
      params["wfc1"], params["bfc1"], params["wfc2"], params["bfc2"])
    return out_padded[:, :output_size]


# ----------------------- deterministic parameter init ---------------------- #
def init_torch_params(key, input_size, hidden_size, intermediate_size,
                      output_size):
    """Raw f32 parameters in the PyTorch nn.LSTM / nn.Linear layout."""
    H, I, O = hidden_size, intermediate_size, output_size
    f32 = jnp.float32
    keys = jax.random.split(key, 12)

    def u(kk, shape, bound):
        return jax.random.uniform(kk, shape, f32, -bound, bound)

    kl = 1.0 / (H ** 0.5)
    kf1 = 1.0 / (H ** 0.5)
    kf2 = 1.0 / (I ** 0.5)
    return {
        "w_ih_l0": u(keys[0], (4 * H, input_size), kl),
        "w_hh_l0": u(keys[1], (4 * H, H), kl),
        "b_ih_l0": u(keys[2], (4 * H,), kl),
        "b_hh_l0": u(keys[3], (4 * H,), kl),
        "w_ih_l1": u(keys[4], (4 * H, H), kl),
        "w_hh_l1": u(keys[5], (4 * H, H), kl),
        "b_ih_l1": u(keys[6], (4 * H,), kl),
        "b_hh_l1": u(keys[7], (4 * H,), kl),
        "w_fc1": u(keys[8], (I, H), kf1),     # torch Linear: (out, in)
        "b_fc1": u(keys[9], (I,), kf1),
        "w_fc2": u(keys[10], (O, I), kf2),
        "b_fc2": u(keys[11], (O,), kf2),
    }


def fuse_params(raw, hidden_size, intermediate_size, output_size,
                *, hp=128, ip=128, op=128, w_dtype=jnp.bfloat16):
    """Fused, lane-padded kernel parameters from the torch-layout weights."""
    H, I, O = hidden_size, intermediate_size, output_size
    f32 = jnp.float32

    def fuse_w(w, in_dim, in_p):
        # torch (4H, in), gate-major rows -> padded (in_p, 4*hp): one 128-lane
        # block per gate, transposed for row-vector @ matrix.
        wg = w.reshape(4, H, in_dim)
        out = jnp.zeros((in_p, 4 * hp), f32)
        for g in range(4):
            out = out.at[:in_dim, g * hp:g * hp + H].set(wg[g].T)
        return out

    def fuse_b(b_ih, b_hh):
        b = (b_ih + b_hh).reshape(4, H)
        out = jnp.zeros((1, 4 * hp), f32)
        for g in range(4):
            out = out.at[0, g * hp:g * hp + H].set(b[g])
        return out

    return {
        "wih0": fuse_w(raw["w_ih_l0"], 1, 1),                        # (1, 4Hp) f32
        "whh0": fuse_w(raw["w_hh_l0"], H, hp).astype(w_dtype),       # (Hp,4Hp) bf16
        "b0": fuse_b(raw["b_ih_l0"], raw["b_hh_l0"]),                # (1, 4Hp) f32
        "w1h0": fuse_w(raw["w_ih_l1"], H, hp).astype(w_dtype),       # h0(t)   half
        "w1h1": fuse_w(raw["w_hh_l1"], H, hp).astype(w_dtype),       # h1(t-1) half
        "b1": fuse_b(raw["b_ih_l1"], raw["b_hh_l1"]),                # (1, 4Hp) f32
        "wfc1": jnp.zeros((hp, ip), f32).at[:H, :I].set(raw["w_fc1"].T)
                    .astype(w_dtype),
        "bfc1": jnp.zeros((1, ip), f32).at[0, :I].set(raw["b_fc1"]),
        "wfc2": jnp.zeros((ip, op), f32).at[:I, :O].set(raw["w_fc2"].T)
                    .astype(w_dtype),
        "bfc2": jnp.zeros((1, op), f32).at[0, :O].set(raw["b_fc2"]),
    }


# ------------------------- pure-JAX references ----------------------------- #
def lstm_net_reference_mirror(x, params, output_size):
    """Mirror of the kernel math (same fused/padded weights, same bf16 casts)."""
    f32 = jnp.float32
    B, T = x.shape
    whh0 = params["whh0"]
    Hp = whh0.shape[0]
    w_dtype = whh0.dtype
    wih0, b0 = params["wih0"], params["b0"]
    w1h0, w1h1, b1 = params["w1h0"], params["w1h1"], params["b1"]

    def cell(pre, c):
        i = jax.nn.sigmoid(pre[:, 0 * Hp:1 * Hp])
        f = jax.nn.sigmoid(pre[:, 1 * Hp:2 * Hp])
        g = jnp.tanh(pre[:, 2 * Hp:3 * Hp])
        o = jax.nn.sigmoid(pre[:, 3 * Hp:4 * Hp])
        c = f * c + i * g
        return (o * jnp.tanh(c)).astype(w_dtype), c

    h0 = jnp.zeros((B, Hp), w_dtype)
    h1 = jnp.zeros((B, Hp), w_dtype)
    c0 = jnp.zeros((B, Hp), f32)
    c1 = jnp.zeros((B, Hp), f32)
    pre1_part = b1
    for t in range(T):
        pre0 = (x[:, t:t + 1] * wih0 + b0
                + jnp.dot(h0, whh0, preferred_element_type=f32))
        h0, c0 = cell(pre0, c0)
        pre1 = jnp.dot(h0, w1h0, preferred_element_type=f32) + pre1_part
        h1, c1 = cell(pre1, c1)
        pre1_part = jnp.dot(h1, w1h1, preferred_element_type=f32) + b1

    z = jnp.tanh(jnp.dot(h1, params["wfc1"], preferred_element_type=f32)
                 + params["bfc1"])
    out = jnp.tanh(jnp.dot(z.astype(w_dtype), params["wfc2"],
                           preferred_element_type=f32) + params["bfc2"])
    return out[:, :output_size]


def lstm_net_reference_f32(x, raw, output_size):
    """All-f32, unpadded reference faithful to the PyTorch LSTMNet forward."""
    B, T = x.shape
    H = raw["w_hh_l0"].shape[1]

    def cell(pre, c):
        i = jax.nn.sigmoid(pre[:, 0 * H:1 * H])
        f = jax.nn.sigmoid(pre[:, 1 * H:2 * H])
        g = jnp.tanh(pre[:, 2 * H:3 * H])
        o = jax.nn.sigmoid(pre[:, 3 * H:4 * H])
        c = f * c + i * g
        return o * jnp.tanh(c), c

    h0 = c0 = h1 = c1 = jnp.zeros((B, H), jnp.float32)
    b0 = raw["b_ih_l0"] + raw["b_hh_l0"]
    b1 = raw["b_ih_l1"] + raw["b_hh_l1"]
    for t in range(T):
        pre0 = x[:, t:t + 1] @ raw["w_ih_l0"].T + h0 @ raw["w_hh_l0"].T + b0
        h0, c0 = cell(pre0, c0)
        pre1 = h0 @ raw["w_ih_l1"].T + h1 @ raw["w_hh_l1"].T + b1
        h1, c1 = cell(pre1, c1)

    z = jnp.tanh(h1 @ raw["w_fc1"].T + raw["b_fc1"])
    return jnp.tanh(z @ raw["w_fc2"].T + raw["b_fc2"])


# --------------------------------- main ------------------------------------ #
if __name__ == "__main__":
    # module config from old/LSTM8.py
    input_size = 1
    hidden_size = 100
    intermediate_size = 64
    output_size = 6

    batch, seq_len = 2, 8

    key = jax.random.PRNGKey(0)
    k_x, k_p = jax.random.split(key)
    x = jax.random.normal(k_x, (batch, seq_len), jnp.float32)  # forward unsqueezes (-1)

    raw = init_torch_params(k_p, input_size, hidden_size, intermediate_size,
                            output_size)
    params = fuse_params(raw, hidden_size, intermediate_size, output_size)

    out = lstm_net_forward(x, params, output_size=output_size)
    out = jax.block_until_ready(out)
    assert out.shape == (batch, output_size)

    # 1) tight check vs. a reference mirroring the kernel's bf16 casts exactly.
    ref_mirror = lstm_net_reference_mirror(x, params, output_size)
    assert jnp.allclose(out, ref_mirror, atol=1e-3, rtol=1e-3), \
        "kernel/mirror-reference mismatch"

    # 2) fidelity check vs. an all-f32, unpadded PyTorch-faithful reference
    #    (bounded divergence from the bf16 weights / bf16-carried h state).
    ref_f32 = lstm_net_reference_f32(x, raw, output_size)
    max_err = float(jnp.max(jnp.abs(out - ref_f32)))
    assert max_err < 3e-2, f"kernel/f32-reference divergence too large: {max_err}"

    print("KERNEL_OK")
</pallas_src>

<mosaic_0001>
module attributes {stable_mosaic.version = 11 : i64} {
  func.func @lstm_net_kernel(%arg0: memref<2x8xf32, #tpu.memory_space<vmem>>, %arg1: memref<1x512xf32, #tpu.memory_space<vmem>>, %arg2: memref<128x512xbf16, #tpu.memory_space<vmem>>, %arg3: memref<1x512xf32, #tpu.memory_space<vmem>>, %arg4: memref<128x512xbf16, #tpu.memory_space<vmem>>, %arg5: memref<128x512xbf16, #tpu.memory_space<vmem>>, %arg6: memref<1x512xf32, #tpu.memory_space<vmem>>, %arg7: memref<128x128xbf16, #tpu.memory_space<vmem>>, %arg8: memref<1x128xf32, #tpu.memory_space<vmem>>, %arg9: memref<128x128xbf16, #tpu.memory_space<vmem>>, %arg10: memref<1x128xf32, #tpu.memory_space<vmem>>, %arg11: memref<2x128xf32, #tpu.memory_space<vmem>>) attributes {dimension_semantics = [], scalar_prefetch = 0 : i64, scratch_operands = 0 : i64, tpu.core_type = #tpu.core_type<tc>} {
    %c0 = arith.constant 0 : index
    %c0_0 = arith.constant 0 : index
    %0 = vector.load %arg0[%c0, %c0_0] : memref<2x8xf32, #tpu.memory_space<vmem>>, vector<2x8xf32>
    %c0_1 = arith.constant 0 : index
    %c0_2 = arith.constant 0 : index
    %1 = vector.load %arg1[%c0_1, %c0_2] : memref<1x512xf32, #tpu.memory_space<vmem>>, vector<1x512xf32>
    %c0_3 = arith.constant 0 : index
    %c0_4 = arith.constant 0 : index
    %2 = vector.load %arg2[%c0_3, %c0_4] : memref<128x512xbf16, #tpu.memory_space<vmem>>, vector<128x512xbf16>
    %c0_5 = arith.constant 0 : index
    %c0_6 = arith.constant 0 : index
    %3 = vector.load %arg3[%c0_5, %c0_6] : memref<1x512xf32, #tpu.memory_space<vmem>>, vector<1x512xf32>
    %c0_7 = arith.constant 0 : index
    %c0_8 = arith.constant 0 : index
    %4 = vector.load %arg4[%c0_7, %c0_8] : memref<128x512xbf16, #tpu.memory_space<vmem>>, vector<128x512xbf16>
    %c0_9 = arith.constant 0 : index
    %c0_10 = arith.constant 0 : index
    %5 = vector.load %arg5[%c0_9, %c0_10] : memref<128x512xbf16, #tpu.memory_space<vmem>>, vector<128x512xbf16>
    %c0_11 = arith.constant 0 : index
    %c0_12 = arith.constant 0 : index
    %6 = vector.load %arg6[%c0_11, %c0_12] : memref<1x512xf32, #tpu.memory_space<vmem>>, vector<1x512xf32>
    %cst = arith.constant 0.000000e+00 : bf16
    %7 = vector.broadcast %cst : bf16 to vector<2x128xbf16>
    %cst_13 = arith.constant 0.000000e+00 : f32
    %8 = vector.broadcast %cst_13 : f32 to vector<2x128xf32>
    %cst_14 = arith.constant 0.000000e+00 : f32
    %9 = vector.broadcast %cst_14 : f32 to vector<2x128xf32>
    %10 = vector.extract_strided_slice %0 {offsets = [0, 0], sizes = [2, 1], strides = [1, 1]} : vector<2x8xf32> to vector<2x1xf32>
    %11 = vector.broadcast %10 : vector<2x1xf32> to vector<2x512xf32>
    %12 = vector.broadcast %1 : vector<1x512xf32> to vector<2x512xf32>
    %13 = arith.mulf %11, %12 : vector<2x512xf32>
    %14 = vector.broadcast %3 : vector<1x512xf32> to vector<2x512xf32>
    %15 = arith.addf %13, %14 : vector<2x512xf32>
    %cst_15 = arith.constant dense<0.000000e+00> : vector<2x512xf32>
    %16 = tpu.matmul %7, %2, %cst_15 {dimension_numbers = #tpu.dot_dimension_numbers<[1], [0], [0], [1], [0, 0, 1, 1], [], []>} : vector<2x128xbf16>, vector<128x512xbf16>, vector<2x512xf32> -> vector<2x512xf32>
    %17 = arith.addf %15, %16 : vector<2x512xf32>
    %18 = vector.extract_strided_slice %17 {offsets = [0, 0], sizes = [2, 128], strides = [1, 1]} : vector<2x512xf32> to vector<2x128xf32>
    %19 = arith.negf %18 : vector<2x128xf32>
    %20 = math.exp %19 : vector<2x128xf32>
    %cst_16 = arith.constant 1.000000e+00 : f32
    %21 = vector.broadcast %cst_16 : f32 to vector<2x128xf32>
    %22 = arith.addf %21, %20 : vector<2x128xf32>
    %23 = arith.divf %21, %22 : vector<2x128xf32>
    %24 = vector.extract_strided_slice %17 {offsets = [0, 128], sizes = [2, 128], strides = [1, 1]} : vector<2x512xf32> to vector<2x128xf32>
    %25 = arith.negf %24 : vector<2x128xf32>
    %26 = math.exp %25 : vector<2x128xf32>
    %cst_17 = arith.constant 1.000000e+00 : f32
    %27 = vector.broadcast %cst_17 : f32 to vector<2x128xf32>
    %28 = arith.addf %27, %26 : vector<2x128xf32>
    %29 = arith.divf %27, %28 : vector<2x128xf32>
    %30 = vector.extract_strided_slice %17 {offsets = [0, 256], sizes = [2, 128], strides = [1, 1]} : vector<2x512xf32> to vector<2x128xf32>
    %31 = math.tanh %30 : vector<2x128xf32>
    %32 = vector.extract_strided_slice %17 {offsets = [0, 384], sizes = [2, 128], strides = [1, 1]} : vector<2x512xf32> to vector<2x128xf32>
    %33 = arith.negf %32 : vector<2x128xf32>
    %34 = math.exp %33 : vector<2x128xf32>
    %cst_18 = arith.constant 1.000000e+00 : f32
    %35 = vector.broadcast %cst_18 : f32 to vector<2x128xf32>
    %36 = arith.addf %35, %34 : vector<2x128xf32>
    %37 = arith.divf %35, %36 : vector<2x128xf32>
    %38 = arith.mulf %29, %8 : vector<2x128xf32>
    %39 = arith.mulf %23, %31 : vector<2x128xf32>
    %40 = arith.addf %38, %39 : vector<2x128xf32>
    %41 = math.tanh %40 : vector<2x128xf32>
    %42 = arith.mulf %37, %41 : vector<2x128xf32>
    %43 = arith.truncf %42 : vector<2x128xf32> to vector<2x128xbf16>
    %cst_19 = arith.constant dense<0.000000e+00> : vector<2x512xf32>
    %44 = tpu.matmul %43, %4, %cst_19 {dimension_numbers = #tpu.dot_dimension_numbers<[1], [0], [0], [1], [0, 0, 1, 1], [], []>} : vector<2x128xbf16>, vector<128x512xbf16>, vector<2x512xf32> -> vector<2x512xf32>
    %45 = vector.broadcast %6 : vector<1x512xf32> to vector<2x512xf32>
    %46 = arith.addf %44, %45 : vector<2x512xf32>
    %47 = vector.extract_strided_slice %46 {offsets = [0, 0], sizes = [2, 128], strides = [1, 1]} : vector<2x512xf32> to vector<2x128xf32>
    %48 = arith.negf %47 : vector<2x128xf32>
    %49 = math.exp %48 : vector<2x128xf32>
    %cst_20 = arith.constant 1.000000e+00 : f32
    %50 = vector.broadcast %cst_20 : f32 to vector<2x128xf32>
    %51 = arith.addf %50, %49 : vector<2x128xf32>
    %52 = arith.divf %50, %51 : vector<2x128xf32>
    %53 = vector.extract_strided_slice %46 {offsets = [0, 128], sizes = [2, 128], strides = [1, 1]} : vector<2x512xf32> to vector<2x128xf32>
    %54 = arith.negf %53 : vector<2x128xf32>
    %55 = math.exp %54 : vector<2x128xf32>
    %cst_21 = arith.constant 1.000000e+00 : f32
    %56 = vector.broadcast %cst_21 : f32 to vector<2x128xf32>
    %57 = arith.addf %56, %55 : vector<2x128xf32>
    %58 = arith.divf %56, %57 : vector<2x128xf32>
    %59 = vector.extract_strided_slice %46 {offsets = [0, 256], sizes = [2, 128], strides = [1, 1]} : vector<2x512xf32> to vector<2x128xf32>
    %60 = math.tanh %59 : vector<2x128xf32>
    %61 = vector.extract_strided_slice %46 {offsets = [0, 384], sizes = [2, 128], strides = [1, 1]} : vector<2x512xf32> to vector<2x128xf32>
    %62 = arith.negf %61 : vector<2x128xf32>
    %63 = math.exp %62 : vector<2x128xf32>
    %cst_22 = arith.constant 1.000000e+00 : f32
    %64 = vector.broadcast %cst_22 : f32 to vector<2x128xf32>
    %65 = arith.addf %64, %63 : vector<2x128xf32>
    %66 = arith.divf %64, %65 : vector<2x128xf32>
    %67 = arith.mulf %58, %9 : vector<2x128xf32>
    %68 = arith.mulf %52, %60 : vector<2x128xf32>
    %69 = arith.addf %67, %68 : vector<2x128xf32>
    %70 = math.tanh %69 : vector<2x128xf32>
    %71 = arith.mulf %66, %70 : vector<2x128xf32>
    %72 = arith.truncf %71 : vector<2x128xf32> to vector<2x128xbf16>
    %cst_23 = arith.constant dense<0.000000e+00> : vector<2x512xf32>
    %73 = tpu.matmul %72, %5, %cst_23 {dimension_numbers = #tpu.dot_dimension_numbers<[1], [0], [0], [1], [0, 0, 1, 1], [], []>} : vector<2x128xbf16>, vector<128x512xbf16>, vector<2x512xf32> -> vector<2x512xf32>
    %74 = vector.broadcast %6 : vector<1x512xf32> to vector<2x512xf32>
    %75 = arith.addf %73, %74 : vector<2x512xf32>
    %76 = vector.extract_strided_slice %0 {offsets = [0, 1], sizes = [2, 1], strides = [1, 1]} : vector<2x8xf32> to vector<2x1xf32>
    %77 = vector.broadcast %76 : vector<2x1xf32> to vector<2x512xf32>
    %78 = vector.broadcast %1 : vector<1x512xf32> to vector<2x512xf32>
    %79 = arith.mulf %77, %78 : vector<2x512xf32>
    %80 = vector.broadcast %3 : vector<1x512xf32> to vector<2x512xf32>
    %81 = arith.addf %79, %80 : vector<2x512xf32>
    %cst_24 = arith.constant dense<0.000000e+00> : vector<2x512xf32>
    %82 = tpu.matmul %43, %2, %cst_24 {dimension_numbers = #tpu.dot_dimension_numbers<[1], [0], [0], [1], [0, 0, 1, 1], [], []>} : vector<2x128xbf16>, vector<128x512xbf16>, vector<2x512xf32> -> vector<2x512xf32>
    %83 = arith.addf %81, %82 : vector<2x512xf32>
    %84 = vector.extract_strided_slice %83 {offsets = [0, 0], sizes = [2, 128], strides = [1, 1]} : vector<2x512xf32> to vector<2x128xf32>
    %85 = arith.negf %84 : vector<2x128xf32>
    %86 = math.exp %85 : vector<2x128xf32>
    %cst_25 = arith.constant 1.000000e+00 : f32
    %87 = vector.broadcast %cst_25 : f32 to vector<2x128xf32>
    %88 = arith.addf %87, %86 : vector<2x128xf32>
    %89 = arith.divf %87, %88 : vector<2x128xf32>
    %90 = vector.extract_strided_slice %83 {offsets = [0, 128], sizes = [2, 128], strides = [1, 1]} : vector<2x512xf32> to vector<2x128xf32>
    %91 = arith.negf %90 : vector<2x128xf32>
    %92 = math.exp %91 : vector<2x128xf32>
    %cst_26 = arith.constant 1.000000e+00 : f32
    %93 = vector.broadcast %cst_26 : f32 to vector<2x128xf32>
    %94 = arith.addf %93, %92 : vector<2x128xf32>
    %95 = arith.divf %93, %94 : vector<2x128xf32>
    %96 = vector.extract_strided_slice %83 {offsets = [0, 256], sizes = [2, 128], strides = [1, 1]} : vector<2x512xf32> to vector<2x128xf32>
    %97 = math.tanh %96 : vector<2x128xf32>
    %98 = vector.extract_strided_slice %83 {offsets = [0, 384], sizes = [2, 128], strides = [1, 1]} : vector<2x512xf32> to vector<2x128xf32>
    %99 = arith.negf %98 : vector<2x128xf32>
    %100 = math.exp %99 : vector<2x128xf32>
    %cst_27 = arith.constant 1.000000e+00 : f32
    %101 = vector.broadcast %cst_27 : f32 to vector<2x128xf32>
    %102 = arith.addf %101, %100 : vector<2x128xf32>
    %103 = arith.divf %101, %102 : vector<2x128xf32>
    %104 = arith.mulf %95, %40 : vector<2x128xf32>
    %105 = arith.mulf %89, %97 : vector<2x128xf32>
    %106 = arith.addf %104, %105 : vector<2x128xf32>
    %107 = math.tanh %106 : vector<2x128xf32>
    %108 = arith.mulf %103, %107 : vector<2x128xf32>
    %109 = arith.truncf %108 : vector<2x128xf32> to vector<2x128xbf16>
    %cst_28 = arith.constant dense<0.000000e+00> : vector<2x512xf32>
    %110 = tpu.matmul %109, %4, %cst_28 {dimension_numbers = #tpu.dot_dimension_numbers<[1], [0], [0], [1], [0, 0, 1, 1], [], []>} : vector<2x128xbf16>, vector<128x512xbf16>, vector<2x512xf32> -> vector<2x512xf32>
    %111 = arith.addf %110, %75 : vector<2x512xf32>
    %112 = vector.extract_strided_slice %111 {offsets = [0, 0], sizes = [2, 128], strides = [1, 1]} : vector<2x512xf32> to vector<2x128xf32>
    %113 = arith.negf %112 : vector<2x128xf32>
    %114 = math.exp %113 : vector<2x128xf32>
    %cst_29 = arith.constant 1.000000e+00 : f32
    %115 = vector.broadcast %cst_29 : f32 to vector<2x128xf32>
    %116 = arith.addf %115, %114 : vector<2x128xf32>
    %117 = arith.divf %115, %116 : vector<2x128xf32>
    %118 = vector.extract_strided_slice %111 {offsets = [0, 128], sizes = [2, 128], strides = [1, 1]} : vector<2x512xf32> to vector<2x128xf32>
    %119 = arith.negf %118 : vector<2x128xf32>
    %120 = math.exp %119 : vector<2x128xf32>
    %cst_30 = arith.constant 1.000000e+00 : f32
    %121 = vector.broadcast %cst_30 : f32 to vector<2x128xf32>
    %122 = arith.addf %121, %120 : vector<2x128xf32>
    %123 = arith.divf %121, %122 : vector<2x128xf32>
    %124 = vector.extract_strided_slice %111 {offsets = [0, 256], sizes = [2, 128], strides = [1, 1]} : vector<2x512xf32> to vector<2x128xf32>
    %125 = math.tanh %124 : vector<2x128xf32>
    %126 = vector.extract_strided_slice %111 {offsets = [0, 384], sizes = [2, 128], strides = [1, 1]} : vector<2x512xf32> to vector<2x128xf32>
    %127 = arith.negf %126 : vector<2x128xf32>
    %128 = math.exp %127 : vector<2x128xf32>
    %cst_31 = arith.constant 1.000000e+00 : f32
    %129 = vector.broadcast %cst_31 : f32 to vector<2x128xf32>
    %130 = arith.addf %129, %128 : vector<2x128xf32>
    %131 = arith.divf %129, %130 : vector<2x128xf32>
    %132 = arith.mulf %123, %69 : vector<2x128xf32>
    %133 = arith.mulf %117, %125 : vector<2x128xf32>
    %134 = arith.addf %132, %133 : vector<2x128xf32>
    %135 = math.tanh %134 : vector<2x128xf32>
    %136 = arith.mulf %131, %135 : vector<2x128xf32>
    %137 = arith.truncf %136 : vector<2x128xf32> to vector<2x128xbf16>
    %cst_32 = arith.constant dense<0.000000e+00> : vector<2x512xf32>
    %138 = tpu.matmul %137, %5, %cst_32 {dimension_numbers = #tpu.dot_dimension_numbers<[1], [0], [0], [1], [0, 0, 1, 1], [], []>} : vector<2x128xbf16>, vector<128x512xbf16>, vector<2x512xf32> -> vector<2x512xf32>
    %139 = vector.broadcast %6 : vector<1x512xf32> to vector<2x512xf32>
    %140 = arith.addf %138, %139 : vector<2x512xf32>
    %141 = vector.extract_strided_slice %0 {offsets = [0, 2], sizes = [2, 1], strides = [1, 1]} : vector<2x8xf32> to vector<2x1xf32>
    %142 = vector.broadcast %141 : vector<2x1xf32> to vector<2x512xf32>
    %143 = vector.broadcast %1 : vector<1x512xf32> to vector<2x512xf32>
    %144 = arith.mulf %142, %143 : vector<2x512xf32>
    %145 = vector.broadcast %3 : vector<1x512xf32> to vector<2x512xf32>
    %146 = arith.addf %144, %145 : vector<2x512xf32>
    %cst_33 = arith.constant dense<0.000000e+00> : vector<2x512xf32>
    %147 = tpu.matmul %109, %2, %cst_33 {dimension_numbers = #tpu.dot_dimension_numbers<[1], [0], [0], [1], [0, 0, 1, 1], [], []>} : vector<2x128xbf16>, vector<128x512xbf16>, vector<2x512xf32> -> vector<2x512xf32>
    %148 = arith.addf %146, %147 : vector<2x512xf32>
    %149 = vector.extract_strided_slice %148 {offsets = [0, 0], sizes = [2, 128], strides = [1, 1]} : vector<2x512xf32> to vector<2x128xf32>
    %150 = arith.negf %149 : vector<2x128xf32>
    %151 = math.exp %150 : vector<2x128xf32>
    %cst_34 = arith.constant 1.000000e+00 : f32
    %152 = vector.broadcast %cst_34 : f32 to vector<2x128xf32>
    %153 = arith.addf %152, %151 : vector<2x128xf32>
    %154 = arith.divf %152, %153 : vector<2x128xf32>
    %155 = vector.extract_strided_slice %148 {offsets = [0, 128], sizes = [2, 128], strides = [1, 1]} : vector<2x512xf32> to vector<2x128xf32>
    %156 = arith.negf %155 : vector<2x128xf32>
    %157 = math.exp %156 : vector<2x128xf32>
    %cst_35 = arith.constant 1.000000e+00 : f32
    %158 = vector.broadcast %cst_35 : f32 to vector<2x128xf32>
    %159 = arith.addf %158, %157 : vector<2x128xf32>
    %160 = arith.divf %158, %159 : vector<2x128xf32>
    %161 = vector.extract_strided_slice %148 {offsets = [0, 256], sizes = [2, 128], strides = [1, 1]} : vector<2x512xf32> to vector<2x128xf32>
    %162 = math.tanh %161 : vector<2x128xf32>
    %163 = vector.extract_strided_slice %148 {offsets = [0, 384], sizes = [2, 128], strides = [1, 1]} : vector<2x512xf32> to vector<2x128xf32>
    %164 = arith.negf %163 : vector<2x128xf32>
    %165 = math.exp %164 : vector<2x128xf32>
    %cst_36 = arith.constant 1.000000e+00 : f32
    %166 = vector.broadcast %cst_36 : f32 to vector<2x128xf32>
    %167 = arith.addf %166, %165 : vector<2x128xf32>
    %168 = arith.divf %166, %167 : vector<2x128xf32>
    %169 = arith.mulf %160, %106 : vector<2x128xf32>
    %170 = arith.mulf %154, %162 : vector<2x128xf32>
    %171 = arith.addf %169, %170 : vector<2x128xf32>
    %172 = math.tanh %171 : vector<2x128xf32>
    %173 = arith.mulf %168, %172 : vector<2x128xf32>
    %174 = arith.truncf %173 : vector<2x128xf32> to vector<2x128xbf16>
    %cst_37 = arith.constant dense<0.000000e+00> : vector<2x512xf32>
    %175 = tpu.matmul %174, %4, %cst_37 {dimension_numbers = #tpu.dot_dimension_numbers<[1], [0], [0], [1], [0, 0, 1, 1], [], []>} : vector<2x128xbf16>, vector<128x512xbf16>, vector<2x512xf32> -> vector<2x512xf32>
    %176 = arith.addf %175, %140 : vector<2x512xf32>
    %177 = vector.extract_strided_slice %176 {offsets = [0, 0], sizes = [2, 128], strides = [1, 1]} : vector<2x512xf32> to vector<2x128xf32>
    %178 = arith.negf %177 : vector<2x128xf32>
    %179 = math.exp %178 : vector<2x128xf32>
    %cst_38 = arith.constant 1.000000e+00 : f32
    %180 = vector.broadcast %cst_38 : f32 to vector<2x128xf32>
    %181 = arith.addf %180, %179 : vector<2x128xf32>
    %182 = arith.divf %180, %181 : vector<2x128xf32>
    %183 = vector.extract_strided_slice %176 {offsets = [0, 128], sizes = [2, 128], strides = [1, 1]} : vector<2x512xf32> to vector<2x128xf32>
    %184 = arith.negf %183 : vector<2x128xf32>
    %185 = math.exp %184 : vector<2x128xf32>
    %cst_39 = arith.constant 1.000000e+00 : f32
    %186 = vector.broadcast %cst_39 : f32 to vector<2x128xf32>
    %187 = arith.addf %186, %185 : vector<2x128xf32>
    %188 = arith.divf %186, %187 : vector<2x128xf32>
    %189 = vector.extract_strided_slice %176 {offsets = [0, 256], sizes = [2, 128], strides = [1, 1]} : vector<2x512xf32> to vector<2x128xf32>
    %190 = math.tanh %189 : vector<2x128xf32>
    %191 = vector.extract_strided_slice %176 {offsets = [0, 384], sizes = [2, 128], strides = [1, 1]} : vector<2x512xf32> to vector<2x128xf32>
    %192 = arith.negf %191 : vector<2x128xf32>
    %193 = math.exp %192 : vector<2x128xf32>
    %cst_40 = arith.constant 1.000000e+00 : f32
    %194 = vector.broadcast %cst_40 : f32 to vector<2x128xf32>
    %195 = arith.addf %194, %193 : vector<2x128xf32>
    %196 = arith.divf %194, %195 : vector<2x128xf32>
    %197 = arith.mulf %188, %134 : vector<2x128xf32>
    %198 = arith.mulf %182, %190 : vector<2x128xf32>
    %199 = arith.addf %197, %198 : vector<2x128xf32>
    %200 = math.tanh %199 : vector<2x128xf32>
    %201 = arith.mulf %196, %200 : vector<2x128xf32>
    %202 = arith.truncf %201 : vector<2x128xf32> to vector<2x128xbf16>
    %cst_41 = arith.constant dense<0.000000e+00> : vector<2x512xf32>
    %203 = tpu.matmul %202, %5, %cst_41 {dimension_numbers = #tpu.dot_dimension_numbers<[1], [0], [0], [1], [0, 0, 1, 1], [], []>} : vector<2x128xbf16>, vector<128x512xbf16>, vector<2x512xf32> -> vector<2x512xf32>
    %204 = vector.broadcast %6 : vector<1x512xf32> to vector<2x512xf32>
    %205 = arith.addf %203, %204 : vector<2x512xf32>
    %206 = vector.extract_strided_slice %0 {offsets = [0, 3], sizes = [2, 1], strides = [1, 1]} : vector<2x8xf32> to vector<2x1xf32>
    %207 = vector.broadcast %206 : vector<2x1xf32> to vector<2x512xf32>
    %208 = vector.broadcast %1 : vector<1x512xf32> to vector<2x512xf32>
    %209 = arith.mulf %207, %208 : vector<2x512xf32>
    %210 = vector.broadcast %3 : vector<1x512xf32> to vector<2x512xf32>
    %211 = arith.addf %209, %210 : vector<2x512xf32>
    %cst_42 = arith.constant dense<0.000000e+00> : vector<2x512xf32>
    %212 = tpu.matmul %174, %2, %cst_42 {dimension_numbers = #tpu.dot_dimension_numbers<[1], [0], [0], [1], [0, 0, 1, 1], [], []>} : vector<2x128xbf16>, vector<128x512xbf16>, vector<2x512xf32> -> vector<2x512xf32>
    %213 = arith.addf %211, %212 : vector<2x512xf32>
    %214 = vector.extract_strided_slice %213 {offsets = [0, 0], sizes = [2, 128], strides = [1, 1]} : vector<2x512xf32> to vector<2x128xf32>
    %215 = arith.negf %214 : vector<2x128xf32>
    %216 = math.exp %215 : vector<2x128xf32>
    %cst_43 = arith.constant 1.000000e+00 : f32
    %217 = vector.broadcast %cst_43 : f32 to vector<2x128xf32>
    %218 = arith.addf %217, %216 : vector<2x128xf32>
    %219 = arith.divf %217, %218 : vector<2x128xf32>
    %220 = vector.extract_strided_slice %213 {offsets = [0, 128], sizes = [2, 128], strides = [1, 1]} : vector<2x512xf32> to vector<2x128xf32>
    %221 = arith.negf %220 : vector<2x128xf32>
    %222 = math.exp %221 : vector<2x128xf32>
    %cst_44 = arith.constant 1.000000e+00 : f32
    %223 = vector.broadcast %cst_44 : f32 to vector<2x128xf32>
    %224 = arith.addf %223, %222 : vector<2x128xf32>
    %225 = arith.divf %223, %224 : vector<2x128xf32>
    %226 = vector.extract_strided_slice %213 {offsets = [0, 256], sizes = [2, 128], strides = [1, 1]} : vector<2x512xf32> to vector<2x128xf32>
    %227 = math.tanh %226 : vector<2x128xf32>
    %228 = vector.extract_strided_slice %213 {offsets = [0, 384], sizes = [2, 128], strides = [1, 1]} : vector<2x512xf32> to vector<2x128xf32>
    %229 = arith.negf %228 : vector<2x128xf32>
    %230 = math.exp %229 : vector<2x128xf32>
    %cst_45 = arith.constant 1.000000e+00 : f32
    %231 = vector.broadcast %cst_45 : f32 to vector<2x128xf32>
    %232 = arith.addf %231, %230 : vector<2x128xf32>
    %233 = arith.divf %231, %232 : vector<2x128xf32>
    %234 = arith.mulf %225, %171 : vector<2x128xf32>
    %235 = arith.mulf %219, %227 : vector<2x128xf32>
    %236 = arith.addf %234, %235 : vector<2x128xf32>
    %237 = math.tanh %236 : vector<2x128xf32>
    %238 = arith.mulf %233, %237 : vector<2x128xf32>
    %239 = arith.truncf %238 : vector<2x128xf32> to vector<2x128xbf16>
    %cst_46 = arith.constant dense<0.000000e+00> : vector<2x512xf32>
    %240 = tpu.matmul %239, %4, %cst_46 {dimension_numbers = #tpu.dot_dimension_numbers<[1], [0], [0], [1], [0, 0, 1, 1], [], []>} : vector<2x128xbf16>, vector<128x512xbf16>, vector<2x512xf32> -> vector<2x512xf32>
    %241 = arith.addf %240, %205 : vector<2x512xf32>
    %242 = vector.extract_strided_slice %241 {offsets = [0, 0], sizes = [2, 128], strides = [1, 1]} : vector<2x512xf32> to vector<2x128xf32>
    %243 = arith.negf %242 : vector<2x128xf32>
    %244 = math.exp %243 : vector<2x128xf32>
    %cst_47 = arith.constant 1.000000e+00 : f32
    %245 = vector.broadcast %cst_47 : f32 to vector<2x128xf32>
    %246 = arith.addf %245, %244 : vector<2x128xf32>
    %247 = arith.divf %245, %246 : vector<2x128xf32>
    %248 = vector.extract_strided_slice %241 {offsets = [0, 128], sizes = [2, 128], strides = [1, 1]} : vector<2x512xf32> to vector<2x128xf32>
    %249 = arith.negf %248 : vector<2x128xf32>
    %250 = math.exp %249 : vector<2x128xf32>
    %cst_48 = arith.constant 1.000000e+00 : f32
    %251 = vector.broadcast %cst_48 : f32 to vector<2x128xf32>
    %252 = arith.addf %251, %250 : vector<2x128xf32>
    %253 = arith.divf %251, %252 : vector<2x128xf32>
    %254 = vector.extract_strided_slice %241 {offsets = [0, 256], sizes = [2, 128], strides = [1, 1]} : vector<2x512xf32> to vector<2x128xf32>
    %255 = math.tanh %254 : vector<2x128xf32>
    %256 = vector.extract_strided_slice %241 {offsets = [0, 384], sizes = [2, 128], strides = [1, 1]} : vector<2x512xf32> to vector<2x128xf32>
    %257 = arith.negf %256 : vector<2x128xf32>
    %258 = math.exp %257 : vector<2x128xf32>
    %cst_49 = arith.constant 1.000000e+00 : f32
    %259 = vector.broadcast %cst_49 : f32 to vector<2x128xf32>
    %260 = arith.addf %259, %258 : vector<2x128xf32>
    %261 = arith.divf %259, %260 : vector<2x128xf32>
    %262 = arith.mulf %253, %199 : vector<2x128xf32>
    %263 = arith.mulf %247, %255 : vector<2x128xf32>
    %264 = arith.addf %262, %263 : vector<2x128xf32>
    %265 = math.tanh %264 : vector<2x128xf32>
    %266 = arith.mulf %261, %265 : vector<2x128xf32>
    %267 = arith.truncf %266 : vector<2x128xf32> to vector<2x128xbf16>
    %cst_50 = arith.constant dense<0.000000e+00> : vector<2x512xf32>
    %268 = tpu.matmul %267, %5, %cst_50 {dimension_numbers = #tpu.dot_dimension_numbers<[1], [0], [0], [1], [0, 0, 1, 1], [], []>} : vector<2x128xbf16>, vector<128x512xbf16>, vector<2x512xf32> -> vector<2x512xf32>
    %269 = vector.broadcast %6 : vector<1x512xf32> to vector<2x512xf32>
    %270 = arith.addf %268, %269 : vector<2x512xf32>
    %271 = vector.extract_strided_slice %0 {offsets = [0, 4], sizes = [2, 1], strides = [1, 1]} : vector<2x8xf32> to vector<2x1xf32>
    %272 = vector.broadcast %271 : vector<2x1xf32> to vector<2x512xf32>
    %273 = vector.broadcast %1 : vector<1x512xf32> to vector<2x512xf32>
    %274 = arith.mulf %272, %273 : vector<2x512xf32>
    %275 = vector.broadcast %3 : vector<1x512xf32> to vector<2x512xf32>
    %276 = arith.addf %274, %275 : vector<2x512xf32>
    %cst_51 = arith.constant dense<0.000000e+00> : vector<2x512xf32>
    %277 = tpu.matmul %239, %2, %cst_51 {dimension_numbers = #tpu.dot_dimension_numbers<[1], [0], [0], [1], [0, 0, 1, 1], [], []>} : vector<2x128xbf16>, vector<128x512xbf16>, vector<2x512xf32> -> vector<2x512xf32>
    %278 = arith.addf %276, %277 : vector<2x512xf32>
    %279 = vector.extract_strided_slice %278 {offsets = [0, 0], sizes = [2, 128], strides = [1, 1]} : vector<2x512xf32> to vector<2x128xf32>
    %280 = arith.negf %279 : vector<2x128xf32>
    %281 = math.exp %280 : vector<2x128xf32>
    %cst_52 = arith.constant 1.000000e+00 : f32
    %282 = vector.broadcast %cst_52 : f32 to vector<2x128xf32>
    %283 = arith.addf %282, %281 : vector<2x128xf32>
    %284 = arith.divf %282, %283 : vector<2x128xf32>
    %285 = vector.extract_strided_slice %278 {offsets = [0, 128], sizes = [2, 128], strides = [1, 1]} : vector<2x512xf32> to vector<2x128xf32>
    %286 = arith.negf %285 : vector<2x128xf32>
    %287 = math.exp %286 : vector<2x128xf32>
    %cst_53 = arith.constant 1.000000e+00 : f32
    %288 = vector.broadcast %cst_53 : f32 to vector<2x128xf32>
    %289 = arith.addf %288, %287 : vector<2x128xf32>
    %290 = arith.divf %288, %289 : vector<2x128xf32>
    %291 = vector.extract_strided_slice %278 {offsets = [0, 256], sizes = [2, 128], strides = [1, 1]} : vector<2x512xf32> to vector<2x128xf32>
    %292 = math.tanh %291 : vector<2x128xf32>
    %293 = vector.extract_strided_slice %278 {offsets = [0, 384], sizes = [2, 128], strides = [1, 1]} : vector<2x512xf32> to vector<2x128xf32>
    %294 = arith.negf %293 : vector<2x128xf32>
    %295 = math.exp %294 : vector<2x128xf32>
    %cst_54 = arith.constant 1.000000e+00 : f32
    %296 = vector.broadcast %cst_54 : f32 to vector<2x128xf32>
    %297 = arith.addf %296, %295 : vector<2x128xf32>
    %298 = arith.divf %296, %297 : vector<2x128xf32>
    %299 = arith.mulf %290, %236 : vector<2x128xf32>
    %300 = arith.mulf %284, %292 : vector<2x128xf32>
    %301 = arith.addf %299, %300 : vector<2x128xf32>
    %302 = math.tanh %301 : vector<2x128xf32>
    %303 = arith.mulf %298, %302 : vector<2x128xf32>
    %304 = arith.truncf %303 : vector<2x128xf32> to vector<2x128xbf16>
    %cst_55 = arith.constant dense<0.000000e+00> : vector<2x512xf32>
    %305 = tpu.matmul %304, %4, %cst_55 {dimension_numbers = #tpu.dot_dimension_numbers<[1], [0], [0], [1], [0, 0, 1, 1], [], []>} : vector<2x128xbf16>, vector<128x512xbf16>, vector<2x512xf32> -> vector<2x512xf32>
    %306 = arith.addf %305, %270 : vector<2x512xf32>
    %307 = vector.extract_strided_slice %306 {offsets = [0, 0], sizes = [2, 128], strides = [1, 1]} : vector<2x512xf32> to vector<2x128xf32>
    %308 = arith.negf %307 : vector<2x128xf32>
    %309 = math.exp %308 : vector<2x128xf32>
    %cst_56 = arith.constant 1.000000e+00 : f32
    %310 = vector.broadcast %cst_56 : f32 to vector<2x128xf32>
    %311 = arith.addf %310, %309 : vector<2x128xf32>
    %312 = arith.divf %310, %311 : vector<2x128xf32>
    %313 = vector.extract_strided_slice %306 {offsets = [0, 128], sizes = [2, 128], strides = [1, 1]} : vector<2x512xf32> to vector<2x128xf32>
    %314 = arith.negf %313 : vector<2x128xf32>
    %315 = math.exp %314 : vector<2x128xf32>
    %cst_57 = arith.constant 1.000000e+00 : f32
    %316 = vector.broadcast %cst_57 : f32 to vector<2x128xf32>
    %317 = arith.addf %316, %315 : vector<2x128xf32>
    %318 = arith.divf %316, %317 : vector<2x128xf32>
    %319 = vector.extract_strided_slice %306 {offsets = [0, 256], sizes = [2, 128], strides = [1, 1]} : vector<2x512xf32> to vector<2x128xf32>
    %320 = math.tanh %319 : vector<2x128xf32>
    %321 = vector.extract_strided_slice %306 {offsets = [0, 384], sizes = [2, 128], strides = [1, 1]} : vector<2x512xf32> to vector<2x128xf32>
    %322 = arith.negf %321 : vector<2x128xf32>
    %323 = math.exp %322 : vector<2x128xf32>
    %cst_58 = arith.constant 1.000000e+00 : f32
    %324 = vector.broadcast %cst_58 : f32 to vector<2x128xf32>
    %325 = arith.addf %324, %323 : vector<2x128xf32>
    %326 = arith.divf %324, %325 : vector<2x128xf32>
    %327 = arith.mulf %318, %264 : vector<2x128xf32>
    %328 = arith.mulf %312, %320 : vector<2x128xf32>
    %329 = arith.addf %327, %328 : vector<2x128xf32>
    %330 = math.tanh %329 : vector<2x128xf32>
    %331 = arith.mulf %326, %330 : vector<2x128xf32>
    %332 = arith.truncf %331 : vector<2x128xf32> to vector<2x128xbf16>
    %cst_59 = arith.constant dense<0.000000e+00> : vector<2x512xf32>
    %333 = tpu.matmul %332, %5, %cst_59 {dimension_numbers = #tpu.dot_dimension_numbers<[1], [0], [0], [1], [0, 0, 1, 1], [], []>} : vector<2x128xbf16>, vector<128x512xbf16>, vector<2x512xf32> -> vector<2x512xf32>
    %334 = vector.broadcast %6 : vector<1x512xf32> to vector<2x512xf32>
    %335 = arith.addf %333, %334 : vector<2x512xf32>
    %336 = vector.extract_strided_slice %0 {offsets = [0, 5], sizes = [2, 1], strides = [1, 1]} : vector<2x8xf32> to vector<2x1xf32>
    %337 = vector.broadcast %336 : vector<2x1xf32> to vector<2x512xf32>
    %338 = vector.broadcast %1 : vector<1x512xf32> to vector<2x512xf32>
    %339 = arith.mulf %337, %338 : vector<2x512xf32>
    %340 = vector.broadcast %3 : vector<1x512xf32> to vector<2x512xf32>
    %341 = arith.addf %339, %340 : vector<2x512xf32>
    %cst_60 = arith.constant dense<0.000000e+00> : vector<2x512xf32>
    %342 = tpu.matmul %304, %2, %cst_60 {dimension_numbers = #tpu.dot_dimension_numbers<[1], [0], [0], [1], [0, 0, 1, 1], [], []>} : vector<2x128xbf16>, vector<128x512xbf16>, vector<2x512xf32> -> vector<2x512xf32>
    %343 = arith.addf %341, %342 : vector<2x512xf32>
    %344 = vector.extract_strided_slice %343 {offsets = [0, 0], sizes = [2, 128], strides = [1, 1]} : vector<2x512xf32> to vector<2x128xf32>
    %345 = arith.negf %344 : vector<2x128xf32>
    %346 = math.exp %345 : vector<2x128xf32>
    %cst_61 = arith.constant 1.000000e+00 : f32
    %347 = vector.broadcast %cst_61 : f32 to vector<2x128xf32>
    %348 = arith.addf %347, %346 : vector<2x128xf32>
    %349 = arith.divf %347, %348 : vector<2x128xf32>
    %350 = vector.extract_strided_slice %343 {offsets = [0, 128], sizes = [2, 128], strides = [1, 1]} : vector<2x512xf32> to vector<2x128xf32>
    %351 = arith.negf %350 : vector<2x128xf32>
    %352 = math.exp %351 : vector<2x128xf32>
    %cst_62 = arith.constant 1.000000e+00 : f32
    %353 = vector.broadcast %cst_62 : f32 to vector<2x128xf32>
    %354 = arith.addf %353, %352 : vector<2x128xf32>
    %355 = arith.divf %353, %354 : vector<2x128xf32>
    %356 = vector.extract_strided_slice %343 {offsets = [0, 256], sizes = [2, 128], strides = [1, 1]} : vector<2x512xf32> to vector<2x128xf32>
    %357 = math.tanh %356 : vector<2x128xf32>
    %358 = vector.extract_strided_slice %343 {offsets = [0, 384], sizes = [2, 128], strides = [1, 1]} : vector<2x512xf32> to vector<2x128xf32>
    %359 = arith.negf %358 : vector<2x128xf32>
    %360 = math.exp %359 : vector<2x128xf32>
    %cst_63 = arith.constant 1.000000e+00 : f32
    %361 = vector.broadcast %cst_63 : f32 to vector<2x128xf32>
    %362 = arith.addf %361, %360 : vector<2x128xf32>
    %363 = arith.divf %361, %362 : vector<2x128xf32>
    %364 = arith.mulf %355, %301 : vector<2x128xf32>
    %365 = arith.mulf %349, %357 : vector<2x128xf32>
    %366 = arith.addf %364, %365 : vector<2x128xf32>
    %367 = math.tanh %366 : vector<2x128xf32>
    %368 = arith.mulf %363, %367 : vector<2x128xf32>
    %369 = arith.truncf %368 : vector<2x128xf32> to vector<2x128xbf16>
    %cst_64 = arith.constant dense<0.000000e+00> : vector<2x512xf32>
    %370 = tpu.matmul %369, %4, %cst_64 {dimension_numbers = #tpu.dot_dimension_numbers<[1], [0], [0], [1], [0, 0, 1, 1], [], []>} : vector<2x128xbf16>, vector<128x512xbf16>, vector<2x512xf32> -> vector<2x512xf32>
    %371 = arith.addf %370, %335 : vector<2x512xf32>
    %372 = vector.extract_strided_slice %371 {offsets = [0, 0], sizes = [2, 128], strides = [1, 1]} : vector<2x512xf32> to vector<2x128xf32>
    %373 = arith.negf %372 : vector<2x128xf32>
    %374 = math.exp %373 : vector<2x128xf32>
    %cst_65 = arith.constant 1.000000e+00 : f32
    %375 = vector.broadcast %cst_65 : f32 to vector<2x128xf32>
    %376 = arith.addf %375, %374 : vector<2x128xf32>
    %377 = arith.divf %375, %376 : vector<2x128xf32>
    %378 = vector.extract_strided_slice %371 {offsets = [0, 128], sizes = [2, 128], strides = [1, 1]} : vector<2x512xf32> to vector<2x128xf32>
    %379 = arith.negf %378 : vector<2x128xf32>
    %380 = math.exp %379 : vector<2x128xf32>
    %cst_66 = arith.constant 1.000000e+00 : f32
    %381 = vector.broadcast %cst_66 : f32 to vector<2x128xf32>
    %382 = arith.addf %381, %380 : vector<2x128xf32>
    %383 = arith.divf %381, %382 : vector<2x128xf32>
    %384 = vector.extract_strided_slice %371 {offsets = [0, 256], sizes = [2, 128], strides = [1, 1]} : vector<2x512xf32> to vector<2x128xf32>
    %385 = math.tanh %384 : vector<2x128xf32>
    %386 = vector.extract_strided_slice %371 {offsets = [0, 384], sizes = [2, 128], strides = [1, 1]} : vector<2x512xf32> to vector<2x128xf32>
    %387 = arith.negf %386 : vector<2x128xf32>
    %388 = math.exp %387 : vector<2x128xf32>
    %cst_67 = arith.constant 1.000000e+00 : f32
    %389 = vector.broadcast %cst_67 : f32 to vector<2x128xf32>
    %390 = arith.addf %389, %388 : vector<2x128xf32>
    %391 = arith.divf %389, %390 : vector<2x128xf32>
    %392 = arith.mulf %383, %329 : vector<2x128xf32>
    %393 = arith.mulf %377, %385 : vector<2x128xf32>
    %394 = arith.addf %392, %393 : vector<2x128xf32>
    %395 = math.tanh %394 : vector<2x128xf32>
    %396 = arith.mulf %391, %395 : vector<2x128xf32>
    %397 = arith.truncf %396 : vector<2x128xf32> to vector<2x128xbf16>
    %cst_68 = arith.constant dense<0.000000e+00> : vector<2x512xf32>
    %398 = tpu.matmul %397, %5, %cst_68 {dimension_numbers = #tpu.dot_dimension_numbers<[1], [0], [0], [1], [0, 0, 1, 1], [], []>} : vector<2x128xbf16>, vector<128x512xbf16>, vector<2x512xf32> -> vector<2x512xf32>
    %399 = vector.broadcast %6 : vector<1x512xf32> to vector<2x512xf32>
    %400 = arith.addf %398, %399 : vector<2x512xf32>
    %401 = vector.extract_strided_slice %0 {offsets = [0, 6], sizes = [2, 1], strides = [1, 1]} : vector<2x8xf32> to vector<2x1xf32>
    %402 = vector.broadcast %401 : vector<2x1xf32> to vector<2x512xf32>
    %403 = vector.broadcast %1 : vector<1x512xf32> to vector<2x512xf32>
    %404 = arith.mulf %402, %403 : vector<2x512xf32>
    %405 = vector.broadcast %3 : vector<1x512xf32> to vector<2x512xf32>
    %406 = arith.addf %404, %405 : vector<2x512xf32>
    %cst_69 = arith.constant dense<0.000000e+00> : vector<2x512xf32>
    %407 = tpu.matmul %369, %2, %cst_69 {dimension_numbers = #tpu.dot_dimension_numbers<[1], [0], [0], [1], [0, 0, 1, 1], [], []>} : vector<2x128xbf16>, vector<128x512xbf16>, vector<2x512xf32> -> vector<2x512xf32>
    %408 = arith.addf %406, %407 : vector<2x512xf32>
    %409 = vector.extract_strided_slice %408 {offsets = [0, 0], sizes = [2, 128], strides = [1, 1]} : vector<2x512xf32> to vector<2x128xf32>
    %410 = arith.negf %409 : vector<2x128xf32>
    %411 = math.exp %410 : vector<2x128xf32>
    %cst_70 = arith.constant 1.000000e+00 : f32
    %412 = vector.broadcast %cst_70 : f32 to vector<2x128xf32>
    %413 = arith.addf %412, %411 : vector<2x128xf32>
    %414 = arith.divf %412, %413 : vector<2x128xf32>
    %415 = vector.extract_strided_slice %408 {offsets = [0, 128], sizes = [2, 128], strides = [1, 1]} : vector<2x512xf32> to vector<2x128xf32>
    %416 = arith.negf %415 : vector<2x128xf32>
    %417 = math.exp %416 : vector<2x128xf32>
    %cst_71 = arith.constant 1.000000e+00 : f32
    %418 = vector.broadcast %cst_71 : f32 to vector<2x128xf32>
    %419 = arith.addf %418, %417 : vector<2x128xf32>
    %420 = arith.divf %418, %419 : vector<2x128xf32>
    %421 = vector.extract_strided_slice %408 {offsets = [0, 256], sizes = [2, 128], strides = [1, 1]} : vector<2x512xf32> to vector<2x128xf32>
    %422 = math.tanh %421 : vector<2x128xf32>
    %423 = vector.extract_strided_slice %408 {offsets = [0, 384], sizes = [2, 128], strides = [1, 1]} : vector<2x512xf32> to vector<2x128xf32>
    %424 = arith.negf %423 : vector<2x128xf32>
    %425 = math.exp %424 : vector<2x128xf32>
    %cst_72 = arith.constant 1.000000e+00 : f32
    %426 = vector.broadcast %cst_72 : f32 to vector<2x128xf32>
    %427 = arith.addf %426, %425 : vector<2x128xf32>
    %428 = arith.divf %426, %427 : vector<2x128xf32>
    %429 = arith.mulf %420, %366 : vector<2x128xf32>
    %430 = arith.mulf %414, %422 : vector<2x128xf32>
    %431 = arith.addf %429, %430 : vector<2x128xf32>
    %432 = math.tanh %431 : vector<2x128xf32>
    %433 = arith.mulf %428, %432 : vector<2x128xf32>
    %434 = arith.truncf %433 : vector<2x128xf32> to vector<2x128xbf16>
    %cst_73 = arith.constant dense<0.000000e+00> : vector<2x512xf32>
    %435 = tpu.matmul %434, %4, %cst_73 {dimension_numbers = #tpu.dot_dimension_numbers<[1], [0], [0], [1], [0, 0, 1, 1], [], []>} : vector<2x128xbf16>, vector<128x512xbf16>, vector<2x512xf32> -> vector<2x512xf32>
    %436 = arith.addf %435, %400 : vector<2x512xf32>
    %437 = vector.extract_strided_slice %436 {offsets = [0, 0], sizes = [2, 128], strides = [1, 1]} : vector<2x512xf32> to vector<2x128xf32>
    %438 = arith.negf %437 : vector<2x128xf32>
    %439 = math.exp %438 : vector<2x128xf32>
    %cst_74 = arith.constant 1.000000e+00 : f32
    %440 = vector.broadcast %cst_74 : f32 to vector<2x128xf32>
    %441 = arith.addf %440, %439 : vector<2x128xf32>
    %442 = arith.divf %440, %441 : vector<2x128xf32>
    %443 = vector.extract_strided_slice %436 {offsets = [0, 128], sizes = [2, 128], strides = [1, 1]} : vector<2x512xf32> to vector<2x128xf32>
    %444 = arith.negf %443 : vector<2x128xf32>
    %445 = math.exp %444 : vector<2x128xf32>
    %cst_75 = arith.constant 1.000000e+00 : f32
    %446 = vector.broadcast %cst_75 : f32 to vector<2x128xf32>
    %447 = arith.addf %446, %445 : vector<2x128xf32>
    %448 = arith.divf %446, %447 : vector<2x128xf32>
    %449 = vector.extract_strided_slice %436 {offsets = [0, 256], sizes = [2, 128], strides = [1, 1]} : vector<2x512xf32> to vector<2x128xf32>
    %450 = math.tanh %449 : vector<2x128xf32>
    %451 = vector.extract_strided_slice %436 {offsets = [0, 384], sizes = [2, 128], strides = [1, 1]} : vector<2x512xf32> to vector<2x128xf32>
    %452 = arith.negf %451 : vector<2x128xf32>
    %453 = math.exp %452 : vector<2x128xf32>
    %cst_76 = arith.constant 1.000000e+00 : f32
    %454 = vector.broadcast %cst_76 : f32 to vector<2x128xf32>
    %455 = arith.addf %454, %453 : vector<2x128xf32>
    %456 = arith.divf %454, %455 : vector<2x128xf32>
    %457 = arith.mulf %448, %394 : vector<2x128xf32>
    %458 = arith.mulf %442, %450 : vector<2x128xf32>
    %459 = arith.addf %457, %458 : vector<2x128xf32>
    %460 = math.tanh %459 : vector<2x128xf32>
    %461 = arith.mulf %456, %460 : vector<2x128xf32>
    %462 = arith.truncf %461 : vector<2x128xf32> to vector<2x128xbf16>
    %cst_77 = arith.constant dense<0.000000e+00> : vector<2x512xf32>
    %463 = tpu.matmul %462, %5, %cst_77 {dimension_numbers = #tpu.dot_dimension_numbers<[1], [0], [0], [1], [0, 0, 1, 1], [], []>} : vector<2x128xbf16>, vector<128x512xbf16>, vector<2x512xf32> -> vector<2x512xf32>
    %464 = vector.broadcast %6 : vector<1x512xf32> to vector<2x512xf32>
    %465 = arith.addf %463, %464 : vector<2x512xf32>
    %466 = vector.extract_strided_slice %0 {offsets = [0, 7], sizes = [2, 1], strides = [1, 1]} : vector<2x8xf32> to vector<2x1xf32>
    %467 = vector.broadcast %466 : vector<2x1xf32> to vector<2x512xf32>
    %468 = vector.broadcast %1 : vector<1x512xf32> to vector<2x512xf32>
    %469 = arith.mulf %467, %468 : vector<2x512xf32>
    %470 = vector.broadcast %3 : vector<1x512xf32> to vector<2x512xf32>
    %471 = arith.addf %469, %470 : vector<2x512xf32>
    %cst_78 = arith.constant dense<0.000000e+00> : vector<2x512xf32>
    %472 = tpu.matmul %434, %2, %cst_78 {dimension_numbers = #tpu.dot_dimension_numbers<[1], [0], [0], [1], [0, 0, 1, 1], [], []>} : vector<2x128xbf16>, vector<128x512xbf16>, vector<2x512xf32> -> vector<2x512xf32>
    %473 = arith.addf %471, %472 : vector<2x512xf32>
    %474 = vector.extract_strided_slice %473 {offsets = [0, 0], sizes = [2, 128], strides = [1, 1]} : vector<2x512xf32> to vector<2x128xf32>
    %475 = arith.negf %474 : vector<2x128xf32>
    %476 = math.exp %475 : vector<2x128xf32>
    %cst_79 = arith.constant 1.000000e+00 : f32
    %477 = vector.broadcast %cst_79 : f32 to vector<2x128xf32>
    %478 = arith.addf %477, %476 : vector<2x128xf32>
    %479 = arith.divf %477, %478 : vector<2x128xf32>
    %480 = vector.extract_strided_slice %473 {offsets = [0, 128], sizes = [2, 128], strides = [1, 1]} : vector<2x512xf32> to vector<2x128xf32>
    %481 = arith.negf %480 : vector<2x128xf32>
    %482 = math.exp %481 : vector<2x128xf32>
    %cst_80 = arith.constant 1.000000e+00 : f32
    %483 = vector.broadcast %cst_80 : f32 to vector<2x128xf32>
    %484 = arith.addf %483, %482 : vector<2x128xf32>
    %485 = arith.divf %483, %484 : vector<2x128xf32>
    %486 = vector.extract_strided_slice %473 {offsets = [0, 256], sizes = [2, 128], strides = [1, 1]} : vector<2x512xf32> to vector<2x128xf32>
    %487 = math.tanh %486 : vector<2x128xf32>
    %488 = vector.extract_strided_slice %473 {offsets = [0, 384], sizes = [2, 128], strides = [1, 1]} : vector<2x512xf32> to vector<2x128xf32>
    %489 = arith.negf %488 : vector<2x128xf32>
    %490 = math.exp %489 : vector<2x128xf32>
    %cst_81 = arith.constant 1.000000e+00 : f32
    %491 = vector.broadcast %cst_81 : f32 to vector<2x128xf32>
    %492 = arith.addf %491, %490 : vector<2x128xf32>
    %493 = arith.divf %491, %492 : vector<2x128xf32>
    %494 = arith.mulf %485, %431 : vector<2x128xf32>
    %495 = arith.mulf %479, %487 : vector<2x128xf32>
    %496 = arith.addf %494, %495 : vector<2x128xf32>
    %497 = math.tanh %496 : vector<2x128xf32>
    %498 = arith.mulf %493, %497 : vector<2x128xf32>
    %499 = arith.truncf %498 : vector<2x128xf32> to vector<2x128xbf16>
    %cst_82 = arith.constant dense<0.000000e+00> : vector<2x512xf32>
    %500 = tpu.matmul %499, %4, %cst_82 {dimension_numbers = #tpu.dot_dimension_numbers<[1], [0], [0], [1], [0, 0, 1, 1], [], []>} : vector<2x128xbf16>, vector<128x512xbf16>, vector<2x512xf32> -> vector<2x512xf32>
    %501 = arith.addf %500, %465 : vector<2x512xf32>
    %502 = vector.extract_strided_slice %501 {offsets = [0, 0], sizes = [2, 128], strides = [1, 1]} : vector<2x512xf32> to vector<2x128xf32>
    %503 = arith.negf %502 : vector<2x128xf32>
    %504 = math.exp %503 : vector<2x128xf32>
    %cst_83 = arith.constant 1.000000e+00 : f32
    %505 = vector.broadcast %cst_83 : f32 to vector<2x128xf32>
    %506 = arith.addf %505, %504 : vector<2x128xf32>
    %507 = arith.divf %505, %506 : vector<2x128xf32>
    %508 = vector.extract_strided_slice %501 {offsets = [0, 128], sizes = [2, 128], strides = [1, 1]} : vector<2x512xf32> to vector<2x128xf32>
    %509 = arith.negf %508 : vector<2x128xf32>
    %510 = math.exp %509 : vector<2x128xf32>
    %cst_84 = arith.constant 1.000000e+00 : f32
    %511 = vector.broadcast %cst_84 : f32 to vector<2x128xf32>
    %512 = arith.addf %511, %510 : vector<2x128xf32>
    %513 = arith.divf %511, %512 : vector<2x128xf32>
    %514 = vector.extract_strided_slice %501 {offsets = [0, 256], sizes = [2, 128], strides = [1, 1]} : vector<2x512xf32> to vector<2x128xf32>
    %515 = math.tanh %514 : vector<2x128xf32>
    %516 = vector.extract_strided_slice %501 {offsets = [0, 384], sizes = [2, 128], strides = [1, 1]} : vector<2x512xf32> to vector<2x128xf32>
    %517 = arith.negf %516 : vector<2x128xf32>
    %518 = math.exp %517 : vector<2x128xf32>
    %cst_85 = arith.constant 1.000000e+00 : f32
    %519 = vector.broadcast %cst_85 : f32 to vector<2x128xf32>
    %520 = arith.addf %519, %518 : vector<2x128xf32>
    %521 = arith.divf %519, %520 : vector<2x128xf32>
    %522 = arith.mulf %513, %459 : vector<2x128xf32>
    %523 = arith.mulf %507, %515 : vector<2x128xf32>
    %524 = arith.addf %522, %523 : vector<2x128xf32>
    %525 = math.tanh %524 : vector<2x128xf32>
    %526 = arith.mulf %521, %525 : vector<2x128xf32>
    %527 = arith.truncf %526 : vector<2x128xf32> to vector<2x128xbf16>
    %c0_86 = arith.constant 0 : index
    %c0_87 = arith.constant 0 : index
    %528 = vector.load %arg7[%c0_86, %c0_87] : memref<128x128xbf16, #tpu.memory_space<vmem>>, vector<128x128xbf16>
    %cst_88 = arith.constant dense<0.000000e+00> : vector<2x128xf32>
    %529 = tpu.matmul %527, %528, %cst_88 {dimension_numbers = #tpu.dot_dimension_numbers<[1], [0], [0], [1], [0, 0, 1, 1], [], []>} : vector<2x128xbf16>, vector<128x128xbf16>, vector<2x128xf32> -> vector<2x128xf32>
    %c0_89 = arith.constant 0 : index
    %c0_90 = arith.constant 0 : index
    %530 = vector.load %arg8[%c0_89, %c0_90] : memref<1x128xf32, #tpu.memory_space<vmem>>, vector<1x128xf32>
    %531 = vector.broadcast %530 : vector<1x128xf32> to vector<2x128xf32>
    %532 = arith.addf %529, %531 : vector<2x128xf32>
    %533 = math.tanh %532 : vector<2x128xf32>
    %534 = arith.truncf %533 : vector<2x128xf32> to vector<2x128xbf16>
    %c0_91 = arith.constant 0 : index
    %c0_92 = arith.constant 0 : index
    %535 = vector.load %arg9[%c0_91, %c0_92] : memref<128x128xbf16, #tpu.memory_space<vmem>>, vector<128x128xbf16>
    %cst_93 = arith.constant dense<0.000000e+00> : vector<2x128xf32>
    %536 = tpu.matmul %534, %535, %cst_93 {dimension_numbers = #tpu.dot_dimension_numbers<[1], [0], [0], [1], [0, 0, 1, 1], [], []>} : vector<2x128xbf16>, vector<128x128xbf16>, vector<2x128xf32> -> vector<2x128xf32>
    %c0_94 = arith.constant 0 : index
    %c0_95 = arith.constant 0 : index
    %537 = vector.load %arg10[%c0_94, %c0_95] : memref<1x128xf32, #tpu.memory_space<vmem>>, vector<1x128xf32>
    %538 = vector.broadcast %537 : vector<1x128xf32> to vector<2x128xf32>
    %539 = arith.addf %536, %538 : vector<2x128xf32>
    %540 = math.tanh %539 : vector<2x128xf32>
    %c0_96 = arith.constant 0 : index
    %c0_97 = arith.constant 0 : index
    %541 = vector.load %arg11[%c0_96, %c0_97] : memref<2x128xf32, #tpu.memory_space<vmem>>, vector<2x128xf32>
    tpu.vector_store %arg11[%c0_96, %c0_97], %540 {strides = array<i32>} : memref<2x128xf32, #tpu.memory_space<vmem>>, vector<2x128xf32>,
    return
  }
}

</mosaic_0001>

<bundles_post_ra>
// kernel: lstm_net_forward.1
= control target key start
LH: loop header
LB: loop body
LE: loop exit
PB: predicated region body
PF: predicated region fallthrough
CT: control target
= control target key end

     0   :  { %16 = vsyncpa [#allocation3], 0  ;;  %s6251_s0 = inlined_call_operand.hbm [shape: f32[2,8], index: 0, kind: input, shape index: {}]   ;;  %s6252_s1 = inlined_call_operand.vmem [shape: f32[1,512], index: 1, kind: input, shape index: {}]   ;;  %s6253_s2 = inlined_call_operand.hbm [shape: bf16[128,512], index: 2, kind: input, shape index: {}]   ;;  %s6254_s3 = inlined_call_operand.hbm [shape: f32[1,512], index: 3, kind: input, shape index: {}]   ;;  %s6255_s4 = inlined_call_operand.hbm [shape: bf16[128,512], index: 4, kind: input, shape index: {}]   ;;  %s6256_s5 = inlined_call_operand.hbm [shape: bf16[128,512], index: 5, kind: input, shape index: {}]   ;;  %s6257_s6 = inlined_call_operand.hbm [shape: f32[1,512], index: 6, kind: input, shape index: {}]   ;;  %s6258_s7 = inlined_call_operand.hbm [shape: bf16[128,128], index: 7, kind: input, shape index: {}]   ;;  %s6259_s8 = inlined_call_operand.vmem [shape: f32[1,128], index: 8, kind: input, shape index: {}]   ;;  %s6260_s9 = inlined_call_operand.hbm [shape: bf16[128,128], index: 9, kind: input, shape index: {}]   ;;  %s6261_s10 = inlined_call_operand.vmem [shape: f32[1,128], index: 10, kind: input, shape index: {}]   ;;  %s6262_s11 = inlined_call_operand.hbm [shape: f32[2,128], index: 11, kind: output, shape index: {}]  }
   0x1   :  { %17 = vsyncpa [#allocation6], 0 }
   0x2   :  { %18 = vsyncpa [#allocation9], 0 }
   0x3   :  { %19 = vsyncpa [#allocation12], 0 }
   0x4   :  { %20 = vsyncpa [#allocation15], 0 }
   0x5   :  { %21 = vsyncpa [#allocation4], 0  ;;  %s4504_s17 = smov [#allocation5]  }
   0x6   :  { %s39_s18 = sshll.u32 %s4504_s17, 4  ;;  %s40_s18 = int_to_ptr.vmem [resolvable:$true] %s39_s18 }
   0x7   :  { %s4320_s19 = scalar_lea.vmem %s40_s18, 4096  ;;  %p4325_p1 = scmp.lt.s32.totalorder %s40_s18, %s40_s18 }
   0x8   :  { %p4321_p0 = scmp.ne.s32.totalorder %s40_s18, %s4320_s19  ;;  %p4326_p2 = scmp.lt.s32.totalorder %s4320_s19, %s4320_s19 }
   0xa   :  { %p4327_p3 = por %p4326_p2, %p4325_p1 }
   0xc   :  { %p4328_p4 = pnand %p4327_p3, %p4321_p0 }
   0xe   :  { %4331 = shalt.err (!%p4328_p4)
}
   0xf   :  { %s4505_s20 = smov 256   ;;  %s4506_s21 = smov 16  }
  0x10   :  { %45 = dma.hbm_to_vmem [thread:$0]  %s6253_s2, 4096, %s40_s18, [#allocation6], %s4505_s20, %s4505_s20, %s4506_s21  }
  0x11   :  { %s4507_s24 = smov [#allocation8]   ;;  %s4508_s26 = smov [#allocation11]  }
  0x12   :  { %s61_s25 = sshll.u32 %s4507_s24, 4  ;;  %s86_s27 = sshll.u32 %s4508_s26, 4  ;;  %s62_s25 = int_to_ptr.vmem [resolvable:$true] %s61_s25  ;;  %s87_s27 = int_to_ptr.vmem [resolvable:$true] %s86_s27 }
  0x13   :  { %s4340_s28 = scalar_lea.vmem %s62_s25, 4096  ;;  %p4345_p6 = scmp.lt.s32.totalorder %s62_s25, %s62_s25 }
  0x14   :  { %p4341_p5 = scmp.ne.s32.totalorder %s62_s25, %s4340_s28  ;;  %p4346_p7 = scmp.lt.s32.totalorder %s4340_s28, %s4340_s28 }
  0x16   :  { %p4347_p8 = por %p4346_p7, %p4345_p6 }
  0x18   :  { %p4348_p9 = pnand %p4347_p8, %p4341_p5 }
  0x1a   :  { %4351 = shalt.err (!%p4348_p9)
}
  0x1b   :  { %67 = dma.hbm_to_vmem [thread:$0]  %s6255_s4, 4096, %s62_s25, [#allocation9], %s4505_s20, %s4505_s20, %s4506_s21  }
  0x1c   :  { %s4360_s2 = scalar_lea.vmem %s87_s27, 64  ;;  %p4365_p11 = scmp.lt.s32.totalorder %s87_s27, %s87_s27 }
  0x1d   :  { %p4361_p10 = scmp.ne.s32.totalorder %s87_s27, %s4360_s2  ;;  %p4366_p12 = scmp.lt.s32.totalorder %s4360_s2, %s4360_s2 }
  0x1f   :  { %p4367_p13 = por %p4366_p12, %p4365_p11 }
  0x21   :  { %p4368_p0 = pnand %p4367_p13, %p4361_p10 }
  0x23   :  { %4371 = shalt.err (!%p4368_p0)
}
  0x24   :  { %89 = dma.hbm_to_vmem [thread:$0]  %s6257_s6, 64, %s87_s27, [#allocation12]  }
  0x25   :  { %s4509_s14 = smov [#allocation2]   ;;  %s4510_s16 = smov [#allocation7]  }
  0x26   :  { %s28_s15 = sshll.u32 %s4509_s14, 4  ;;  %s52_s17 = sshll.u32 %s4510_s16, 4  ;;  %s29_s15 = int_to_ptr.vmem [resolvable:$true] %s28_s15  ;;  %s53_s17 = int_to_ptr.vmem [resolvable:$true] %s52_s17 }
  0x27   :  { %s4380_s18 = scalar_lea.vmem %s29_s15, 32  ;;  %p4385_p2 = scmp.lt.s32.totalorder %s29_s15, %s29_s15 }
  0x28   :  { %p4381_p1 = scmp.ne.s32.totalorder %s29_s15, %s4380_s18  ;;  %p4386_p3 = scmp.lt.s32.totalorder %s4380_s18, %s4380_s18 }
  0x2a   :  { %p4387_p4 = por %p4386_p3, %p4385_p2 }
  0x2c   :  { %p4388_p5 = pnand %p4387_p4, %p4381_p1 }
  0x2e   :  { %4391 = shalt.err (!%p4388_p5)
}
  0x2f   :  { %31 = dma.hbm_to_vmem [thread:$0]  %s6251_s0, 32, %s29_s15, [#allocation3]  }
  0x30   :  { %s4400_s22 = scalar_lea.vmem %s53_s17, 64  ;;  %p4405_p7 = scmp.lt.s32.totalorder %s53_s17, %s53_s17 }
  0x31   :  { %p4401_p6 = scmp.ne.s32.totalorder %s53_s17, %s4400_s22  ;;  %p4406_p8 = scmp.lt.s32.totalorder %s4400_s22, %s4400_s22 }
  0x33   :  { %p4407_p9 = por %p4406_p8, %p4405_p7 }
  0x35   :  { %p4408_p10 = pnand %p4407_p9, %p4401_p6 }
  0x37   :  { %4411 = shalt.err (!%p4408_p10)
}
  0x38   :  { %55 = dma.hbm_to_vmem [thread:$0]  %s6254_s3, 64, %s53_s17, [#allocation6]  }
  0x39   :  { %s4511_s24 = smov [#allocation10]   ;;  %s4512_s26 = smov [#allocation13]  }
  0x3a   :  { %s73_s25 = sshll.u32 %s4511_s24, 4  ;;  %s95_s27 = sshll.u32 %s4512_s26, 4  ;;  %s74_s25 = int_to_ptr.vmem [resolvable:$true] %s73_s25  ;;  %s96_s27 = int_to_ptr.vmem [resolvable:$true] %s95_s27 }
  0x3b   :  { %s4420_s28 = scalar_lea.vmem %s74_s25, 4096  ;;  %p4425_p12 = scmp.lt.s32.totalorder %s74_s25, %s74_s25 }
  0x3c   :  { %p4421_p11 = scmp.ne.s32.totalorder %s74_s25, %s4420_s28  ;;  %p4426_p13 = scmp.lt.s32.totalorder %s4420_s28, %s4420_s28 }
  0x3e   :  { %p4427_p0 = por %p4426_p13, %p4425_p12 }
  0x40   :  { %p4428_p1 = pnand %p4427_p0, %p4421_p11 }
  0x42   :  { %4431 = shalt.err (!%p4428_p1)
}
  0x43   :  { %79 = dma.hbm_to_vmem [thread:$0]  %s6256_s5, 4096, %s74_s25, [#allocation9], %s4505_s20, %s4505_s20, %s4506_s21  }
  0x44   :  { %s4440_s3 = scalar_lea.vmem %s96_s27, 1024  ;;  %p4445_p3 = scmp.lt.s32.totalorder %s96_s27, %s96_s27 }
  0x45   :  { %p4441_p2 = scmp.ne.s32.totalorder %s96_s27, %s4440_s3  ;;  %p4446_p4 = scmp.lt.s32.totalorder %s4440_s3, %s4440_s3 }
  0x47   :  { %p4447_p5 = por %p4446_p4, %p4445_p3 }
  0x49   :  { %p4448_p6 = pnand %p4447_p5, %p4441_p2 }
  0x4b   :  { %4451 = shalt.err (!%p4448_p6)
}
  0x4c   :  { %s4513_s30 = smov 64   ;;  %s4514_s2 = smov 4  }
  0x4d   :  { %101 = dma.hbm_to_vmem [thread:$0]  %s6258_s7, 1024, %s96_s27, [#allocation12], %s4513_s30, %s4513_s30, %s4514_s2  }
  0x4e   :  { %s4515_s14 = smov [#allocation14]  }
  0x4f   :  { %s109_s15 = sshll.u32 %s4515_s14, 4  ;;  %s110_s15 = int_to_ptr.vmem [resolvable:$true] %s109_s15 }
  0x50   :  { %s4460_s16 = scalar_lea.vmem %s110_s15, 1024  ;;  %p4465_p8 = scmp.lt.s32.totalorder %s110_s15, %s110_s15 }
  0x51   :  { %p4461_p7 = scmp.ne.s32.totalorder %s110_s15, %s4460_s16  ;;  %p4466_p9 = scmp.lt.s32.totalorder %s4460_s16, %s4460_s16 }
  0x53   :  { %p4467_p10 = por %p4466_p9, %p4465_p8 }
  0x55   :  { %p4468_p11 = pnand %p4467_p10, %p4461_p7 }
  0x57   :  { %4471 = shalt.err (!%p4468_p11)
}
  0x58   :  { %115 = dma.hbm_to_vmem [thread:$0]  %s6260_s9, 1024, %s110_s15, [#allocation15], %s4513_s30, %s4513_s30, %s4514_s2  }
  0x59   :  { %4492 = dma.done.wait [#allocation3], 32  }
  0x5a   :  { %4493 = vsyncadd [#allocation3], 4294967264 }
  0x5b   :  { %4494 = dma.done.wait [#allocation6], 4160  }
  0x5c   :  { %4495 = vsyncadd [#allocation6], 4294963136 }
  0x5d   :  { %4496 = dma.done.wait [#allocation9], 8192  }
  0x5e   :  { %4497 = vsyncadd [#allocation9], 4294959104 }
  0x5f   :  { %4498 = dma.done.wait [#allocation12], 1088  }
  0x60   :  { %4499 = vsyncadd [#allocation12], 4294966208 }
  0x61   :  { %4500 = dma.done.wait [#allocation15], 1024  }
  0x62   :  { %4501 = vsyncadd [#allocation15], 4294966272  ;;  %v6263_v0 = vmov 0   ;;  %v4623_v1 = vld [vmem:[#allocation5 + $0xe4] ss:$16 sps:$4 sm:$0xff]   ;;  %vm4525_vm0 = vmmov 0  }
  0x63   :  { %490 = vmatprep.mubr.bf16.mxu0 %v6263_v0  ;;  %531 = vmatprep.mubr.bf16.mxu1 %v6263_v0  ;;  %v4625_v2 = vld [vmem:[#allocation5 + $0xec] ss:$16 sps:$4 sm:$0xff]   ;;  %v4628_v3 = vld [vmem:[#allocation5 + $0xe0] ss:$16 sps:$4 sm:$0xff]   ;;  %v4630_v4 = vld [vmem:[#allocation5 + $0xe8] ss:$16 sps:$4 sm:$0xff]  }
  0x64   :  { %3689 = vset.pattern.permute.xlu0 %v6263_v0  ;;  %458 = vmatprep.subr.bf16.mxu0 %v4623_v1  ;;  %v4633_v5 = vld [vmem:[#allocation5 + $0xc4] ss:$16 sps:$4 sm:$0xff]   ;;  %v4637_v6 = vld [vmem:[#allocation5 + $0xcc] ss:$16 sps:$4 sm:$0xff]   ;;  %v4639_v7 = vld [vmem:[#allocation5 + $0xc0] ss:$16 sps:$4 sm:$0xff]  }
  0x65   :  { %499 = vmatprep.subr.bf16.mxu1 %v4625_v2  ;;  %459 = vmatpush1.bf16.msra.mxu0 %v4628_v3  ;;  %v4642_v8 = vld [vmem:[#allocation5 + $0xc8] ss:$16 sps:$4 sm:$0xff]   ;;  %v4645_v9 = vld [vmem:[#allocation5 + $0xa4] ss:$16 sps:$4 sm:$0xff]   ;;  %v4647_v10 = vld [vmem:[#allocation5 + $0xac] ss:$16 sps:$4 sm:$0xff]  }
  0x66   :  { %500 = vmatpush1.bf16.msra.mxu1 %v4630_v4  ;;  %460 = vmatprep.subr.bf16.mxu0 %v4633_v5  ;;  %v4649_v11 = vld [vmem:[#allocation5 + $0xa0] ss:$16 sps:$4 sm:$0xff]   ;;  %v4651_v12 = vld [vmem:[#allocation5 + $0xa8] ss:$16 sps:$4 sm:$0xff]   ;;  %v4655_v13 = vld [vmem:[#allocation5 + $0x84] ss:$16 sps:$4 sm:$0xff]  }
  0x67   :  { %501 = vmatprep.subr.bf16.mxu1 %v4637_v6  ;;  %v4659_v14 = vld [vmem:[#allocation5 + $0x8c] ss:$16 sps:$4 sm:$0xff]   ;;  %v4661_v15 = vld [vmem:[#allocation5 + $0x80] ss:$16 sps:$4 sm:$0xff]   ;;  %v4665_v16 = vld [vmem:[#allocation5 + $0x88] ss:$16 sps:$4 sm:$0xff]  }
  0x68   :  { %v4667_v17 = vld [vmem:[#allocation5 + $0x64] ss:$16 sps:$4 sm:$0xff]   ;;  %v4671_v18 = vld [vmem:[#allocation5 + $0x6c] ss:$16 sps:$4 sm:$0xff]   ;;  %v4673_v19 = vld [vmem:[#allocation5 + $0x60] ss:$16 sps:$4 sm:$0xff]  }
  0x69   :  { %461 = vmatpush1.bf16.msra.mxu0 %v4639_v7  ;;  %v4675_v20 = vld [vmem:[#allocation5 + $0x68] ss:$16 sps:$4 sm:$0xff]   ;;  %v4679_v21 = vld [vmem:[#allocation5 + $0x44] ss:$16 sps:$4 sm:$0xff]   ;;  %v4683_v22 = vld [vmem:[#allocation5 + $0x4c] ss:$16 sps:$4 sm:$0xff]  }
  0x6a   :  { %502 = vmatpush1.bf16.msra.mxu1 %v4642_v8  ;;  %462 = vmatprep.subr.bf16.mxu0 %v4645_v9  ;;  %v4687_v23 = vld [vmem:[#allocation5 + $0x40] ss:$16 sps:$4 sm:$0xff]   ;;  %v4689_v24 = vld [vmem:[#allocation5 + $0x48] ss:$16 sps:$4 sm:$0xff]   ;;  %v4693_v25 = vld [vmem:[#allocation5 + $0x24] ss:$16 sps:$4 sm:$0xff]  }
  0x6b   :  { %503 = vmatprep.subr.bf16.mxu1 %v4647_v10  ;;  %v4695_v26 = vld [vmem:[#allocation5 + $0x2c] ss:$16 sps:$4 sm:$0xff]   ;;  %v4699_v28 = vld [vmem:[#allocation5 + $0x20] ss:$16 sps:$4 sm:$0xff]   ;;  %v4701_v29 = vld [vmem:[#allocation5 + $0x28] ss:$16 sps:$4 sm:$0xff]  }
  0x6c   :  { %v4697_v27 = vld [vmem:[#allocation2] sm:$0x3]  ;;  %v4704_v30 = vld [vmem:[#allocation5 + $0x4] ss:$16 sps:$4 sm:$0xff]   ;;  %v4712_v32 = vld [vmem:[#allocation5] ss:$16 sps:$4 sm:$0xff]  }
  0x6d   :  { %463 = vmatpush1.bf16.msra.mxu0 %v4649_v11  ;;  %245 = vperm.xlu0 %3689, %v4697_v27   ;;  %v4706_v31 = vld [vmem:[#allocation5 + $0xc] ss:$16 sps:$4 sm:$0xff]   ;;  %v4714_v33 = vld [vmem:[#allocation5 + $0x8] ss:$16 sps:$4 sm:$0xff]   ;;  %v4728_v35 = vld [vmem:[#allocation8 + $0xec] ss:$16 sps:$4 sm:$0xff]  }
  0x6e   :  { %504 = vmatpush1.bf16.msra.mxu1 %v4651_v12  ;;  %464 = vmatprep.subr.bf16.mxu0 %v4655_v13  ;;  %v4726_v34 = vld [vmem:[#allocation8 + $0xe4] ss:$16 sps:$4 sm:$0xff]   ;;  %v4730_v36 = vld [vmem:[#allocation8 + $0xe0] ss:$16 sps:$4 sm:$0xff]   ;;  %v4732_v37 = vld [vmem:[#allocation8 + $0xe8] ss:$16 sps:$4 sm:$0xff]  }
  0x6f   :  { %505 = vmatprep.subr.bf16.mxu1 %v4659_v14  ;;  %v4738_v38 = vld [vmem:[#allocation8 + $0xc4] ss:$16 sps:$4 sm:$0xff]   ;;  %v4740_v39 = vld [vmem:[#allocation8 + $0xcc] ss:$16 sps:$4 sm:$0xff]   ;;  %v4742_v40 = vld [vmem:[#allocation8 + $0xc0] ss:$16 sps:$4 sm:$0xff]  }
  0x70   :  { %6602 = vst [vmem:[#allocation23_spill] sm:$0xff] %v4742_v40  ;;  %v4744_v41 = vld [vmem:[#allocation8 + $0xc8] ss:$16 sps:$4 sm:$0xff]   ;;  %v4750_v42 = vld [vmem:[#allocation8 + $0xa4] ss:$16 sps:$4 sm:$0xff]  }
  0x71   :  { %465 = vmatpush1.bf16.msra.mxu0 %v4661_v15  ;;  %6603 = vst [vmem:[#allocation24_spill] sm:$0xff] %v4744_v41  ;;  %6604 = vst [vmem:[#allocation25_spill] sm:$0xff] %v4750_v42  ;;  %v4752_v43 = vld [vmem:[#allocation8 + $0xac] ss:$16 sps:$4 sm:$0xff]   ;;  %v4754_v44 = vld [vmem:[#allocation8 + $0xa0] ss:$16 sps:$4 sm:$0xff]  }
  0x72   :  { %506 = vmatpush1.bf16.msra.mxu1 %v4665_v16  ;;  %466 = vmatprep.subr.bf16.mxu0 %v4667_v17  ;;  %6605 = vst [vmem:[#allocation26_spill] sm:$0xff] %v4752_v43  ;;  %6606 = vst [vmem:[#allocation27_spill] sm:$0xff] %v4754_v44  ;;  %v4756_v45 = vld [vmem:[#allocation8 + $0xa8] ss:$16 sps:$4 sm:$0xff]   ;;  %v4762_v46 = vld [vmem:[#allocation8 + $0x84] ss:$16 sps:$4 sm:$0xff]  }
  0x73   :  { %507 = vmatprep.subr.bf16.mxu1 %v4671_v18  ;;  %6607 = vst [vmem:[#allocation28_spill] sm:$0xff] %v4756_v45  ;;  %6608 = vst [vmem:[#allocation29_spill] sm:$0xff] %v4762_v46  ;;  %v4764_v47 = vld [vmem:[#allocation8 + $0x8c] ss:$16 sps:$4 sm:$0xff]   ;;  %v4766_v48 = vld [vmem:[#allocation8 + $0x80] ss:$16 sps:$4 sm:$0xff]  }
  0x74   :  { %6609 = vst [vmem:[#allocation30_spill] sm:$0xff] %v4764_v47  ;;  %6610 = vst [vmem:[#allocation31_spill] sm:$0xff] %v4766_v48  ;;  %v4768_v49 = vld [vmem:[#allocation8 + $0x88] ss:$16 sps:$4 sm:$0xff]   ;;  %v4774_v50 = vld [vmem:[#allocation8 + $0x64] ss:$16 sps:$4 sm:$0xff]  }
  0x75   :  { %467 = vmatpush1.bf16.msra.mxu0 %v4673_v19  ;;  %6611 = vst [vmem:[#allocation32_spill] sm:$0xff] %v4768_v49  ;;  %6612 = vst [vmem:[#allocation33_spill] sm:$0xff] %v4774_v50  ;;  %v4776_v51 = vld [vmem:[#allocation8 + $0x6c] ss:$16 sps:$4 sm:$0xff]   ;;  %v4778_v52 = vld [vmem:[#allocation8 + $0x60] ss:$16 sps:$4 sm:$0xff]  }
  0x76   :  { %508 = vmatpush1.bf16.msra.mxu1 %v4675_v20  ;;  %468 = vmatprep.subr.bf16.mxu0 %v4679_v21  ;;  %6613 = vst [vmem:[#allocation34_spill] sm:$0xff] %v4776_v51  ;;  %6614 = vst [vmem:[#allocation35_spill] sm:$0xff] %v4778_v52  ;;  %v4780_v53 = vld [vmem:[#allocation8 + $0x68] ss:$16 sps:$4 sm:$0xff]   ;;  %v4782_v54 = vld [vmem:[#allocation8 + $0x44] ss:$16 sps:$4 sm:$0xff]  }
  0x77   :  { %509 = vmatprep.subr.bf16.mxu1 %v4683_v22  ;;  %6615 = vst [vmem:[#allocation36_spill] sm:$0xff] %v4780_v53  ;;  %6616 = vst [vmem:[#allocation37_spill] sm:$0xff] %v4782_v54  ;;  %v4784_v55 = vld [vmem:[#allocation8 + $0x4c] ss:$16 sps:$4 sm:$0xff]   ;;  %v4790_v56 = vld [vmem:[#allocation8 + $0x40] ss:$16 sps:$4 sm:$0xff]  }
  0x78   :  { %6617 = vst [vmem:[#allocation38_spill] sm:$0xff] %v4784_v55  ;;  %6618 = vst [vmem:[#allocation39_spill] sm:$0xff] %v4790_v56  ;;  %v4794_v57 = vld [vmem:[#allocation8 + $0x48] ss:$16 sps:$4 sm:$0xff]   ;;  %v4796_v58 = vld [vmem:[#allocation8 + $0x24] ss:$16 sps:$4 sm:$0xff]  }
  0x79   :  { %469 = vmatpush1.bf16.msra.mxu0 %v4687_v23  ;;  %6619 = vst [vmem:[#allocation40_spill] sm:$0xff] %v4794_v57  ;;  %6620 = vst [vmem:[#allocation41_spill] sm:$0xff] %v4796_v58  ;;  %v4798_v59 = vld [vmem:[#allocation8 + $0x2c] ss:$16 sps:$4 sm:$0xff]   ;;  %v4801_v60 = vld [vmem:[#allocation8 + $0x20] ss:$16 sps:$4 sm:$0xff]  }
  0x7a   :  { %510 = vmatpush1.bf16.msra.mxu1 %v4689_v24  ;;  %470 = vmatprep.subr.bf16.mxu0 %v4693_v25  ;;  %6621 = vst [vmem:[#allocation42_spill] sm:$0xff] %v4798_v59  ;;  %6622 = vst [vmem:[#allocation43_spill] sm:$0xff] %v4801_v60  ;;  %v4805_v61 = vld [vmem:[#allocation8 + $0x28] ss:$16 sps:$4 sm:$0xff]   ;;  %v4807_v62 = vld [vmem:[#allocation8 + $0x4] ss:$16 sps:$4 sm:$0xff]  }
  0x7b   :  { %511 = vmatprep.subr.bf16.mxu1 %v4695_v26  ;;  %6623 = vst [vmem:[#allocation44_spill] sm:$0xff] %v4805_v61  ;;  %6624 = vst [vmem:[#allocation45_spill] sm:$0xff] %v4807_v62  ;;  %v4810_v63 = vld [vmem:[#allocation8 + $0xc] ss:$16 sps:$4 sm:$0xff]  }
  0x7c   :  { %6625 = vst [vmem:[#allocation46_spill] sm:$0xff] %v4810_v63 }
  0x7d   :  { %471 = vmatpush1.bf16.msra.mxu0 %v4699_v28 }
  0x7e   :  { %512 = vmatpush1.bf16.msra.mxu1 %v4701_v29  ;;  %472 = vmatprep.subr.bf16.mxu0 %v4704_v30 }
  0x7f   :  { %513 = vmatprep.subr.bf16.mxu1 %v4706_v31 }
  0x81   :  { %473 = vmatpush1.bf16.msra.mxu0 %v4712_v32 }
  0x82   :  { %514 = vmatpush1.bf16.msra.mxu1 %v4714_v33  ;;  %750 = vmatprep.subr.bf16.mxu0 %v4726_v34 }
  0x83   :  { %791 = vmatprep.subr.bf16.mxu1 %v4728_v35 }
  0x84   :  { %491 = vmatmul.mubr.bf16.vlgmr.msra.gmra.mxu0 %v6263_v0 }
  0x85   :  { %532 = vmatmul.mubr.bf16.vlgmr.msra.gmra.mxu1 %v6263_v0  ;;  %782 = vmatprep.mubr.bf16.mxu0 %v6263_v0 }
  0x86   :  { %823 = vmatprep.mubr.bf16.mxu1 %v6263_v0  ;;  %751 = vmatpush1.bf16.msra.mxu0 %v4730_v36  ;;  %v4813_v0 = vld [vmem:[#allocation8] ss:$16 sps:$4 sm:$0xff]  }
  0x87   :  { %792 = vmatpush1.bf16.msra.mxu1 %v4732_v37  ;;  %752 = vmatprep.subr.bf16.mxu0 %v4738_v38  ;;  %6626 = vst [vmem:[#allocation47_spill] sm:$0xff] %v4813_v0 }
  0x88   :  { %793 = vmatprep.subr.bf16.mxu1 %v4740_v39 }
  0x8a   :  { %753 = vmatpush1.bf16.msra.mxu0 %v4742_v40 }
  0x8b   :  { %794 = vmatpush1.bf16.msra.mxu1 %v4744_v41  ;;  %754 = vmatprep.subr.bf16.mxu0 %v4750_v42 }
  0x8c   :  { %795 = vmatprep.subr.bf16.mxu1 %v4752_v43 }
  0x8e   :  { %755 = vmatpush1.bf16.msra.mxu0 %v4754_v44 }
  0x8f   :  { %796 = vmatpush1.bf16.msra.mxu1 %v4756_v45  ;;  %756 = vmatprep.subr.bf16.mxu0 %v4762_v46 }
  0x90   :  { %797 = vmatprep.subr.bf16.mxu1 %v4764_v47 }
  0x92   :  { %757 = vmatpush1.bf16.msra.mxu0 %v4766_v48 }
  0x93   :  { %798 = vmatpush1.bf16.msra.mxu1 %v4768_v49  ;;  %758 = vmatprep.subr.bf16.mxu0 %v4774_v50 }
  0x94   :  { %799 = vmatprep.subr.bf16.mxu1 %v4776_v51 }
  0x96   :  { %759 = vmatpush1.bf16.msra.mxu0 %v4778_v52 }
  0x97   :  { %800 = vmatpush1.bf16.msra.mxu1 %v4780_v53  ;;  %760 = vmatprep.subr.bf16.mxu0 %v4782_v54  ;;  %v177_v54 = vld [vmem:[#allocation7] sm:$0xf] }
  0x98   :  { %801 = vmatprep.subr.bf16.mxu1 %v4784_v55 }
  0x9a   :  { %761 = vmatpush1.bf16.msra.mxu0 %v4790_v56  ;;  %v4817_v56 = vld [vmem:[#allocation8 + $0x8] ss:$16 sps:$4 sm:$0xff]  }
  0x9b   :  { %802 = vmatpush1.bf16.msra.mxu1 %v4794_v57  ;;  %762 = vmatprep.subr.bf16.mxu0 %v4796_v58  ;;  %6627 = vst [vmem:[#allocation48_spill] sm:$0xff] %v4817_v56  ;;  %v249_v58 = vlaneseq }
  0x9c   :  { %803 = vmatprep.subr.bf16.mxu1 %v4798_v59 }
  0x9d   :  { %v250_v59 = vshrl.u32 %v249_v58, 7 }
  0x9e   :  { %763 = vmatpush1.bf16.msra.mxu0 %v4801_v60  ;;  %v144_v60 = vld [vmem:[%s6252_s1] sm:$0xf] }
  0x9f   :  { %804 = vmatpush1.bf16.msra.mxu1 %v4805_v61  ;;  %764 = vmatprep.subr.bf16.mxu0 %v4807_v62  ;;  %v4822_v57 = vsub.s32 0, %v250_v59  ;;  %v4827_v55 = vsub.s32 1, %v250_v59  ;;  %v4843_v52 = vsub.s32 3, %v250_v59  ;;  %v4850_v46 = vsub.s32 2, %v250_v59 }
  0xa0   :  { %805 = vmatprep.subr.bf16.mxu1 %v4810_v63 }
  0xa1   :  { %v4830_v62 = vrot.slane %v144_v60, %v4822_v57  ;;  %v4833_v63 = vrot.slane %v144_v60, %v4827_v55  ;;  %v4837_v58 = vrot.slane %v177_v54, %v4822_v57  ;;  %v4841_v53 = vrot.slane %v177_v54, %v4827_v55 }
  0xa2   :  { %765 = vmatpush1.bf16.msra.mxu0 %v4813_v0  ;;  %v4848_v47 = vrot.slane %v144_v60, %v4843_v52  ;;  %v4854_v41 = vrot.slane %v177_v54, %v4843_v52 }
  0xa3   :  { %806 = vmatpush1.bf16.msra.mxu1 %v4817_v56  ;;  %6628 = vst [vmem:[#allocation49_spill] sm:$0xff] %v4830_v62  ;;  %6629 = vst [vmem:[#allocation50_spill] sm:$0xff] %v4833_v63 }
  0xa4   :  { %6630 = vst [vmem:[#allocation51_spill] sm:$0xff] %v4837_v58  ;;  %6631 = vst [vmem:[#allocation52_spill] sm:$0xff] %v4841_v53 }
  0xa5   :  { %6632 = vst [vmem:[#allocation53_spill] sm:$0xff] %v4848_v47 }
  0xe8   :  { %v246_v61 = vpop.permute.xlu0 %245 }
  0xe9   :  { %v269_v56 = vmul.f32 %v4830_v62, %v246_v61  ;;  %v270_v0 = vmul.f32 %v4833_v63, %v246_v61  ;;  %v272_v42 = vmul.f32 %v4848_v47, %v246_v61 }
  0xeb   :  { %v294_v51 = vadd.f32 %v4837_v58, %v269_v56  ;;  %v295_v50 = vadd.f32 %v4841_v53, %v270_v0  ;;  %v4857_v53 = vrot.slane %v144_v60, %v4850_v46 }
  0xed   :  { %6633 = vst [vmem:[#allocation54_spill] sm:$0xff] %v4857_v53  ;;  %v271_v59 = vmul.f32 %v4857_v53, %v246_v61 }
 0x144   :  { %v492_v49 = vpop.f32.mrf.mxu0 }
 0x145   :  { %v533_v48 = vpop.f32.mrf.mxu1  ;;  %v540_v62 = vadd.f32 %v492_v49, %v294_v51  ;;  %v297_v51 = vadd.f32 %v4854_v41, %v272_v42 }
 0x146   :  { %v494_v45 = vpop.f32.mrf.mxu0 }
 0x147   :  { %v535_v44 = vpop.f32.mrf.mxu1  ;;  %v3478_v63 = vmul.f32 -1.442695, %v540_v62  ;;  %v541_v43 = vadd.f32 %v494_v45, %v295_v50  ;;  %v4862_v45 = vrot.slane %v177_v54, %v4850_v46 }
 0x148   :  { %v496_v56 = vpop.f32.mrf.mxu0  ;;  %v543_v50 = vadd.f32 %v535_v44, %v297_v51 }
 0x149   :  { %v537_v58 = vpop.f32.mrf.mxu1  ;;  %3858 = vpow2.f32 %v3478_v63  ;;  %v3479_v0 = vmul.f32 -1.442695, %v541_v43  ;;  %v296_v62 = vadd.f32 %v4862_v45, %v271_v59 }
 0x14a   :  { %v497_v40 = vpop.f32.mrf.mxu0  ;;  %v3480_v56 = vmul.f32 -1.442695, %v543_v50 }
 0x14b   :  { %v538_v49 = vpop.f32.mrf.mxu1  ;;  %3860 = vpow2.f32 %v3479_v0  ;;  %v542_v63 = vadd.f32 %v533_v48, %v296_v62  ;;  %v4874_v62 = vld [vmem:[#allocation10 + $0xe4] ss:$16 sps:$4 sm:$0xff]  }
 0x14c   :  { %3862 = vpow2.f32 %v3480_v56  ;;  %6635 = vst [vmem:[#allocation55_spill] sm:$0xff] %v4874_v62  ;;  %v4878_v56 = vld [vmem:[#allocation10 + $0xe0] ss:$16 sps:$4 sm:$0xff]   ;;  %1017 = vmatprep.subr.bf16.mxu0 %v4874_v62 }
 0x156   :  { %v3859_v58 = vpop.eup %3858 }
 0x157   :  { %v547_v43 = vadd.f32 1.0, %v3859_v58  ;;  %v4880_v58 = vld [vmem:[#allocation10 + $0xe8] ss:$16 sps:$4 sm:$0xff]  }
 0x158   :  { %v3861_v47 = vpop.eup %3860  ;;  %6637 = vst [vmem:[#allocation57_spill] sm:$0xff] %v4880_v58 }
 0x159   :  { %3864 = vrcp.f32 %v547_v43  ;;  %v553_v40 = vadd.f32 1.0, %v3861_v47  ;;  %v3863_v60 = vpop.eup %3862  ;;  %v6634_v47 = vmov 0   ;;  %v4888_v43 = vld [vmem:[#allocation10 + $0xcc] ss:$16 sps:$4 sm:$0xff]  }
 0x15a   :  { %3866 = vtanh.f32 %v542_v63  ;;  %v560_v49 = vadd.f32 1.0, %v3863_v60  ;;  %v4886_v63 = vld [vmem:[#allocation10 + $0xc4] ss:$16 sps:$4 sm:$0xff]   ;;  %6639 = vst [vmem:[#allocation59_spill] sm:$0xff] %v4888_v43  ;;  %v4892_v60 = vld [vmem:[#allocation10 + $0xc8] ss:$16 sps:$4 sm:$0xff]  }
 0x15b   :  { %3868 = vrcp.f32 %v553_v40  ;;  %6638 = vst [vmem:[#allocation58_spill] sm:$0xff] %v4886_v63  ;;  %v4890_v40 = vld [vmem:[#allocation10 + $0xc0] ss:$16 sps:$4 sm:$0xff]   ;;  %6641 = vst [vmem:[#allocation61_spill] sm:$0xff] %v4892_v60 }
 0x15c   :  { %3870 = vrcp.f32 %v560_v49  ;;  %6640 = vst [vmem:[#allocation60_spill] sm:$0xff] %v4890_v40  ;;  %v4904_v49 = vld [vmem:[#allocation10 + $0xa8] ss:$16 sps:$4 sm:$0xff]  }
 0x15d   :  { %6645 = vst [vmem:[#allocation65_spill] sm:$0xff] %v4904_v49 }
 0x166   :  { %v3865_v42 = vpop.eup %3864 }
 0x167   :  { %v3867_v0 = vpop.eup %3866 }
 0x168   :  { %v3869_v61 = vpop.eup %3868  ;;  %v564_v53 = vmul.f32 %v3867_v0, %v3865_v42  ;;  %v4898_v42 = vld [vmem:[#allocation10 + $0xa4] ss:$16 sps:$4 sm:$0xff]   ;;  %v4900_v0 = vld [vmem:[#allocation10 + $0xac] ss:$16 sps:$4 sm:$0xff]  }
 0x169   :  { %v563_v54 = vmul.f32 0.0, %v3869_v61  ;;  %v3871_v48 = vpop.eup %3870  ;;  %6642 = vst [vmem:[#allocation62_spill] sm:$0xff] %v4898_v42  ;;  %6643 = vst [vmem:[#allocation63_spill] sm:$0xff] %v4900_v0  ;;  %v4902_v61 = vld [vmem:[#allocation10 + $0xa0] ss:$16 sps:$4 sm:$0xff]  }
 0x16a   :  { %6644 = vst [vmem:[#allocation64_spill] sm:$0xff] %v4902_v61 }
 0x16b   :  { %v4865_v44 = vadd.f32 %v564_v53, %v563_v54  ;;  %v4876_v53 = vld [vmem:[#allocation10 + $0xec] ss:$16 sps:$4 sm:$0xff]   ;;  %v4910_v54 = vld [vmem:[#allocation10 + $0x84] ss:$16 sps:$4 sm:$0xff]  }
 0x16c   :  { %6636 = vst [vmem:[#allocation56_spill] sm:$0xff] %v4876_v53  ;;  %1058 = vmatprep.subr.bf16.mxu1 %v4876_v53  ;;  %6646 = vst [vmem:[#allocation66_spill] sm:$0xff] %v4910_v54 }
 0x16d   :  { %3872 = vtanh.f32 %v4865_v44 }
 0x17a   :  { %v3873_v51 = vpop.eup %3872 }
 0x17b   :  { %v567_v59 = vmul.f32 %v3873_v51, %v3871_v48  ;;  %v4912_v48 = vld [vmem:[#allocation10 + $0x8c] ss:$16 sps:$4 sm:$0xff]   ;;  %v4914_v51 = vld [vmem:[#allocation10 + $0x80] ss:$16 sps:$4 sm:$0xff]  }
 0x17c   :  { %6647 = vst [vmem:[#allocation67_spill] sm:$0xff] %v4912_v48  ;;  %6648 = vst [vmem:[#allocation68_spill] sm:$0xff] %v4914_v51 }
 0x17d   :  { %v4868_v50 = vpack.c.bf16 %v567_v59, %v567_v59  ;;  %v4916_v59 = vld [vmem:[#allocation10 + $0x88] ss:$16 sps:$4 sm:$0xff]  }
 0x17e   :  { %6649 = vst [vmem:[#allocation69_spill] sm:$0xff] %v4916_v59 }
 0x17f   :  { %783 = vmatmul.mubr.bf16.vlgmr.msra.gmra.mxu0 %v4868_v50  ;;  %824 = vmatmul.mubr.bf16.vlgmr.msra.gmra.mxu1 %v4868_v50 }
 0x180   :  { %1049 = vmatprep.mubr.bf16.mxu0 %v6634_v47  ;;  %1090 = vmatprep.mubr.bf16.mxu1 %v6634_v47 }
 0x181   :  { %1018 = vmatpush1.bf16.msra.mxu0 %v4878_v56  ;;  %1059 = vmatpush1.bf16.msra.mxu1 %v4880_v58 }
 0x182   :  { %1019 = vmatprep.subr.bf16.mxu0 %v4886_v63  ;;  %1060 = vmatprep.subr.bf16.mxu1 %v4888_v43 }
 0x185   :  { %1020 = vmatpush1.bf16.msra.mxu0 %v4890_v40  ;;  %1061 = vmatpush1.bf16.msra.mxu1 %v4892_v60  ;;  %v4930_v60 = vld [vmem:[#allocation10 + $0x44] ss:$16 sps:$4 sm:$0xff]   ;;  %v4932_v40 = vld [vmem:[#allocation10 + $0x4c] ss:$16 sps:$4 sm:$0xff]  }
 0x186   :  { %1021 = vmatprep.subr.bf16.mxu0 %v4898_v42  ;;  %1062 = vmatprep.subr.bf16.mxu1 %v4900_v0  ;;  %v4922_v0 = vld [vmem:[#allocation10 + $0x64] ss:$16 sps:$4 sm:$0xff]   ;;  %v4928_v42 = vld [vmem:[#allocation10 + $0x68] ss:$16 sps:$4 sm:$0xff]   ;;  %6654 = vst [vmem:[#allocation74_spill] sm:$0xff] %v4930_v60  ;;  %6655 = vst [vmem:[#allocation75_spill] sm:$0xff] %v4932_v40 }
 0x187   :  { %6650 = vst [vmem:[#allocation70_spill] sm:$0xff] %v4922_v0  ;;  %6653 = vst [vmem:[#allocation73_spill] sm:$0xff] %v4928_v42 }
 0x189   :  { %1022 = vmatpush1.bf16.msra.mxu0 %v4902_v61  ;;  %1063 = vmatpush1.bf16.msra.mxu1 %v4904_v49  ;;  %v4924_v61 = vld [vmem:[#allocation10 + $0x6c] ss:$16 sps:$4 sm:$0xff]   ;;  %v4926_v49 = vld [vmem:[#allocation10 + $0x60] ss:$16 sps:$4 sm:$0xff]  }
 0x18a   :  { %1023 = vmatprep.subr.bf16.mxu0 %v4910_v54  ;;  %1064 = vmatprep.subr.bf16.mxu1 %v4912_v48  ;;  %6651 = vst [vmem:[#allocation71_spill] sm:$0xff] %v4924_v61  ;;  %6652 = vst [vmem:[#allocation72_spill] sm:$0xff] %v4926_v49  ;;  %v4944_v48 = vld [vmem:[#allocation10 + $0x24] ss:$16 sps:$4 sm:$0xff]   ;;  %v4946_v54 = vld [vmem:[#allocation10 + $0x2c] ss:$16 sps:$4 sm:$0xff]  }
 0x18b   :  { %6658 = vst [vmem:[#allocation78_spill] sm:$0xff] %v4944_v48  ;;  %6659 = vst [vmem:[#allocation79_spill] sm:$0xff] %v4946_v54 }
 0x18d   :  { %1024 = vmatpush1.bf16.msra.mxu0 %v4914_v51  ;;  %1065 = vmatpush1.bf16.msra.mxu1 %v4916_v59  ;;  %v4938_v59 = vld [vmem:[#allocation10 + $0x40] ss:$16 sps:$4 sm:$0xff]   ;;  %v4940_v51 = vld [vmem:[#allocation10 + $0x48] ss:$16 sps:$4 sm:$0xff]  }
 0x18e   :  { %1025 = vmatprep.subr.bf16.mxu0 %v4922_v0  ;;  %1066 = vmatprep.subr.bf16.mxu1 %v4924_v61  ;;  %6656 = vst [vmem:[#allocation76_spill] sm:$0xff] %v4938_v59  ;;  %6657 = vst [vmem:[#allocation77_spill] sm:$0xff] %v4940_v51  ;;  %v4950_v61 = vld [vmem:[#allocation10 + $0x20] ss:$16 sps:$4 sm:$0xff]  }
 0x18f   :  { %6660 = vst [vmem:[#allocation80_spill] sm:$0xff] %v4950_v61 }
 0x191   :  { %1026 = vmatpush1.bf16.msra.mxu0 %v4926_v49  ;;  %1067 = vmatpush1.bf16.msra.mxu1 %v4928_v42  ;;  %v4952_v49 = vld [vmem:[#allocation10 + $0x28] ss:$16 sps:$4 sm:$0xff]   ;;  %v4956_v42 = vld [vmem:[#allocation10 + $0x4] ss:$16 sps:$4 sm:$0xff]  }
 0x192   :  { %1027 = vmatprep.subr.bf16.mxu0 %v4930_v60  ;;  %1068 = vmatprep.subr.bf16.mxu1 %v4932_v40  ;;  %6661 = vst [vmem:[#allocation81_spill] sm:$0xff] %v4952_v49  ;;  %6662 = vst [vmem:[#allocation82_spill] sm:$0xff] %v4956_v42  ;;  %v4958_v60 = vld [vmem:[#allocation10 + $0xc] ss:$16 sps:$4 sm:$0xff]   ;;  %v4962_v40 = vld [vmem:[#allocation10] ss:$16 sps:$4 sm:$0xff]  }
 0x193   :  { %6663 = vst [vmem:[#allocation83_spill] sm:$0xff] %v4958_v60  ;;  %6664 = vst [vmem:[#allocation84_spill] sm:$0xff] %v4962_v40 }
 0x195   :  { %1028 = vmatpush1.bf16.msra.mxu0 %v4938_v59  ;;  %1069 = vmatpush1.bf16.msra.mxu1 %v4940_v51  ;;  %v4964_v59 = vld [vmem:[#allocation10 + $0x8] ss:$16 sps:$4 sm:$0xff]  }
 0x196   :  { %1029 = vmatprep.subr.bf16.mxu0 %v4944_v48  ;;  %1070 = vmatprep.subr.bf16.mxu1 %v4946_v54  ;;  %6665 = vst [vmem:[#allocation85_spill] sm:$0xff] %v4964_v59  ;;  %v4517_v54 = vmov 1  }
 0x197   :  { %3690 = vset.pattern.permute.xlu0 %v4517_v54 }
 0x198   :  { %1100 = vperm.xlu0 %3690, %v4697_v27  }
 0x199   :  { %1030 = vmatpush1.bf16.msra.mxu0 %v4950_v61  ;;  %1071 = vmatpush1.bf16.msra.mxu1 %v4952_v49  ;;  %v242_v49 = vld [vmem:[#allocation11] sm:$0xf] }
 0x19a   :  { %1031 = vmatprep.subr.bf16.mxu0 %v4956_v42  ;;  %1072 = vmatprep.subr.bf16.mxu1 %v4958_v60  ;;  %v4974_v61 = vrot.slane %v242_v49, %v4822_v57  ;;  %v4977_v42 = vrot.slane %v242_v49, %v4827_v55  ;;  %v4982_v57 = vrot.slane %v242_v49, %v4843_v52 }
 0x19b   :  { %v4986_v58 = vrot.slane %v242_v49, %v4850_v46 }
 0x19c   :  { %6666 = vst [vmem:[#allocation86_spill] sm:$0xff] %v4974_v61  ;;  %6667 = vst [vmem:[#allocation87_spill] sm:$0xff] %v4977_v42 }
 0x19d   :  { %1032 = vmatpush1.bf16.msra.mxu0 %v4962_v40  ;;  %1073 = vmatpush1.bf16.msra.mxu1 %v4964_v59 }
 0x19e   :  { %1111 = vmatprep.subr.bf16.mxu0 %v4623_v1  ;;  %1152 = vmatprep.subr.bf16.mxu1 %v4625_v2 }
 0x23f   :  { %v784_v60 = vpop.f32.mrf.mxu0  ;;  %v825_v48 = vpop.f32.mrf.mxu1 }
 0x240   :  { %v785_v40 = vadd.f32 %v784_v60, %v4974_v61 }
 0x241   :  { %v786_v59 = vpop.f32.mrf.mxu0  ;;  %v827_v51 = vpop.f32.mrf.mxu1 }
 0x242   :  { %v3513_v1 = vmul.f32 -1.442695, %v785_v40  ;;  %v787_v2 = vadd.f32 %v786_v59, %v4977_v42  ;;  %v828_v55 = vadd.f32 %v827_v51, %v4982_v57  ;;  %v826_v40 = vadd.f32 %v825_v48, %v4986_v58 }
 0x243   :  { %v788_v0 = vpop.f32.mrf.mxu0  ;;  %v829_v54 = vpop.f32.mrf.mxu1 }
 0x244   :  { %3874 = vpow2.f32 %v3513_v1  ;;  %v3514_v27 = vmul.f32 -1.442695, %v787_v2  ;;  %v3515_v60 = vmul.f32 -1.442695, %v828_v55 }
 0x245   :  { %v789_v43 = vpop.f32.mrf.mxu0  ;;  %v830_v63 = vpop.f32.mrf.mxu1 }
 0x246   :  { %3876 = vpow2.f32 %v3514_v27 }
 0x247   :  { %3878 = vpow2.f32 %v3515_v60 }
 0x251   :  { %v3875_v61 = vpop.eup %3874 }
 0x252   :  { %v835_v59 = vadd.f32 1.0, %v3875_v61 }
 0x253   :  { %v3877_v0 = vpop.eup %3876 }
 0x254   :  { %3880 = vrcp.f32 %v835_v59  ;;  %v841_v1 = vadd.f32 1.0, %v3877_v0  ;;  %v3879_v63 = vpop.eup %3878  ;;  %v1101_v0 = vpop.permute.xlu0 %1100 }
 0x255   :  { %3882 = vtanh.f32 %v826_v40  ;;  %v848_v54 = vadd.f32 1.0, %v3879_v63 }
 0x256   :  { %3884 = vrcp.f32 %v841_v1  ;;  %v6694_v1 = vld [vmem:[#allocation49_spill] sm:$0xff] }
 0x257   :  { %3886 = vrcp.f32 %v848_v54  ;;  %v1103_v63 = vmul.f32 %v1101_v0, %v6694_v1 }
 0x261   :  { %v3881_v43 = vpop.eup %3880 }
 0x262   :  { %v3883_v52 = vpop.eup %3882 }
 0x263   :  { %v3885_v2 = vpop.eup %3884  ;;  %v852_v27 = vmul.f32 %v3883_v52, %v3881_v43  ;;  %v6695_v43 = vld [vmem:[#allocation50_spill] sm:$0xff] }
 0x264   :  { %v851_v51 = vmul.f32 0.0, %v3885_v2  ;;  %v3887_v49 = vpop.eup %3886  ;;  %v1104_v52 = vmul.f32 %v1101_v0, %v6695_v43  ;;  %v6696_v2 = vld [vmem:[#allocation51_spill] sm:$0xff] }
 0x265   :  { %v1107_v54 = vadd.f32 %v1103_v63, %v6696_v2  ;;  %v6699_v2 = vld [vmem:[#allocation54_spill] sm:$0xff] }
 0x266   :  { %v4989_v46 = vadd.f32 %v852_v27, %v851_v51  ;;  %v6697_v51 = vld [vmem:[#allocation52_spill] sm:$0xff] }
 0x267   :  { %v1108_v27 = vadd.f32 %v1104_v52, %v6697_v51  ;;  %v1105_v52 = vmul.f32 %v1101_v0, %v6699_v2 }
 0x268   :  { %3888 = vtanh.f32 %v4989_v46 }
 0x275   :  { %v3889_v61 = vpop.eup %3888 }
 0x276   :  { %v855_v48 = vmul.f32 %v3889_v61, %v3887_v49 }
 0x278   :  { %v856_v55 = vpack.c.bf16 %v855_v48, %v855_v48 }
 0x27a   :  { %1050 = vmatmul.mubr.bf16.vlgmr.msra.gmra.mxu0 %v856_v55  ;;  %1091 = vmatmul.mubr.bf16.vlgmr.msra.gmra.mxu1 %v856_v55 }
 0x27b   :  { %1112 = vmatpush1.bf16.msra.mxu0 %v4628_v3  ;;  %1153 = vmatpush1.bf16.msra.mxu1 %v4630_v4  ;;  %v6668_v3 = vld [vmem:[#allocation23_spill] sm:$0xff]  ;;  %v6669_v4 = vld [vmem:[#allocation24_spill] sm:$0xff] }
 0x27c   :  { %1113 = vmatprep.subr.bf16.mxu0 %v4633_v5  ;;  %1154 = vmatprep.subr.bf16.mxu1 %v4637_v6  ;;  %v6670_v5 = vld [vmem:[#allocation25_spill] sm:$0xff]  ;;  %v6671_v6 = vld [vmem:[#allocation26_spill] sm:$0xff] }
 0x27d   :  { %1143 = vmatprep.mubr.bf16.mxu0 %v6634_v47  ;;  %1184 = vmatprep.mubr.bf16.mxu1 %v6634_v47 }
 0x27f   :  { %1114 = vmatpush1.bf16.msra.mxu0 %v4639_v7  ;;  %1155 = vmatpush1.bf16.msra.mxu1 %v4642_v8  ;;  %v6672_v7 = vld [vmem:[#allocation27_spill] sm:$0xff]  ;;  %v6673_v8 = vld [vmem:[#allocation28_spill] sm:$0xff] }
 0x280   :  { %1115 = vmatprep.subr.bf16.mxu0 %v4645_v9  ;;  %1156 = vmatprep.subr.bf16.mxu1 %v4647_v10  ;;  %v6674_v9 = vld [vmem:[#allocation29_spill] sm:$0xff]  ;;  %v6675_v10 = vld [vmem:[#allocation30_spill] sm:$0xff] }
 0x283   :  { %1116 = vmatpush1.bf16.msra.mxu0 %v4649_v11  ;;  %1157 = vmatpush1.bf16.msra.mxu1 %v4651_v12  ;;  %v6676_v11 = vld [vmem:[#allocation31_spill] sm:$0xff]  ;;  %v6677_v12 = vld [vmem:[#allocation32_spill] sm:$0xff] }
 0x284   :  { %1117 = vmatprep.subr.bf16.mxu0 %v4655_v13  ;;  %1158 = vmatprep.subr.bf16.mxu1 %v4659_v14  ;;  %v6678_v13 = vld [vmem:[#allocation33_spill] sm:$0xff]  ;;  %v6679_v14 = vld [vmem:[#allocation34_spill] sm:$0xff] }
 0x287   :  { %1118 = vmatpush1.bf16.msra.mxu0 %v4661_v15  ;;  %1159 = vmatpush1.bf16.msra.mxu1 %v4665_v16  ;;  %v6680_v15 = vld [vmem:[#allocation35_spill] sm:$0xff]  ;;  %v6681_v16 = vld [vmem:[#allocation36_spill] sm:$0xff] }
 0x288   :  { %1119 = vmatprep.subr.bf16.mxu0 %v4667_v17  ;;  %1160 = vmatprep.subr.bf16.mxu1 %v4671_v18  ;;  %v6682_v17 = vld [vmem:[#allocation37_spill] sm:$0xff]  ;;  %v6683_v18 = vld [vmem:[#allocation38_spill] sm:$0xff] }
 0x28b   :  { %1120 = vmatpush1.bf16.msra.mxu0 %v4673_v19  ;;  %1161 = vmatpush1.bf16.msra.mxu1 %v4675_v20  ;;  %v6684_v19 = vld [vmem:[#allocation39_spill] sm:$0xff]  ;;  %v6685_v20 = vld [vmem:[#allocation40_spill] sm:$0xff] }
 0x28c   :  { %1121 = vmatprep.subr.bf16.mxu0 %v4679_v21  ;;  %1162 = vmatprep.subr.bf16.mxu1 %v4683_v22  ;;  %v6686_v21 = vld [vmem:[#allocation41_spill] sm:$0xff]  ;;  %v6687_v22 = vld [vmem:[#allocation42_spill] sm:$0xff] }
 0x28f   :  { %1122 = vmatpush1.bf16.msra.mxu0 %v4687_v23  ;;  %1163 = vmatpush1.bf16.msra.mxu1 %v4689_v24  ;;  %v6688_v23 = vld [vmem:[#allocation43_spill] sm:$0xff]  ;;  %v6689_v24 = vld [vmem:[#allocation44_spill] sm:$0xff] }
 0x290   :  { %1123 = vmatprep.subr.bf16.mxu0 %v4693_v25  ;;  %1164 = vmatprep.subr.bf16.mxu1 %v4695_v26  ;;  %v6690_v25 = vld [vmem:[#allocation45_spill] sm:$0xff]  ;;  %v6691_v26 = vld [vmem:[#allocation46_spill] sm:$0xff] }
 0x293   :  { %1124 = vmatpush1.bf16.msra.mxu0 %v4699_v28  ;;  %1165 = vmatpush1.bf16.msra.mxu1 %v4701_v29  ;;  %v6692_v28 = vld [vmem:[#allocation47_spill] sm:$0xff]  ;;  %v6693_v29 = vld [vmem:[#allocation48_spill] sm:$0xff] }
 0x294   :  { %1125 = vmatprep.subr.bf16.mxu0 %v4704_v30  ;;  %1166 = vmatprep.subr.bf16.mxu1 %v4706_v31 }
 0x297   :  { %1126 = vmatpush1.bf16.msra.mxu0 %v4712_v32  ;;  %1167 = vmatpush1.bf16.msra.mxu1 %v4714_v33 }
 0x298   :  { %1222 = vmatprep.subr.bf16.mxu0 %v4726_v34  ;;  %1263 = vmatprep.subr.bf16.mxu1 %v4728_v35 }
 0x29a   :  { %1144 = vmatmul.mubr.bf16.vlgmr.msra.gmra.mxu0 %v4868_v50  ;;  %1185 = vmatmul.mubr.bf16.vlgmr.msra.gmra.mxu1 %v4868_v50 }
 0x29b   :  { %1223 = vmatpush1.bf16.msra.mxu0 %v4730_v36  ;;  %1264 = vmatpush1.bf16.msra.mxu1 %v4732_v37 }
 0x29c   :  { %1224 = vmatprep.subr.bf16.mxu0 %v4738_v38  ;;  %1265 = vmatprep.subr.bf16.mxu1 %v4740_v39 }
 0x29d   :  { %1254 = vmatprep.mubr.bf16.mxu0 %v6634_v47  ;;  %1295 = vmatprep.mubr.bf16.mxu1 %v6634_v47 }
 0x29f   :  { %1225 = vmatpush1.bf16.msra.mxu0 %v6668_v3  ;;  %1266 = vmatpush1.bf16.msra.mxu1 %v6669_v4 }
 0x2a0   :  { %1226 = vmatprep.subr.bf16.mxu0 %v6670_v5  ;;  %1267 = vmatprep.subr.bf16.mxu1 %v6671_v6 }
 0x2a3   :  { %1227 = vmatpush1.bf16.msra.mxu0 %v6672_v7  ;;  %1268 = vmatpush1.bf16.msra.mxu1 %v6673_v8 }
 0x2a4   :  { %1228 = vmatprep.subr.bf16.mxu0 %v6674_v9  ;;  %1269 = vmatprep.subr.bf16.mxu1 %v6675_v10 }
 0x2a7   :  { %1229 = vmatpush1.bf16.msra.mxu0 %v6676_v11  ;;  %1270 = vmatpush1.bf16.msra.mxu1 %v6677_v12 }
 0x2a8   :  { %1230 = vmatprep.subr.bf16.mxu0 %v6678_v13  ;;  %1271 = vmatprep.subr.bf16.mxu1 %v6679_v14 }
 0x2ab   :  { %1231 = vmatpush1.bf16.msra.mxu0 %v6680_v15  ;;  %1272 = vmatpush1.bf16.msra.mxu1 %v6681_v16 }
 0x2ac   :  { %1232 = vmatprep.subr.bf16.mxu0 %v6682_v17  ;;  %1273 = vmatprep.subr.bf16.mxu1 %v6683_v18 }
 0x2af   :  { %1233 = vmatpush1.bf16.msra.mxu0 %v6684_v19  ;;  %1274 = vmatpush1.bf16.msra.mxu1 %v6685_v20 }
 0x2b0   :  { %1234 = vmatprep.subr.bf16.mxu0 %v6686_v21  ;;  %1275 = vmatprep.subr.bf16.mxu1 %v6687_v22 }
 0x2b3   :  { %1235 = vmatpush1.bf16.msra.mxu0 %v6688_v23  ;;  %1276 = vmatpush1.bf16.msra.mxu1 %v6689_v24 }
 0x2b4   :  { %1236 = vmatprep.subr.bf16.mxu0 %v6690_v25  ;;  %1277 = vmatprep.subr.bf16.mxu1 %v6691_v26 }
 0x2b7   :  { %1237 = vmatpush1.bf16.msra.mxu0 %v6692_v28  ;;  %1278 = vmatpush1.bf16.msra.mxu1 %v6693_v29 }
 0x2b8   :  { %1329 = vmatprep.subr.bf16.mxu0 %v4874_v62  ;;  %1370 = vmatprep.subr.bf16.mxu1 %v4876_v53 }
 0x33a   :  { %v5062_v30 = vpop.f32.mrf.mxu0  ;;  %v5064_v31 = vpop.f32.mrf.mxu1 }
 0x33c   :  { %v5066_v32 = vpop.f32.mrf.mxu0  ;;  %v5068_v33 = vpop.f32.mrf.mxu1 }
 0x33e   :  { %v1055_v50 = vpop.f32.mrf.mxu0  ;;  %v1096_v60 = vpop.f32.mrf.mxu1 }
 0x33f   :  { %v6698_v50 = vld [vmem:[#allocation53_spill] sm:$0xff] }
 0x340   :  { %v1056_v40 = vpop.f32.mrf.mxu0  ;;  %v1097_v59 = vpop.f32.mrf.mxu1  ;;  %v1106_v60 = vmul.f32 %v1101_v0, %v6698_v50 }
 0x342   :  { %v1110_v63 = vadd.f32 %v1106_v60, %v4854_v41 }
 0x35a   :  { %v1145_v49 = vpop.f32.mrf.mxu0  ;;  %v1186_v61 = vpop.f32.mrf.mxu1 }
 0x35b   :  { %v1193_v48 = vadd.f32 %v1145_v49, %v1107_v54  ;;  %v1109_v54 = vadd.f32 %v1105_v52, %v4862_v45  ;;  %v6701_v52 = vld [vmem:[#allocation58_spill] sm:$0xff] }
 0x35c   :  { %v1147_v55 = vpop.f32.mrf.mxu0  ;;  %v1188_v53 = vpop.f32.mrf.mxu1 }
 0x35d   :  { %v3548_v62 = vmul.f32 -1.442695, %v1193_v48  ;;  %v1194_v29 = vadd.f32 %v1147_v55, %v1108_v27  ;;  %v1196_v51 = vadd.f32 %v1188_v53, %v1110_v63  ;;  %v1195_v48 = vadd.f32 %v1186_v61, %v1109_v54  ;;  %v6700_v63 = vld [vmem:[#allocation57_spill] sm:$0xff]  ;;  %v6703_v54 = vld [vmem:[#allocation60_spill] sm:$0xff] }
 0x35e   :  { %v1149_v40 = vpop.f32.mrf.mxu0  ;;  %v1190_v59 = vpop.f32.mrf.mxu1 }
 0x35f   :  { %3890 = vpow2.f32 %v3548_v62  ;;  %v3549_v28 = vmul.f32 -1.442695, %v1194_v29  ;;  %v3550_v49 = vmul.f32 -1.442695, %v1196_v51 }
 0x360   :  { %v1150_v1 = vpop.f32.mrf.mxu0  ;;  %v1191_v26 = vpop.f32.mrf.mxu1 }
 0x361   :  { %3892 = vpow2.f32 %v3549_v28 }
 0x362   :  { %3894 = vpow2.f32 %v3550_v49  ;;  %v6704_v49 = vld [vmem:[#allocation61_spill] sm:$0xff] }
 0x36c   :  { %v3891_v43 = vpop.eup %3890 }
 0x36d   :  { %v1200_v27 = vadd.f32 1.0, %v3891_v43 }
 0x36e   :  { %v3893_v55 = vpop.eup %3892 }
 0x36f   :  { %3896 = vrcp.f32 %v1200_v27  ;;  %v1206_v40 = vadd.f32 1.0, %v3893_v55  ;;  %v3895_v62 = vpop.eup %3894  ;;  %v6706_v27 = vld [vmem:[#allocation63_spill] sm:$0xff]  ;;  %v6707_v55 = vld [vmem:[#allocation64_spill] sm:$0xff] }
 0x370   :  { %3898 = vtanh.f32 %v1195_v48  ;;  %v1213_v1 = vadd.f32 1.0, %v3895_v62  ;;  %v6705_v48 = vld [vmem:[#allocation62_spill] sm:$0xff] }
 0x371   :  { %3900 = vrcp.f32 %v1206_v40  ;;  %v6708_v40 = vld [vmem:[#allocation65_spill] sm:$0xff]  ;;  %v6709_v62 = vld [vmem:[#allocation66_spill] sm:$0xff] }
 0x372   :  { %3902 = vrcp.f32 %v1213_v1  ;;  %v6713_v1 = vld [vmem:[#allocation70_spill] sm:$0xff] }
 0x37c   :  { %v3897_v26 = vpop.eup %3896 }
 0x37d   :  { %v3899_v28 = vpop.eup %3898 }
 0x37e   :  { %v3901_v29 = vpop.eup %3900  ;;  %v1217_v60 = vmul.f32 %v3899_v28, %v3897_v26  ;;  %v6710_v26 = vld [vmem:[#allocation67_spill] sm:$0xff]  ;;  %v6711_v28 = vld [vmem:[#allocation68_spill] sm:$0xff] }
 0x37f   :  { %v1216_v53 = vmul.f32 %v3901_v29, %v4865_v44  ;;  %v3903_v43 = vpop.eup %3902  ;;  %v6702_v44 = vld [vmem:[#allocation59_spill] sm:$0xff]  ;;  %v6712_v29 = vld [vmem:[#allocation69_spill] sm:$0xff] }
 0x381   :  { %v5079_v0 = vadd.f32 %v1217_v60, %v1216_v53  ;;  %v6714_v60 = vld [vmem:[#allocation71_spill] sm:$0xff]  ;;  %v6715_v53 = vld [vmem:[#allocation72_spill] sm:$0xff] }
 0x383   :  { %3904 = vtanh.f32 %v5079_v0 }
 0x390   :  { %v3905_v51 = vpop.eup %3904 }
 0x391   :  { %v1220_v61 = vmul.f32 %v3905_v51, %v3903_v43  ;;  %v6716_v43 = vld [vmem:[#allocation73_spill] sm:$0xff]  ;;  %v6717_v51 = vld [vmem:[#allocation74_spill] sm:$0xff] }
 0x393   :  { %v5082_v59 = vpack.c.bf16 %v1220_v61, %v1220_v61  ;;  %v6718_v61 = vld [vmem:[#allocation75_spill] sm:$0xff] }
 0x395   :  { %1255 = vmatmul.mubr.bf16.vlgmr.msra.gmra.mxu0 %v5082_v59  ;;  %1296 = vmatmul.mubr.bf16.vlgmr.msra.gmra.mxu1 %v5082_v59 }
 0x396   :  { %1330 = vmatpush1.bf16.msra.mxu0 %v4878_v56  ;;  %1371 = vmatpush1.bf16.msra.mxu1 %v6700_v63 }
 0x397   :  { %1331 = vmatprep.subr.bf16.mxu0 %v6701_v52  ;;  %1372 = vmatprep.subr.bf16.mxu1 %v6702_v44 }
 0x398   :  { %1361 = vmatprep.mubr.bf16.mxu0 %v6634_v47  ;;  %1402 = vmatprep.mubr.bf16.mxu1 %v6634_v47 }
 0x39a   :  { %1332 = vmatpush1.bf16.msra.mxu0 %v6703_v54  ;;  %1373 = vmatpush1.bf16.msra.mxu1 %v6704_v49 }
 0x39b   :  { %1333 = vmatprep.subr.bf16.mxu0 %v6705_v48  ;;  %1374 = vmatprep.subr.bf16.mxu1 %v6706_v27 }
 0x39e   :  { %1334 = vmatpush1.bf16.msra.mxu0 %v6707_v55  ;;  %1375 = vmatpush1.bf16.msra.mxu1 %v6708_v40  ;;  %v6719_v40 = vld [vmem:[#allocation76_spill] sm:$0xff] }
 0x39f   :  { %1335 = vmatprep.subr.bf16.mxu0 %v6709_v62  ;;  %1376 = vmatprep.subr.bf16.mxu1 %v6710_v26  ;;  %v6720_v62 = vld [vmem:[#allocation77_spill] sm:$0xff]  ;;  %v6721_v26 = vld [vmem:[#allocation78_spill] sm:$0xff] }
 0x3a2   :  { %1336 = vmatpush1.bf16.msra.mxu0 %v6711_v28  ;;  %1377 = vmatpush1.bf16.msra.mxu1 %v6712_v29  ;;  %v6722_v28 = vld [vmem:[#allocation79_spill] sm:$0xff]  ;;  %v6723_v29 = vld [vmem:[#allocation80_spill] sm:$0xff] }
 0x3a3   :  { %1337 = vmatprep.subr.bf16.mxu0 %v6713_v1  ;;  %1378 = vmatprep.subr.bf16.mxu1 %v6714_v60  ;;  %v6724_v1 = vld [vmem:[#allocation81_spill] sm:$0xff]  ;;  %v6725_v60 = vld [vmem:[#allocation82_spill] sm:$0xff] }
 0x3a6   :  { %1338 = vmatpush1.bf16.msra.mxu0 %v6715_v53  ;;  %1379 = vmatpush1.bf16.msra.mxu1 %v6716_v43  ;;  %v6726_v53 = vld [vmem:[#allocation83_spill] sm:$0xff]  ;;  %v6727_v43 = vld [vmem:[#allocation84_spill] sm:$0xff] }
 0x3a7   :  { %1339 = vmatprep.subr.bf16.mxu0 %v6717_v51  ;;  %1380 = vmatprep.subr.bf16.mxu1 %v6718_v61  ;;  %v6728_v51 = vld [vmem:[#allocation85_spill] sm:$0xff]  ;;  %v5118_v61 = vld [vmem:[#allocation5 + $0xe4] ss:$16 sps:$4 sm:$0xff]  }
 0x3a8   :  { %6729 = vst [vmem:[#allocation23_spill] sm:$0xff] %v5118_v61 }
 0x3aa   :  { %1340 = vmatpush1.bf16.msra.mxu0 %v6719_v40  ;;  %1381 = vmatpush1.bf16.msra.mxu1 %v6720_v62  ;;  %v5121_v62 = vld [vmem:[#allocation5 + $0xec] ss:$16 sps:$4 sm:$0xff]  }
 0x3ab   :  { %1341 = vmatprep.subr.bf16.mxu0 %v6721_v26  ;;  %1382 = vmatprep.subr.bf16.mxu1 %v6722_v28  ;;  %6730 = vst [vmem:[#allocation24_spill] sm:$0xff] %v5121_v62  ;;  %v4518_v28 = vmov 2  }
 0x3ac   :  { %3691 = vset.pattern.permute.xlu1 %v4518_v28 }
 0x3ae   :  { %1342 = vmatpush1.bf16.msra.mxu0 %v6723_v29  ;;  %1383 = vmatpush1.bf16.msra.mxu1 %v6724_v1  ;;  %v5124_v29 = vld [vmem:[#allocation2] sm:$0x3] }
 0x3af   :  { %1343 = vmatprep.subr.bf16.mxu0 %v6725_v60  ;;  %1384 = vmatprep.subr.bf16.mxu1 %v6726_v53  ;;  %6731 = vst [vmem:[#allocation25_spill] sm:$0xff] %v5124_v29  ;;  %v6732_v60 = vld [vmem:[#allocation86_spill] sm:$0xff] }
 0x3b0   :  { %1412 = vperm.xlu1 %3691, %v5124_v29   ;;  %v1052_v53 = vadd.f32 %v5062_v30, %v6732_v60  ;;  %v1095_v30 = vadd.f32 %v5068_v33, %v4982_v57  ;;  %v1093_v29 = vadd.f32 %v5064_v31, %v4986_v58 }
 0x3b2   :  { %1344 = vmatpush1.bf16.msra.mxu0 %v6727_v43  ;;  %1385 = vmatpush1.bf16.msra.mxu1 %v6728_v51  ;;  %v1054_v51 = vadd.f32 %v5066_v32, %v4977_v42 }
 0x3b3   :  { %1423 = vmatprep.subr.bf16.mxu0 %v5118_v61  ;;  %1464 = vmatprep.subr.bf16.mxu1 %v5121_v62 }
 0x455   :  { %v1256_v43 = vpop.f32.mrf.mxu0  ;;  %v1297_v1 = vpop.f32.mrf.mxu1 }
 0x456   :  { %v1257_v26 = vadd.f32 %v1256_v43, %v1052_v53  ;;  %v1298_v32 = vadd.f32 %v1297_v1, %v1093_v29 }
 0x457   :  { %v1258_v61 = vpop.f32.mrf.mxu0  ;;  %v1299_v40 = vpop.f32.mrf.mxu1 }
 0x458   :  { %v3551_v55 = vmul.f32 -1.442695, %v1257_v26  ;;  %v1259_v27 = vadd.f32 %v1258_v61, %v1054_v51  ;;  %v1300_v60 = vadd.f32 %v1299_v40, %v1095_v30  ;;  %v5142_v61 = vld [vmem:[#allocation5 + $0xe8] ss:$16 sps:$4 sm:$0xff]   ;;  %v5153_v30 = vld [vmem:[#allocation5 + $0xc0] ss:$16 sps:$4 sm:$0xff]  }
 0x459   :  { %v1260_v62 = vpop.f32.mrf.mxu0  ;;  %v1301_v48 = vpop.f32.mrf.mxu1 }
 0x45a   :  { %3906 = vpow2.f32 %v3551_v55  ;;  %v3552_v28 = vmul.f32 -1.442695, %v1259_v27  ;;  %v3553_v53 = vmul.f32 -1.442695, %v1300_v60 }
 0x45b   :  { %v1261_v49 = vpop.f32.mrf.mxu0  ;;  %v1302_v54 = vpop.f32.mrf.mxu1 }
 0x45c   :  { %3908 = vpow2.f32 %v3552_v28  ;;  %v5148_v28 = vld [vmem:[#allocation5 + $0xcc] ss:$16 sps:$4 sm:$0xff]  }
 0x45d   :  { %3910 = vtanh.f32 %v1298_v32  ;;  %v5156_v32 = vld [vmem:[#allocation5 + $0xc8] ss:$16 sps:$4 sm:$0xff]  }
 0x45e   :  { %3912 = vpow2.f32 %v3553_v53  ;;  %v5159_v53 = vld [vmem:[#allocation5 + $0xa4] ss:$16 sps:$4 sm:$0xff]  }
 0x467   :  { %v3907_v43 = vpop.eup %3906 }
 0x468   :  { %v1307_v42 = vadd.f32 1.0, %v3907_v43  ;;  %v5162_v43 = vld [vmem:[#allocation5 + $0xac] ss:$16 sps:$4 sm:$0xff]  }
 0x469   :  { %v3909_v26 = vpop.eup %3908 }
 0x46a   :  { %3914 = vrcp.f32 %v1307_v42  ;;  %v1313_v48 = vadd.f32 1.0, %v3909_v26  ;;  %v3911_v49 = vpop.eup %3910  ;;  %v5139_v42 = vld [vmem:[#allocation5 + $0xe0] ss:$16 sps:$4 sm:$0xff]  }
 0x46b   :  { %v3913_v54 = vpop.eup %3912  ;;  %v5165_v26 = vld [vmem:[#allocation5 + $0xa0] ss:$16 sps:$4 sm:$0xff]  }
 0x46c   :  { %3916 = vrcp.f32 %v1313_v48  ;;  %v1320_v33 = vadd.f32 1.0, %v3913_v54  ;;  %v5168_v48 = vld [vmem:[#allocation5 + $0xa8] ss:$16 sps:$4 sm:$0xff]   ;;  %v5174_v54 = vld [vmem:[#allocation5 + $0x8c] ss:$16 sps:$4 sm:$0xff]  }
 0x46e   :  { %3918 = vrcp.f32 %v1320_v33  ;;  %v5186_v33 = vld [vmem:[#allocation5 + $0x6c] ss:$16 sps:$4 sm:$0xff]  }
 0x46f   :  { %6733 = vst [vmem:[#allocation26_spill] sm:$0xff] %v5186_v33 }
 0x477   :  { %v3915_v27 = vpop.eup %3914 }
 0x478   :  { %v1324_v55 = vmul.f32 %v3915_v27, %v3911_v49  ;;  %v5171_v49 = vld [vmem:[#allocation5 + $0x84] ss:$16 sps:$4 sm:$0xff]   ;;  %v5177_v27 = vld [vmem:[#allocation5 + $0x80] ss:$16 sps:$4 sm:$0xff]  }
 0x479   :  { %v3917_v62 = vpop.eup %3916 }
 0x47a   :  { %v1323_v40 = vmul.f32 %v3917_v62, %v4989_v46  ;;  %v5145_v46 = vld [vmem:[#allocation5 + $0xc4] ss:$16 sps:$4 sm:$0xff]  }
 0x47b   :  { %v3919_v31 = vpop.eup %3918  ;;  %v5183_v62 = vld [vmem:[#allocation5 + $0x64] ss:$16 sps:$4 sm:$0xff]  }
 0x47c   :  { %v5136_v51 = vadd.f32 %v1324_v55, %v1323_v40  ;;  %v5180_v55 = vld [vmem:[#allocation5 + $0x88] ss:$16 sps:$4 sm:$0xff]   ;;  %v5189_v40 = vld [vmem:[#allocation5 + $0x60] ss:$16 sps:$4 sm:$0xff]  }
 0x47d   :  { %6734 = vst [vmem:[#allocation27_spill] sm:$0xff] %v5189_v40 }
 0x47e   :  { %3920 = vtanh.f32 %v5136_v51 }
 0x48b   :  { %v3921_v29 = vpop.eup %3920 }
 0x48c   :  { %v1327_v1 = vmul.f32 %v3921_v29, %v3919_v31  ;;  %v5192_v31 = vld [vmem:[#allocation5 + $0x68] ss:$16 sps:$4 sm:$0xff]   ;;  %v5195_v29 = vld [vmem:[#allocation5 + $0x44] ss:$16 sps:$4 sm:$0xff]  }
 0x48d   :  { %6735 = vst [vmem:[#allocation28_spill] sm:$0xff] %v5192_v31  ;;  %6736 = vst [vmem:[#allocation29_spill] sm:$0xff] %v5195_v29 }
 0x48e   :  { %v1328_v60 = vpack.c.bf16 %v1327_v1, %v1327_v1  ;;  %v5198_v1 = vld [vmem:[#allocation5 + $0x4c] ss:$16 sps:$4 sm:$0xff]  }
 0x48f   :  { %6737 = vst [vmem:[#allocation30_spill] sm:$0xff] %v5198_v1 }
 0x490   :  { %1362 = vmatmul.mubr.bf16.vlgmr.msra.gmra.mxu0 %v1328_v60  ;;  %1403 = vmatmul.mubr.bf16.vlgmr.msra.gmra.mxu1 %v1328_v60  ;;  %v5201_v60 = vld [vmem:[#allocation5 + $0x40] ss:$16 sps:$4 sm:$0xff]  }
 0x491   :  { %1424 = vmatpush1.bf16.msra.mxu0 %v5139_v42  ;;  %1465 = vmatpush1.bf16.msra.mxu1 %v5142_v61  ;;  %6738 = vst [vmem:[#allocation31_spill] sm:$0xff] %v5201_v60 }
 0x492   :  { %1425 = vmatprep.subr.bf16.mxu0 %v5145_v46  ;;  %1466 = vmatprep.subr.bf16.mxu1 %v5148_v28 }
 0x493   :  { %1455 = vmatprep.mubr.bf16.mxu0 %v6634_v47  ;;  %1496 = vmatprep.mubr.bf16.mxu1 %v6634_v47 }
 0x495   :  { %1426 = vmatpush1.bf16.msra.mxu0 %v5153_v30  ;;  %1467 = vmatpush1.bf16.msra.mxu1 %v5156_v32 }
 0x496   :  { %1427 = vmatprep.subr.bf16.mxu0 %v5159_v53  ;;  %1468 = vmatprep.subr.bf16.mxu1 %v5162_v43 }
 0x499   :  { %1428 = vmatpush1.bf16.msra.mxu0 %v5165_v26  ;;  %1469 = vmatpush1.bf16.msra.mxu1 %v5168_v48 }
 0x49a   :  { %1429 = vmatprep.subr.bf16.mxu0 %v5171_v49  ;;  %1470 = vmatprep.subr.bf16.mxu1 %v5174_v54 }
 0x49d   :  { %1430 = vmatpush1.bf16.msra.mxu0 %v5177_v27  ;;  %1471 = vmatpush1.bf16.msra.mxu1 %v5180_v55 }
 0x49e   :  { %1431 = vmatprep.subr.bf16.mxu0 %v5183_v62  ;;  %1472 = vmatprep.subr.bf16.mxu1 %v5186_v33  ;;  %v5204_v33 = vld [vmem:[#allocation5 + $0x48] ss:$16 sps:$4 sm:$0xff]  }
 0x49f   :  { %6739 = vst [vmem:[#allocation32_spill] sm:$0xff] %v5204_v33 }
 0x4a1   :  { %1432 = vmatpush1.bf16.msra.mxu0 %v5189_v40  ;;  %1473 = vmatpush1.bf16.msra.mxu1 %v5192_v31  ;;  %v5207_v40 = vld [vmem:[#allocation5 + $0x24] ss:$16 sps:$4 sm:$0xff]   ;;  %v5210_v31 = vld [vmem:[#allocation5 + $0x2c] ss:$16 sps:$4 sm:$0xff]  }
 0x4a2   :  { %1433 = vmatprep.subr.bf16.mxu0 %v5195_v29  ;;  %1474 = vmatprep.subr.bf16.mxu1 %v5198_v1  ;;  %6740 = vst [vmem:[#allocation33_spill] sm:$0xff] %v5207_v40  ;;  %6741 = vst [vmem:[#allocation34_spill] sm:$0xff] %v5210_v31  ;;  %v5213_v29 = vld [vmem:[#allocation5 + $0x20] ss:$16 sps:$4 sm:$0xff]   ;;  %v5216_v1 = vld [vmem:[#allocation5 + $0x28] ss:$16 sps:$4 sm:$0xff]  }
 0x4a3   :  { %6742 = vst [vmem:[#allocation35_spill] sm:$0xff] %v5216_v1 }
 0x4a5   :  { %1434 = vmatpush1.bf16.msra.mxu0 %v5201_v60  ;;  %1475 = vmatpush1.bf16.msra.mxu1 %v5204_v33  ;;  %v5219_v60 = vld [vmem:[#allocation5 + $0x4] ss:$16 sps:$4 sm:$0xff]   ;;  %v5222_v33 = vld [vmem:[#allocation5 + $0xc] ss:$16 sps:$4 sm:$0xff]  }
 0x4a6   :  { %1435 = vmatprep.subr.bf16.mxu0 %v5207_v40  ;;  %1476 = vmatprep.subr.bf16.mxu1 %v5210_v31  ;;  %6743 = vst [vmem:[#allocation36_spill] sm:$0xff] %v5219_v60  ;;  %6744 = vst [vmem:[#allocation37_spill] sm:$0xff] %v5222_v33  ;;  %v5225_v40 = vld [vmem:[#allocation5] ss:$16 sps:$4 sm:$0xff]   ;;  %v5228_v31 = vld [vmem:[#allocation5 + $0x8] ss:$16 sps:$4 sm:$0xff]  }
 0x4a7   :  { %6745 = vst [vmem:[#allocation38_spill] sm:$0xff] %v5225_v40  ;;  %6746 = vst [vmem:[#allocation39_spill] sm:$0xff] %v5228_v31 }
 0x4a9   :  { %1436 = vmatpush1.bf16.msra.mxu0 %v5213_v29  ;;  %1477 = vmatpush1.bf16.msra.mxu1 %v5216_v1 }
 0x4aa   :  { %1437 = vmatprep.subr.bf16.mxu0 %v5219_v60  ;;  %1478 = vmatprep.subr.bf16.mxu1 %v5222_v33 }
 0x4ad   :  { %1438 = vmatpush1.bf16.msra.mxu0 %v5225_v40  ;;  %1479 = vmatpush1.bf16.msra.mxu1 %v5228_v31 }
 0x4ae   :  { %1534 = vmatprep.subr.bf16.mxu0 %v4726_v34  ;;  %1575 = vmatprep.subr.bf16.mxu1 %v4728_v35  ;;  %v6747_v34 = vld [vmem:[#allocation46_spill] sm:$0xff]  ;;  %v6748_v35 = vld [vmem:[#allocation47_spill] sm:$0xff] }
 0x4b0   :  { %1456 = vmatmul.mubr.bf16.vlgmr.msra.gmra.mxu0 %v5082_v59  ;;  %1497 = vmatmul.mubr.bf16.vlgmr.msra.gmra.mxu1 %v5082_v59 }
 0x4b1   :  { %1535 = vmatpush1.bf16.msra.mxu0 %v4730_v36  ;;  %1576 = vmatpush1.bf16.msra.mxu1 %v4732_v37  ;;  %v6749_v36 = vld [vmem:[#allocation48_spill] sm:$0xff]  ;;  %v6750_v37 = vld [vmem:[#allocation55_spill] sm:$0xff] }
 0x4b2   :  { %1536 = vmatprep.subr.bf16.mxu0 %v4738_v38  ;;  %1577 = vmatprep.subr.bf16.mxu1 %v4740_v39  ;;  %v6751_v38 = vld [vmem:[#allocation56_spill] sm:$0xff] }
 0x4b3   :  { %1566 = vmatprep.mubr.bf16.mxu0 %v6634_v47  ;;  %1607 = vmatprep.mubr.bf16.mxu1 %v6634_v47 }
 0x4b5   :  { %1537 = vmatpush1.bf16.msra.mxu0 %v6668_v3  ;;  %1578 = vmatpush1.bf16.msra.mxu1 %v6669_v4 }
 0x4b6   :  { %1538 = vmatprep.subr.bf16.mxu0 %v6670_v5  ;;  %1579 = vmatprep.subr.bf16.mxu1 %v6671_v6 }
 0x4b9   :  { %1539 = vmatpush1.bf16.msra.mxu0 %v6672_v7  ;;  %1580 = vmatpush1.bf16.msra.mxu1 %v6673_v8 }
 0x4ba   :  { %1540 = vmatprep.subr.bf16.mxu0 %v6674_v9  ;;  %1581 = vmatprep.subr.bf16.mxu1 %v6675_v10  ;;  %v1413_v10 = vpop.permute.xlu1 %1412 }
 0x4bb   :  { %v1418_v59 = vmul.f32 %v1413_v10, %v6698_v50 }
 0x4bd   :  { %1541 = vmatpush1.bf16.msra.mxu0 %v6676_v11  ;;  %1582 = vmatpush1.bf16.msra.mxu1 %v6677_v12  ;;  %v6752_v11 = vld [vmem:[#allocation49_spill] sm:$0xff] }
 0x4be   :  { %1542 = vmatprep.subr.bf16.mxu0 %v6678_v13  ;;  %1583 = vmatprep.subr.bf16.mxu1 %v6679_v14  ;;  %v1415_v12 = vmul.f32 %v1413_v10, %v6752_v11  ;;  %v6753_v13 = vld [vmem:[#allocation50_spill] sm:$0xff] }
 0x4bf   :  { %v1416_v14 = vmul.f32 %v1413_v10, %v6753_v13 }
 0x4c1   :  { %1543 = vmatpush1.bf16.msra.mxu0 %v6680_v15  ;;  %1584 = vmatpush1.bf16.msra.mxu1 %v6681_v16  ;;  %v6754_v15 = vld [vmem:[#allocation51_spill] sm:$0xff] }
 0x4c2   :  { %1544 = vmatprep.subr.bf16.mxu0 %v6682_v17  ;;  %1585 = vmatprep.subr.bf16.mxu1 %v6683_v18  ;;  %v1419_v16 = vadd.f32 %v1415_v12, %v6754_v15  ;;  %v6755_v17 = vld [vmem:[#allocation52_spill] sm:$0xff] }
 0x4c3   :  { %v1420_v18 = vadd.f32 %v1416_v14, %v6755_v17 }
 0x4c5   :  { %1545 = vmatpush1.bf16.msra.mxu0 %v6684_v19  ;;  %1586 = vmatpush1.bf16.msra.mxu1 %v6685_v20 }
 0x4c6   :  { %1546 = vmatprep.subr.bf16.mxu0 %v6686_v21  ;;  %1587 = vmatprep.subr.bf16.mxu1 %v6687_v22 }
 0x4c9   :  { %1547 = vmatpush1.bf16.msra.mxu0 %v6688_v23  ;;  %1588 = vmatpush1.bf16.msra.mxu1 %v6689_v24 }
 0x4ca   :  { %1548 = vmatprep.subr.bf16.mxu0 %v6690_v25  ;;  %1589 = vmatprep.subr.bf16.mxu1 %v6747_v34 }
 0x4cd   :  { %1549 = vmatpush1.bf16.msra.mxu0 %v6748_v35  ;;  %1590 = vmatpush1.bf16.msra.mxu1 %v6749_v36 }
 0x4ce   :  { %1641 = vmatprep.subr.bf16.mxu0 %v6750_v37  ;;  %1682 = vmatprep.subr.bf16.mxu1 %v6751_v38 }
 0x550   :  { %v5269_v39 = vpop.f32.mrf.mxu0  ;;  %v5271_v3 = vpop.f32.mrf.mxu1 }
 0x552   :  { %v5273_v4 = vpop.f32.mrf.mxu0  ;;  %v5275_v5 = vpop.f32.mrf.mxu1 }
 0x554   :  { %v1367_v6 = vpop.f32.mrf.mxu0  ;;  %v1408_v7 = vpop.f32.mrf.mxu1 }
 0x555   :  { %v1422_v6 = vadd.f32 %v1418_v59, %v4854_v41  ;;  %v1417_v7 = vmul.f32 %v1413_v10, %v6699_v2 }
 0x556   :  { %v1368_v8 = vpop.f32.mrf.mxu0  ;;  %v1409_v9 = vpop.f32.mrf.mxu1 }
 0x557   :  { %v1421_v9 = vadd.f32 %v1417_v7, %v4862_v45  ;;  %v6758_v7 = vld [vmem:[#allocation62_spill] sm:$0xff] }
 0x570   :  { %v1457_v19 = vpop.f32.mrf.mxu0  ;;  %v1498_v20 = vpop.f32.mrf.mxu1 }
 0x571   :  { %v1505_v21 = vadd.f32 %v1457_v19, %v1419_v16  ;;  %v1507_v16 = vadd.f32 %v1498_v20, %v1421_v9  ;;  %v6760_v9 = vld [vmem:[#allocation64_spill] sm:$0xff] }
 0x572   :  { %v1459_v22 = vpop.f32.mrf.mxu0  ;;  %v1500_v23 = vpop.f32.mrf.mxu1 }
 0x573   :  { %v3554_v24 = vmul.f32 -1.442695, %v1505_v21  ;;  %v1506_v25 = vadd.f32 %v1459_v22, %v1420_v18  ;;  %v1508_v8 = vadd.f32 %v1500_v23, %v1422_v6  ;;  %v6757_v6 = vld [vmem:[#allocation61_spill] sm:$0xff] }
 0x574   :  { %v1461_v34 = vpop.f32.mrf.mxu0  ;;  %v1502_v35 = vpop.f32.mrf.mxu1 }
 0x575   :  { %3922 = vpow2.f32 %v3554_v24  ;;  %v3555_v36 = vmul.f32 -1.442695, %v1506_v25  ;;  %v3556_v12 = vmul.f32 -1.442695, %v1508_v8  ;;  %v6759_v8 = vld [vmem:[#allocation63_spill] sm:$0xff] }
 0x576   :  { %v1462_v37 = vpop.f32.mrf.mxu0  ;;  %v1503_v38 = vpop.f32.mrf.mxu1 }
 0x577   :  { %3924 = vpow2.f32 %v3555_v36 }
 0x578   :  { %3926 = vpow2.f32 %v3556_v12  ;;  %v6765_v12 = vld [vmem:[#allocation69_spill] sm:$0xff] }
 0x582   :  { %v3923_v14 = vpop.eup %3922 }
 0x583   :  { %v1512_v18 = vadd.f32 1.0, %v3923_v14  ;;  %v6766_v14 = vld [vmem:[#allocation70_spill] sm:$0xff] }
 0x584   :  { %v3925_v19 = vpop.eup %3924 }
 0x585   :  { %3928 = vrcp.f32 %v1512_v18  ;;  %v1518_v21 = vadd.f32 1.0, %v3925_v19  ;;  %v3927_v22 = vpop.eup %3926  ;;  %v6768_v18 = vld [vmem:[#allocation72_spill] sm:$0xff]  ;;  %v6769_v19 = vld [vmem:[#allocation73_spill] sm:$0xff] }
 0x586   :  { %3930 = vtanh.f32 %v1507_v16  ;;  %v1525_v59 = vadd.f32 1.0, %v3927_v22  ;;  %v6767_v16 = vld [vmem:[#allocation71_spill] sm:$0xff] }
 0x587   :  { %3932 = vrcp.f32 %v1518_v21  ;;  %v6770_v21 = vld [vmem:[#allocation74_spill] sm:$0xff]  ;;  %v6771_v22 = vld [vmem:[#allocation75_spill] sm:$0xff] }
 0x588   :  { %3934 = vrcp.f32 %v1525_v59  ;;  %v6775_v59 = vld [vmem:[#allocation79_spill] sm:$0xff] }
 0x592   :  { %v3929_v24 = vpop.eup %3928 }
 0x593   :  { %v3931_v25 = vpop.eup %3930 }
 0x594   :  { %v3933_v34 = vpop.eup %3932  ;;  %v1529_v35 = vmul.f32 %v3931_v25, %v3929_v24  ;;  %v6772_v24 = vld [vmem:[#allocation76_spill] sm:$0xff]  ;;  %v6773_v25 = vld [vmem:[#allocation77_spill] sm:$0xff] }
 0x595   :  { %v1528_v10 = vmul.f32 %v3933_v34, %v5079_v0  ;;  %v3935_v20 = vpop.eup %3934  ;;  %v6756_v0 = vld [vmem:[#allocation60_spill] sm:$0xff]  ;;  %v6774_v34 = vld [vmem:[#allocation78_spill] sm:$0xff] }
 0x597   :  { %v5286_v23 = vadd.f32 %v1529_v35, %v1528_v10  ;;  %v6776_v35 = vld [vmem:[#allocation80_spill] sm:$0xff]  ;;  %v6777_v10 = vld [vmem:[#allocation81_spill] sm:$0xff] }
 0x599   :  { %3936 = vtanh.f32 %v5286_v23 }
 0x5a6   :  { %v3937_v36 = vpop.eup %3936 }
 0x5a7   :  { %v1532_v37 = vmul.f32 %v3937_v36, %v3935_v20  ;;  %v6778_v20 = vld [vmem:[#allocation82_spill] sm:$0xff]  ;;  %v6779_v36 = vld [vmem:[#allocation83_spill] sm:$0xff] }
 0x5a9   :  { %v5289_v38 = vpack.c.bf16 %v1532_v37, %v1532_v37  ;;  %v6780_v37 = vld [vmem:[#allocation84_spill] sm:$0xff] }
 0x5ab   :  { %1567 = vmatmul.mubr.bf16.vlgmr.msra.gmra.mxu0 %v5289_v38  ;;  %1608 = vmatmul.mubr.bf16.vlgmr.msra.gmra.mxu1 %v5289_v38 }
 0x5ac   :  { %1642 = vmatpush1.bf16.msra.mxu0 %v4878_v56  ;;  %1683 = vmatpush1.bf16.msra.mxu1 %v6700_v63  ;;  %v6761_v56 = vld [vmem:[#allocation65_spill] sm:$0xff]  ;;  %v6762_v63 = vld [vmem:[#allocation66_spill] sm:$0xff] }
 0x5ad   :  { %1643 = vmatprep.subr.bf16.mxu0 %v6701_v52  ;;  %1684 = vmatprep.subr.bf16.mxu1 %v6702_v44  ;;  %v6763_v52 = vld [vmem:[#allocation67_spill] sm:$0xff]  ;;  %v6764_v44 = vld [vmem:[#allocation68_spill] sm:$0xff] }
 0x5ae   :  { %1673 = vmatprep.mubr.bf16.mxu0 %v6634_v47  ;;  %1714 = vmatprep.mubr.bf16.mxu1 %v6634_v47 }
 0x5b0   :  { %1644 = vmatpush1.bf16.msra.mxu0 %v6756_v0  ;;  %1685 = vmatpush1.bf16.msra.mxu1 %v6757_v6  ;;  %v6781_v0 = vld [vmem:[#allocation85_spill] sm:$0xff]  ;;  %v6782_v6 = vld [vmem:[#allocation23_spill] sm:$0xff] }
 0x5b1   :  { %1645 = vmatprep.subr.bf16.mxu0 %v6758_v7  ;;  %1686 = vmatprep.subr.bf16.mxu1 %v6759_v8  ;;  %v6783_v7 = vld [vmem:[#allocation24_spill] sm:$0xff]  ;;  %v4519_v8 = vmov 3  }
 0x5b2   :  { %3692 = vset.pattern.permute.xlu1 %v4519_v8 }
 0x5b4   :  { %1646 = vmatpush1.bf16.msra.mxu0 %v6760_v9  ;;  %1687 = vmatpush1.bf16.msra.mxu1 %v6761_v56  ;;  %v6784_v9 = vld [vmem:[#allocation25_spill] sm:$0xff]  ;;  %v6785_v56 = vld [vmem:[#allocation86_spill] sm:$0xff] }
 0x5b5   :  { %1647 = vmatprep.subr.bf16.mxu0 %v6762_v63  ;;  %1688 = vmatprep.subr.bf16.mxu1 %v6763_v52  ;;  %v1364_v63 = vadd.f32 %v5269_v39, %v6785_v56  ;;  %v1407_v39 = vadd.f32 %v5275_v5, %v4982_v57 }
 0x5b6   :  { %1724 = vperm.xlu1 %3692, %v6784_v9  }
 0x5b8   :  { %1648 = vmatpush1.bf16.msra.mxu0 %v6764_v44  ;;  %1689 = vmatpush1.bf16.msra.mxu1 %v6765_v12  ;;  %v6786_v12 = vld [vmem:[#allocation87_spill] sm:$0xff] }
 0x5b9   :  { %1649 = vmatprep.subr.bf16.mxu0 %v6766_v14  ;;  %1690 = vmatprep.subr.bf16.mxu1 %v6767_v16  ;;  %v1366_v14 = vadd.f32 %v5273_v4, %v6786_v12 }
 0x5bc   :  { %1650 = vmatpush1.bf16.msra.mxu0 %v6768_v18  ;;  %1691 = vmatpush1.bf16.msra.mxu1 %v6769_v19 }
 0x5bd   :  { %1651 = vmatprep.subr.bf16.mxu0 %v6770_v21  ;;  %1692 = vmatprep.subr.bf16.mxu1 %v6771_v22 }
 0x5c0   :  { %1652 = vmatpush1.bf16.msra.mxu0 %v6772_v24  ;;  %1693 = vmatpush1.bf16.msra.mxu1 %v6773_v25 }
 0x5c1   :  { %1653 = vmatprep.subr.bf16.mxu0 %v6774_v34  ;;  %1694 = vmatprep.subr.bf16.mxu1 %v6775_v59 }
 0x5c4   :  { %1654 = vmatpush1.bf16.msra.mxu0 %v6776_v35  ;;  %1695 = vmatpush1.bf16.msra.mxu1 %v6777_v10 }
 0x5c5   :  { %1655 = vmatprep.subr.bf16.mxu0 %v6778_v20  ;;  %1696 = vmatprep.subr.bf16.mxu1 %v6779_v36  ;;  %v1405_v20 = vadd.f32 %v5271_v3, %v4986_v58 }
 0x5c8   :  { %1656 = vmatpush1.bf16.msra.mxu0 %v6780_v37  ;;  %1697 = vmatpush1.bf16.msra.mxu1 %v6781_v0 }
 0x5c9   :  { %1735 = vmatprep.subr.bf16.mxu0 %v6782_v6  ;;  %1776 = vmatprep.subr.bf16.mxu1 %v6783_v7 }
 0x66b   :  { %v1568_v52 = vpop.f32.mrf.mxu0  ;;  %v1609_v44 = vpop.f32.mrf.mxu1 }
 0x66c   :  { %v1569_v16 = vadd.f32 %v1568_v52, %v1364_v63  ;;  %v1610_v4 = vadd.f32 %v1609_v44, %v1405_v20  ;;  %v6793_v20 = vld [vmem:[#allocation32_spill] sm:$0xff] }
 0x66d   :  { %v1570_v18 = vpop.f32.mrf.mxu0  ;;  %v1611_v19 = vpop.f32.mrf.mxu1 }
 0x66e   :  { %v3557_v21 = vmul.f32 -1.442695, %v1569_v16  ;;  %v1571_v22 = vadd.f32 %v1570_v18, %v1366_v14  ;;  %v1612_v10 = vadd.f32 %v1611_v19, %v1407_v39  ;;  %v6791_v39 = vld [vmem:[#allocation30_spill] sm:$0xff] }
 0x66f   :  { %v1572_v24 = vpop.f32.mrf.mxu0  ;;  %v1613_v25 = vpop.f32.mrf.mxu1 }
 0x670   :  { %3938 = vpow2.f32 %v3557_v21  ;;  %v3558_v34 = vmul.f32 -1.442695, %v1571_v22  ;;  %v3559_v36 = vmul.f32 -1.442695, %v1612_v10  ;;  %v6792_v10 = vld [vmem:[#allocation31_spill] sm:$0xff] }
 0x671   :  { %v1573_v59 = vpop.f32.mrf.mxu0  ;;  %v1614_v35 = vpop.f32.mrf.mxu1 }
 0x672   :  { %3940 = vpow2.f32 %v3558_v34  ;;  %v6788_v34 = vld [vmem:[#allocation27_spill] sm:$0xff]  ;;  %v6789_v59 = vld [vmem:[#allocation28_spill] sm:$0xff]  ;;  %v6790_v35 = vld [vmem:[#allocation29_spill] sm:$0xff] }
 0x673   :  { %3942 = vtanh.f32 %v1610_v4  ;;  %v6794_v4 = vld [vmem:[#allocation33_spill] sm:$0xff] }
 0x674   :  { %3944 = vpow2.f32 %v3559_v36  ;;  %v6795_v36 = vld [vmem:[#allocation34_spill] sm:$0xff] }
 0x67d   :  { %v3939_v37 = vpop.eup %3938 }
 0x67e   :  { %v1619_v0 = vadd.f32 1.0, %v3939_v37  ;;  %v5372_v37 = vld [vmem:[#allocation8 + $0xe4] ss:$16 sps:$4 sm:$0xff]  }
 0x67f   :  { %v3941_v8 = vpop.eup %3940  ;;  %6796 = vst [vmem:[#allocation40_spill] sm:$0xff] %v5372_v37 }
 0x680   :  { %3946 = vrcp.f32 %v1619_v0  ;;  %v1625_v63 = vadd.f32 1.0, %v3941_v8  ;;  %v3943_v52 = vpop.eup %3942  ;;  %v5375_v0 = vld [vmem:[#allocation8 + $0xec] ss:$16 sps:$4 sm:$0xff]   ;;  %v5380_v8 = vld [vmem:[#allocation8 + $0xe0] ss:$16 sps:$4 sm:$0xff]  }
 0x681   :  { %v3945_v14 = vpop.eup %3944  ;;  %6797 = vst [vmem:[#allocation41_spill] sm:$0xff] %v5375_v0  ;;  %6798 = vst [vmem:[#allocation42_spill] sm:$0xff] %v5380_v8 }
 0x682   :  { %3948 = vrcp.f32 %v1625_v63  ;;  %v1632_v5 = vadd.f32 1.0, %v3945_v14  ;;  %v5383_v63 = vld [vmem:[#allocation8 + $0xe8] ss:$16 sps:$4 sm:$0xff]   ;;  %v5389_v14 = vld [vmem:[#allocation8 + $0xcc] ss:$16 sps:$4 sm:$0xff]  }
 0x683   :  { %6799 = vst [vmem:[#allocation43_spill] sm:$0xff] %v5383_v63  ;;  %6801 = vst [vmem:[#allocation45_spill] sm:$0xff] %v5389_v14 }
 0x684   :  { %3950 = vrcp.f32 %v1632_v5  ;;  %v5406_v5 = vld [vmem:[#allocation8 + $0xa0] ss:$16 sps:$4 sm:$0xff]  }
 0x685   :  { %6806 = vst [vmem:[#allocation59_spill] sm:$0xff] %v5406_v5 }
 0x68d   :  { %v3947_v16 = vpop.eup %3946 }
 0x68e   :  { %v1636_v18 = vmul.f32 %v3947_v16, %v3943_v52  ;;  %v5386_v52 = vld [vmem:[#allocation8 + $0xc4] ss:$16 sps:$4 sm:$0xff]   ;;  %v5397_v16 = vld [vmem:[#allocation8 + $0xc8] ss:$16 sps:$4 sm:$0xff]  }
 0x68f   :  { %v3949_v21 = vpop.eup %3948  ;;  %6800 = vst [vmem:[#allocation44_spill] sm:$0xff] %v5386_v52  ;;  %6803 = vst [vmem:[#allocation54_spill] sm:$0xff] %v5397_v16 }
 0x690   :  { %v1635_v19 = vmul.f32 %v3949_v21, %v5136_v51  ;;  %v6787_v51 = vld [vmem:[#allocation26_spill] sm:$0xff] }
 0x691   :  { %v3951_v3 = vpop.eup %3950  ;;  %v5403_v21 = vld [vmem:[#allocation8 + $0xac] ss:$16 sps:$4 sm:$0xff]  }
 0x692   :  { %v5337_v22 = vadd.f32 %v1636_v18, %v1635_v19  ;;  %v5400_v18 = vld [vmem:[#allocation8 + $0xa4] ss:$16 sps:$4 sm:$0xff]   ;;  %6805 = vst [vmem:[#allocation58_spill] sm:$0xff] %v5403_v21  ;;  %v5409_v19 = vld [vmem:[#allocation8 + $0xa8] ss:$16 sps:$4 sm:$0xff]  }
 0x693   :  { %6804 = vst [vmem:[#allocation57_spill] sm:$0xff] %v5400_v18  ;;  %6807 = vst [vmem:[#allocation46_spill] sm:$0xff] %v5409_v19 }
 0x694   :  { %3952 = vtanh.f32 %v5337_v22 }
 0x6a1   :  { %v3953_v44 = vpop.eup %3952 }
 0x6a2   :  { %v1639_v24 = vmul.f32 %v3953_v44, %v3951_v3  ;;  %v5412_v3 = vld [vmem:[#allocation8 + $0x84] ss:$16 sps:$4 sm:$0xff]   ;;  %v5415_v44 = vld [vmem:[#allocation8 + $0x8c] ss:$16 sps:$4 sm:$0xff]  }
 0x6a3   :  { %6808 = vst [vmem:[#allocation47_spill] sm:$0xff] %v5412_v3  ;;  %6809 = vst [vmem:[#allocation48_spill] sm:$0xff] %v5415_v44 }
 0x6a4   :  { %v1640_v25 = vpack.c.bf16 %v1639_v24, %v1639_v24  ;;  %v5418_v24 = vld [vmem:[#allocation8 + $0x80] ss:$16 sps:$4 sm:$0xff]  }
 0x6a5   :  { %6810 = vst [vmem:[#allocation55_spill] sm:$0xff] %v5418_v24 }
 0x6a6   :  { %1674 = vmatmul.mubr.bf16.vlgmr.msra.gmra.mxu0 %v1640_v25  ;;  %1715 = vmatmul.mubr.bf16.vlgmr.msra.gmra.mxu1 %v1640_v25  ;;  %v5421_v25 = vld [vmem:[#allocation8 + $0x88] ss:$16 sps:$4 sm:$0xff]  }
 0x6a7   :  { %1736 = vmatpush1.bf16.msra.mxu0 %v5139_v42  ;;  %1777 = vmatpush1.bf16.msra.mxu1 %v5142_v61  ;;  %6811 = vst [vmem:[#allocation56_spill] sm:$0xff] %v5421_v25 }
 0x6a8   :  { %1737 = vmatprep.subr.bf16.mxu0 %v5145_v46  ;;  %1778 = vmatprep.subr.bf16.mxu1 %v5148_v28 }
 0x6a9   :  { %1767 = vmatprep.mubr.bf16.mxu0 %v6634_v47  ;;  %1808 = vmatprep.mubr.bf16.mxu1 %v6634_v47 }
 0x6ab   :  { %1738 = vmatpush1.bf16.msra.mxu0 %v5153_v30  ;;  %1779 = vmatpush1.bf16.msra.mxu1 %v5156_v32 }
 0x6ac   :  { %1739 = vmatprep.subr.bf16.mxu0 %v5159_v53  ;;  %1780 = vmatprep.subr.bf16.mxu1 %v5162_v43 }
 0x6af   :  { %1740 = vmatpush1.bf16.msra.mxu0 %v5165_v26  ;;  %1781 = vmatpush1.bf16.msra.mxu1 %v5168_v48 }
 0x6b0   :  { %1741 = vmatprep.subr.bf16.mxu0 %v5171_v49  ;;  %1782 = vmatprep.subr.bf16.mxu1 %v5174_v54 }
 0x6b3   :  { %1742 = vmatpush1.bf16.msra.mxu0 %v5177_v27  ;;  %1783 = vmatpush1.bf16.msra.mxu1 %v5180_v55 }
 0x6b4   :  { %1743 = vmatprep.subr.bf16.mxu0 %v5183_v62  ;;  %1784 = vmatprep.subr.bf16.mxu1 %v6787_v51 }
 0x6b7   :  { %1744 = vmatpush1.bf16.msra.mxu0 %v6788_v34  ;;  %1785 = vmatpush1.bf16.msra.mxu1 %v6789_v59 }
 0x6b8   :  { %1745 = vmatprep.subr.bf16.mxu0 %v6790_v35  ;;  %1786 = vmatprep.subr.bf16.mxu1 %v6791_v39 }
 0x6bb   :  { %1746 = vmatpush1.bf16.msra.mxu0 %v6792_v10  ;;  %1787 = vmatpush1.bf16.msra.mxu1 %v6793_v20 }
 0x6bc   :  { %1747 = vmatprep.subr.bf16.mxu0 %v6794_v4  ;;  %1788 = vmatprep.subr.bf16.mxu1 %v6795_v36 }
 0x6bf   :  { %1748 = vmatpush1.bf16.msra.mxu0 %v5213_v29  ;;  %1789 = vmatpush1.bf16.msra.mxu1 %v5216_v1 }
 0x6c0   :  { %1749 = vmatprep.subr.bf16.mxu0 %v5219_v60  ;;  %1790 = vmatprep.subr.bf16.mxu1 %v5222_v33 }
 0x6c3   :  { %1750 = vmatpush1.bf16.msra.mxu0 %v5225_v40  ;;  %1791 = vmatpush1.bf16.msra.mxu1 %v5228_v31 }
 0x6c4   :  { %1846 = vmatprep.subr.bf16.mxu0 %v5372_v37  ;;  %1887 = vmatprep.subr.bf16.mxu1 %v5375_v0 }
 0x6c6   :  { %1768 = vmatmul.mubr.bf16.vlgmr.msra.gmra.mxu0 %v5289_v38  ;;  %1809 = vmatmul.mubr.bf16.vlgmr.msra.gmra.mxu1 %v5289_v38  ;;  %v5394_v38 = vld [vmem:[#allocation8 + $0xc0] ss:$16 sps:$4 sm:$0xff]  }
 0x6c7   :  { %1847 = vmatpush1.bf16.msra.mxu0 %v5380_v8  ;;  %1888 = vmatpush1.bf16.msra.mxu1 %v5383_v63  ;;  %6802 = vst [vmem:[#allocation53_spill] sm:$0xff] %v5394_v38 }
 0x6c8   :  { %1848 = vmatprep.subr.bf16.mxu0 %v5386_v52  ;;  %1889 = vmatprep.subr.bf16.mxu1 %v5389_v14  ;;  %v1725_v14 = vpop.permute.xlu1 %1724 }
 0x6c9   :  { %1878 = vmatprep.mubr.bf16.mxu0 %v6634_v47  ;;  %1919 = vmatprep.mubr.bf16.mxu1 %v6634_v47  ;;  %v1727_v52 = vmul.f32 %v1725_v14, %v6752_v11 }
 0x6cb   :  { %1849 = vmatpush1.bf16.msra.mxu0 %v5394_v38  ;;  %1890 = vmatpush1.bf16.msra.mxu1 %v5397_v16  ;;  %v1731_v63 = vadd.f32 %v1727_v52, %v6754_v15 }
 0x6cc   :  { %1850 = vmatprep.subr.bf16.mxu0 %v5400_v18  ;;  %1891 = vmatprep.subr.bf16.mxu1 %v5403_v21 }
 0x6cf   :  { %1851 = vmatpush1.bf16.msra.mxu0 %v5406_v5  ;;  %1892 = vmatpush1.bf16.msra.mxu1 %v5409_v19  ;;  %v5424_v5 = vld [vmem:[#allocation8 + $0x64] ss:$16 sps:$4 sm:$0xff]   ;;  %v5427_v19 = vld [vmem:[#allocation8 + $0x6c] ss:$16 sps:$4 sm:$0xff]  }
 0x6d0   :  { %1852 = vmatprep.subr.bf16.mxu0 %v5412_v3  ;;  %1893 = vmatprep.subr.bf16.mxu1 %v5415_v44  ;;  %6812 = vst [vmem:[#allocation50_spill] sm:$0xff] %v5424_v5  ;;  %6813 = vst [vmem:[#allocation60_spill] sm:$0xff] %v5427_v19  ;;  %v5430_v3 = vld [vmem:[#allocation8 + $0x60] ss:$16 sps:$4 sm:$0xff]   ;;  %v5433_v44 = vld [vmem:[#allocation8 + $0x68] ss:$16 sps:$4 sm:$0xff]  }
 0x6d1   :  { %6814 = vst [vmem:[#allocation61_spill] sm:$0xff] %v5430_v3  ;;  %6815 = vst [vmem:[#allocation62_spill] sm:$0xff] %v5433_v44 }
 0x6d3   :  { %1853 = vmatpush1.bf16.msra.mxu0 %v5418_v24  ;;  %1894 = vmatpush1.bf16.msra.mxu1 %v5421_v25  ;;  %v5436_v24 = vld [vmem:[#allocation8 + $0x44] ss:$16 sps:$4 sm:$0xff]   ;;  %v5439_v25 = vld [vmem:[#allocation8 + $0x4c] ss:$16 sps:$4 sm:$0xff]  }
 0x6d4   :  { %1854 = vmatprep.subr.bf16.mxu0 %v5424_v5  ;;  %1895 = vmatprep.subr.bf16.mxu1 %v5427_v19  ;;  %6816 = vst [vmem:[#allocation63_spill] sm:$0xff] %v5436_v24  ;;  %6817 = vst [vmem:[#allocation64_spill] sm:$0xff] %v5439_v25  ;;  %v5442_v5 = vld [vmem:[#allocation8 + $0x40] ss:$16 sps:$4 sm:$0xff]   ;;  %v5445_v19 = vld [vmem:[#allocation8 + $0x48] ss:$16 sps:$4 sm:$0xff]  }
 0x6d5   :  { %6818 = vst [vmem:[#allocation65_spill] sm:$0xff] %v5442_v5  ;;  %6819 = vst [vmem:[#allocation66_spill] sm:$0xff] %v5445_v19 }
 0x6d7   :  { %1855 = vmatpush1.bf16.msra.mxu0 %v5430_v3  ;;  %1896 = vmatpush1.bf16.msra.mxu1 %v5433_v44  ;;  %v5448_v3 = vld [vmem:[#allocation8 + $0x24] ss:$16 sps:$4 sm:$0xff]   ;;  %v5451_v44 = vld [vmem:[#allocation8 + $0x2c] ss:$16 sps:$4 sm:$0xff]  }
 0x6d8   :  { %1856 = vmatprep.subr.bf16.mxu0 %v5436_v24  ;;  %1897 = vmatprep.subr.bf16.mxu1 %v5439_v25  ;;  %6820 = vst [vmem:[#allocation67_spill] sm:$0xff] %v5448_v3  ;;  %6821 = vst [vmem:[#allocation68_spill] sm:$0xff] %v5451_v44  ;;  %v5454_v24 = vld [vmem:[#allocation8 + $0x20] ss:$16 sps:$4 sm:$0xff]   ;;  %v5457_v25 = vld [vmem:[#allocation8 + $0x28] ss:$16 sps:$4 sm:$0xff]  }
 0x6d9   :  { %6822 = vst [vmem:[#allocation69_spill] sm:$0xff] %v5454_v24  ;;  %6823 = vst [vmem:[#allocation70_spill] sm:$0xff] %v5457_v25 }
 0x6db   :  { %1857 = vmatpush1.bf16.msra.mxu0 %v5442_v5  ;;  %1898 = vmatpush1.bf16.msra.mxu1 %v5445_v19  ;;  %v5460_v5 = vld [vmem:[#allocation8 + $0x4] ss:$16 sps:$4 sm:$0xff]   ;;  %v5463_v19 = vld [vmem:[#allocation8 + $0xc] ss:$16 sps:$4 sm:$0xff]  }
 0x6dc   :  { %1858 = vmatprep.subr.bf16.mxu0 %v5448_v3  ;;  %1899 = vmatprep.subr.bf16.mxu1 %v5451_v44  ;;  %6824 = vst [vmem:[#allocation71_spill] sm:$0xff] %v5460_v5  ;;  %6825 = vst [vmem:[#allocation72_spill] sm:$0xff] %v5463_v19  ;;  %v5466_v3 = vld [vmem:[#allocation8] ss:$16 sps:$4 sm:$0xff]   ;;  %v5469_v44 = vld [vmem:[#allocation8 + $0x8] ss:$16 sps:$4 sm:$0xff]  }
 0x6dd   :  { %6826 = vst [vmem:[#allocation73_spill] sm:$0xff] %v5466_v3  ;;  %6827 = vst [vmem:[#allocation74_spill] sm:$0xff] %v5469_v44 }
 0x6df   :  { %1859 = vmatpush1.bf16.msra.mxu0 %v5454_v24  ;;  %1900 = vmatpush1.bf16.msra.mxu1 %v5457_v25  ;;  %v5472_v24 = vld [vmem:[#allocation10 + $0xe4] ss:$16 sps:$4 sm:$0xff]   ;;  %v5475_v25 = vld [vmem:[#allocation10 + $0xec] ss:$16 sps:$4 sm:$0xff]  }
 0x6e0   :  { %1860 = vmatprep.subr.bf16.mxu0 %v5460_v5  ;;  %1901 = vmatprep.subr.bf16.mxu1 %v5463_v19  ;;  %6828 = vst [vmem:[#allocation75_spill] sm:$0xff] %v5472_v24  ;;  %6829 = vst [vmem:[#allocation76_spill] sm:$0xff] %v5475_v25 }
 0x6e3   :  { %1861 = vmatpush1.bf16.msra.mxu0 %v5466_v3  ;;  %1902 = vmatpush1.bf16.msra.mxu1 %v5469_v44 }
 0x6e4   :  { %1953 = vmatprep.subr.bf16.mxu0 %v5472_v24  ;;  %1994 = vmatprep.subr.bf16.mxu1 %v5475_v25  ;;  %v1728_v24 = vmul.f32 %v1725_v14, %v6753_v13 }
 0x6e6   :  { %v1732_v25 = vadd.f32 %v1728_v24, %v6755_v17  ;;  %v1729_v24 = vmul.f32 %v1725_v14, %v6699_v2 }
 0x766   :  { %v5478_v5 = vpop.f32.mrf.mxu0  ;;  %v5480_v21 = vpop.f32.mrf.mxu1 }
 0x768   :  { %v5482_v19 = vpop.f32.mrf.mxu0  ;;  %v5484_v18 = vpop.f32.mrf.mxu1 }
 0x76a   :  { %v1679_v3 = vpop.f32.mrf.mxu0  ;;  %v1720_v16 = vpop.f32.mrf.mxu1 }
 0x76b   :  { %v1730_v16 = vmul.f32 %v1725_v14, %v6698_v50 }
 0x76c   :  { %v1680_v38 = vpop.f32.mrf.mxu0  ;;  %v1721_v44 = vpop.f32.mrf.mxu1 }
 0x76d   :  { %v1734_v52 = vadd.f32 %v1730_v16, %v4854_v41 }
 0x786   :  { %v1769_v8 = vpop.f32.mrf.mxu0  ;;  %v1810_v0 = vpop.f32.mrf.mxu1 }
 0x787   :  { %v1817_v37 = vadd.f32 %v1769_v8, %v1731_v63  ;;  %v1733_v8 = vadd.f32 %v1729_v24, %v4862_v45  ;;  %v5505_v24 = vld [vmem:[#allocation10 + $0xe8] ss:$16 sps:$4 sm:$0xff]  }
 0x788   :  { %v1771_v31 = vpop.f32.mrf.mxu0  ;;  %v1812_v40 = vpop.f32.mrf.mxu1 }
 0x789   :  { %v3560_v33 = vmul.f32 -1.442695, %v1817_v37  ;;  %v1818_v60 = vadd.f32 %v1771_v31, %v1732_v25  ;;  %v1820_v17 = vadd.f32 %v1812_v40, %v1734_v52  ;;  %v1819_v37 = vadd.f32 %v1810_v0, %v1733_v8  ;;  %v5502_v52 = vld [vmem:[#allocation10 + $0xe0] ss:$16 sps:$4 sm:$0xff]   ;;  %v5511_v8 = vld [vmem:[#allocation10 + $0xcc] ss:$16 sps:$4 sm:$0xff]  }
 0x78a   :  { %v1773_v38 = vpop.f32.mrf.mxu0  ;;  %v1814_v3 = vpop.f32.mrf.mxu1 }
 0x78b   :  { %3954 = vpow2.f32 %v3560_v33  ;;  %v3561_v44 = vmul.f32 -1.442695, %v1818_v60  ;;  %v3562_v63 = vmul.f32 -1.442695, %v1820_v17 }
 0x78c   :  { %v1774_v11 = vpop.f32.mrf.mxu0  ;;  %v1815_v1 = vpop.f32.mrf.mxu1 }
 0x78d   :  { %3956 = vpow2.f32 %v3561_v44 }
 0x78e   :  { %3958 = vpow2.f32 %v3562_v63  ;;  %v5516_v63 = vld [vmem:[#allocation10 + $0xc0] ss:$16 sps:$4 sm:$0xff]  }
 0x798   :  { %v3955_v15 = vpop.eup %3954 }
 0x799   :  { %v1824_v31 = vadd.f32 1.0, %v3955_v15 }
 0x79a   :  { %v3957_v25 = vpop.eup %3956 }
 0x79b   :  { %3960 = vrcp.f32 %v1824_v31  ;;  %v1830_v38 = vadd.f32 1.0, %v3957_v25  ;;  %v3959_v33 = vpop.eup %3958  ;;  %v5522_v31 = vld [vmem:[#allocation10 + $0xa4] ss:$16 sps:$4 sm:$0xff]   ;;  %v5525_v25 = vld [vmem:[#allocation10 + $0xac] ss:$16 sps:$4 sm:$0xff]  }
 0x79c   :  { %3962 = vtanh.f32 %v1819_v37  ;;  %v1837_v16 = vadd.f32 1.0, %v3959_v33  ;;  %v5519_v37 = vld [vmem:[#allocation10 + $0xc8] ss:$16 sps:$4 sm:$0xff]   ;;  %6830 = vst [vmem:[#allocation77_spill] sm:$0xff] %v5525_v25 }
 0x79d   :  { %3964 = vrcp.f32 %v1830_v38  ;;  %v5528_v38 = vld [vmem:[#allocation10 + $0xa0] ss:$16 sps:$4 sm:$0xff]   ;;  %v5531_v33 = vld [vmem:[#allocation10 + $0xa8] ss:$16 sps:$4 sm:$0xff]  }
 0x79e   :  { %3966 = vrcp.f32 %v1837_v16  ;;  %6831 = vst [vmem:[#allocation78_spill] sm:$0xff] %v5528_v38  ;;  %6832 = vst [vmem:[#allocation79_spill] sm:$0xff] %v5531_v33  ;;  %v5543_v16 = vld [vmem:[#allocation10 + $0x88] ss:$16 sps:$4 sm:$0xff]  }
 0x79f   :  { %6836 = vst [vmem:[#allocation83_spill] sm:$0xff] %v5543_v16 }
 0x7a8   :  { %v3961_v1 = vpop.eup %3960 }
 0x7a9   :  { %v3963_v60 = vpop.eup %3962 }
 0x7aa   :  { %v3965_v11 = vpop.eup %3964  ;;  %v1841_v3 = vmul.f32 %v3963_v60, %v3961_v1  ;;  %v5534_v1 = vld [vmem:[#allocation10 + $0x84] ss:$16 sps:$4 sm:$0xff]   ;;  %v5537_v60 = vld [vmem:[#allocation10 + $0x8c] ss:$16 sps:$4 sm:$0xff]  }
 0x7ab   :  { %v1840_v40 = vmul.f32 %v3965_v11, %v5286_v23  ;;  %v3967_v15 = vpop.eup %3966  ;;  %v5508_v23 = vld [vmem:[#allocation10 + $0xc4] ss:$16 sps:$4 sm:$0xff]   ;;  %6833 = vst [vmem:[#allocation80_spill] sm:$0xff] %v5534_v1  ;;  %6834 = vst [vmem:[#allocation81_spill] sm:$0xff] %v5537_v60  ;;  %v5540_v11 = vld [vmem:[#allocation10 + $0x80] ss:$16 sps:$4 sm:$0xff]  }
 0x7ac   :  { %6835 = vst [vmem:[#allocation82_spill] sm:$0xff] %v5540_v11 }
 0x7ad   :  { %v5495_v14 = vadd.f32 %v1841_v3, %v1840_v40  ;;  %v5546_v3 = vld [vmem:[#allocation10 + $0x64] ss:$16 sps:$4 sm:$0xff]   ;;  %v5549_v40 = vld [vmem:[#allocation10 + $0x6c] ss:$16 sps:$4 sm:$0xff]  }
 0x7ae   :  { %6837 = vst [vmem:[#allocation84_spill] sm:$0xff] %v5546_v3  ;;  %6838 = vst [vmem:[#allocation85_spill] sm:$0xff] %v5549_v40 }
 0x7af   :  { %3968 = vtanh.f32 %v5495_v14 }
 0x7bc   :  { %v3969_v17 = vpop.eup %3968 }
 0x7bd   :  { %v1844_v0 = vmul.f32 %v3969_v17, %v3967_v15  ;;  %v5552_v15 = vld [vmem:[#allocation10 + $0x60] ss:$16 sps:$4 sm:$0xff]   ;;  %v5555_v17 = vld [vmem:[#allocation10 + $0x68] ss:$16 sps:$4 sm:$0xff]  }
 0x7be   :  { %6839 = vst [vmem:[#allocation23_spill] sm:$0xff] %v5552_v15  ;;  %6840 = vst [vmem:[#allocation24_spill] sm:$0xff] %v5555_v17 }
 0x7bf   :  { %v5498_v44 = vpack.c.bf16 %v1844_v0, %v1844_v0  ;;  %v5558_v0 = vld [vmem:[#allocation10 + $0x44] ss:$16 sps:$4 sm:$0xff]  }
 0x7c0   :  { %6841 = vst [vmem:[#allocation25_spill] sm:$0xff] %v5558_v0 }
 0x7c1   :  { %1879 = vmatmul.mubr.bf16.vlgmr.msra.gmra.mxu0 %v5498_v44  ;;  %1920 = vmatmul.mubr.bf16.vlgmr.msra.gmra.mxu1 %v5498_v44 }
 0x7c2   :  { %1954 = vmatpush1.bf16.msra.mxu0 %v5502_v52  ;;  %1995 = vmatpush1.bf16.msra.mxu1 %v5505_v24 }
 0x7c3   :  { %1955 = vmatprep.subr.bf16.mxu0 %v5508_v23  ;;  %1996 = vmatprep.subr.bf16.mxu1 %v5511_v8 }
 0x7c4   :  { %1985 = vmatprep.mubr.bf16.mxu0 %v6634_v47  ;;  %2026 = vmatprep.mubr.bf16.mxu1 %v6634_v47 }
 0x7c6   :  { %1956 = vmatpush1.bf16.msra.mxu0 %v5516_v63  ;;  %1997 = vmatpush1.bf16.msra.mxu1 %v5519_v37 }
 0x7c7   :  { %1957 = vmatprep.subr.bf16.mxu0 %v5522_v31  ;;  %1998 = vmatprep.subr.bf16.mxu1 %v5525_v25 }
 0x7ca   :  { %1958 = vmatpush1.bf16.msra.mxu0 %v5528_v38  ;;  %1999 = vmatpush1.bf16.msra.mxu1 %v5531_v33 }
 0x7cb   :  { %1959 = vmatprep.subr.bf16.mxu0 %v5534_v1  ;;  %2000 = vmatprep.subr.bf16.mxu1 %v5537_v60 }
 0x7ce   :  { %1960 = vmatpush1.bf16.msra.mxu0 %v5540_v11  ;;  %2001 = vmatpush1.bf16.msra.mxu1 %v5543_v16  ;;  %v5561_v16 = vld [vmem:[#allocation10 + $0x4c] ss:$16 sps:$4 sm:$0xff]  }
 0x7cf   :  { %1961 = vmatprep.subr.bf16.mxu0 %v5546_v3  ;;  %2002 = vmatprep.subr.bf16.mxu1 %v5549_v40  ;;  %6842 = vst [vmem:[#allocation26_spill] sm:$0xff] %v5561_v16  ;;  %v5564_v3 = vld [vmem:[#allocation10 + $0x40] ss:$16 sps:$4 sm:$0xff]   ;;  %v5567_v40 = vld [vmem:[#allocation10 + $0x48] ss:$16 sps:$4 sm:$0xff]  }
 0x7d0   :  { %6843 = vst [vmem:[#allocation27_spill] sm:$0xff] %v5564_v3  ;;  %6844 = vst [vmem:[#allocation28_spill] sm:$0xff] %v5567_v40 }
 0x7d2   :  { %1962 = vmatpush1.bf16.msra.mxu0 %v5552_v15  ;;  %2003 = vmatpush1.bf16.msra.mxu1 %v5555_v17  ;;  %v5570_v15 = vld [vmem:[#allocation10 + $0x24] ss:$16 sps:$4 sm:$0xff]   ;;  %v5573_v17 = vld [vmem:[#allocation10 + $0x2c] ss:$16 sps:$4 sm:$0xff]  }
 0x7d3   :  { %1963 = vmatprep.subr.bf16.mxu0 %v5558_v0  ;;  %2004 = vmatprep.subr.bf16.mxu1 %v5561_v16  ;;  %6845 = vst [vmem:[#allocation29_spill] sm:$0xff] %v5570_v15  ;;  %6846 = vst [vmem:[#allocation30_spill] sm:$0xff] %v5573_v17  ;;  %v5576_v0 = vld [vmem:[#allocation10 + $0x20] ss:$16 sps:$4 sm:$0xff]   ;;  %v5579_v16 = vld [vmem:[#allocation10 + $0x28] ss:$16 sps:$4 sm:$0xff]  }
 0x7d4   :  { %6847 = vst [vmem:[#allocation31_spill] sm:$0xff] %v5576_v0  ;;  %6848 = vst [vmem:[#allocation32_spill] sm:$0xff] %v5579_v16 }
 0x7d6   :  { %1964 = vmatpush1.bf16.msra.mxu0 %v5564_v3  ;;  %2005 = vmatpush1.bf16.msra.mxu1 %v5567_v40  ;;  %v5582_v3 = vld [vmem:[#allocation10 + $0x4] ss:$16 sps:$4 sm:$0xff]   ;;  %v5585_v40 = vld [vmem:[#allocation10 + $0xc] ss:$16 sps:$4 sm:$0xff]  }
 0x7d7   :  { %1965 = vmatprep.subr.bf16.mxu0 %v5570_v15  ;;  %2006 = vmatprep.subr.bf16.mxu1 %v5573_v17  ;;  %6849 = vst [vmem:[#allocation33_spill] sm:$0xff] %v5582_v3  ;;  %6850 = vst [vmem:[#allocation34_spill] sm:$0xff] %v5585_v40  ;;  %v5588_v15 = vld [vmem:[#allocation10] ss:$16 sps:$4 sm:$0xff]   ;;  %v5591_v17 = vld [vmem:[#allocation10 + $0x8] ss:$16 sps:$4 sm:$0xff]  }
 0x7d8   :  { %6851 = vst [vmem:[#allocation88_spill] sm:$0xff] %v5588_v15  ;;  %6852 = vst [vmem:[#allocation89_spill] sm:$0xff] %v5591_v17 }
 0x7da   :  { %1966 = vmatpush1.bf16.msra.mxu0 %v5576_v0  ;;  %2007 = vmatpush1.bf16.msra.mxu1 %v5579_v16  ;;  %v4520_v16 = vmov 4  }
 0x7db   :  { %1967 = vmatprep.subr.bf16.mxu0 %v5582_v3  ;;  %2008 = vmatprep.subr.bf16.mxu1 %v5585_v40  ;;  %v1676_v3 = vadd.f32 %v5478_v5, %v6785_v56  ;;  %v1717_v56 = vadd.f32 %v5480_v21, %v4986_v58 }
 0x7dc   :  { %3693 = vset.pattern.permute.xlu1 %v4520_v16 }
 0x7dd   :  { %2036 = vperm.xlu1 %3693, %v6784_v9   ;;  %v1719_v9 = vadd.f32 %v5484_v18, %v4982_v57 }
 0x7de   :  { %1968 = vmatpush1.bf16.msra.mxu0 %v5588_v15  ;;  %2009 = vmatpush1.bf16.msra.mxu1 %v5591_v17  ;;  %v1678_v15 = vadd.f32 %v5482_v19, %v6786_v12 }
 0x7df   :  { %2047 = vmatprep.subr.bf16.mxu0 %v6782_v6  ;;  %2088 = vmatprep.subr.bf16.mxu1 %v6783_v7 }
 0x881   :  { %v1880_v40 = vpop.f32.mrf.mxu0  ;;  %v1921_v0 = vpop.f32.mrf.mxu1 }
 0x882   :  { %v1881_v11 = vadd.f32 %v1880_v40, %v1676_v3  ;;  %v1922_v19 = vadd.f32 %v1921_v0, %v1717_v56 }
 0x883   :  { %v1882_v60 = vpop.f32.mrf.mxu0  ;;  %v1923_v1 = vpop.f32.mrf.mxu1 }
 0x884   :  { %v3563_v17 = vmul.f32 -1.442695, %v1881_v11  ;;  %v1883_v33 = vadd.f32 %v1882_v60, %v1678_v15  ;;  %v1924_v5 = vadd.f32 %v1923_v1, %v1719_v9  ;;  %v6882_v9 = vld [vmem:[#allocation67_spill] sm:$0xff] }
 0x885   :  { %v1884_v6 = vpop.f32.mrf.mxu0  ;;  %v1925_v38 = vpop.f32.mrf.mxu1 }
 0x886   :  { %3970 = vpow2.f32 %v3563_v17  ;;  %v3564_v7 = vmul.f32 -1.442695, %v1883_v33  ;;  %v3565_v3 = vmul.f32 -1.442695, %v1924_v5  ;;  %v6883_v5 = vld [vmem:[#allocation68_spill] sm:$0xff] }
 0x887   :  { %v1885_v16 = vpop.f32.mrf.mxu0  ;;  %v1926_v25 = vpop.f32.mrf.mxu1 }
 0x888   :  { %3972 = vpow2.f32 %v3564_v7  ;;  %v6881_v16 = vld [vmem:[#allocation66_spill] sm:$0xff] }
 0x889   :  { %3974 = vtanh.f32 %v1922_v19  ;;  %v6884_v19 = vld [vmem:[#allocation69_spill] sm:$0xff] }
 0x88a   :  { %3976 = vpow2.f32 %v3565_v3  ;;  %v6885_v3 = vld [vmem:[#allocation70_spill] sm:$0xff] }
 0x893   :  { %v3971_v40 = vpop.eup %3970 }
 0x894   :  { %v1931_v12 = vadd.f32 1.0, %v3971_v40  ;;  %v6886_v40 = vld [vmem:[#allocation71_spill] sm:$0xff] }
 0x895   :  { %v3973_v60 = vpop.eup %3972 }
 0x896   :  { %3978 = vrcp.f32 %v1931_v12  ;;  %v1937_v38 = vadd.f32 1.0, %v3973_v60  ;;  %v3975_v33 = vpop.eup %3974  ;;  %v6869_v12 = vld [vmem:[#allocation46_spill] sm:$0xff]  ;;  %v6887_v60 = vld [vmem:[#allocation72_spill] sm:$0xff] }
 0x897   :  { %v3977_v25 = vpop.eup %3976 }
 0x898   :  { %3980 = vrcp.f32 %v1937_v38  ;;  %v1944_v18 = vadd.f32 1.0, %v3977_v25  ;;  %v6888_v38 = vld [vmem:[#allocation73_spill] sm:$0xff]  ;;  %v6890_v25 = vld [vmem:[#allocation75_spill] sm:$0xff] }
 0x89a   :  { %3982 = vrcp.f32 %v1944_v18 }
 0x8a3   :  { %v3979_v11 = vpop.eup %3978 }
 0x8a4   :  { %v1948_v15 = vmul.f32 %v3979_v11, %v3975_v33  ;;  %v6889_v33 = vld [vmem:[#allocation74_spill] sm:$0xff]  ;;  %v6891_v11 = vld [vmem:[#allocation76_spill] sm:$0xff] }
 0x8a5   :  { %v3981_v17 = vpop.eup %3980 }
 0x8a6   :  { %v1947_v1 = vmul.f32 %v3981_v17, %v5337_v22  ;;  %v6870_v22 = vld [vmem:[#allocation47_spill] sm:$0xff] }
 0x8a7   :  { %v3983_v56 = vpop.eup %3982 }
 0x8a8   :  { %v5606_v6 = vadd.f32 %v1948_v15, %v1947_v1 }
 0x8aa   :  { %3984 = vtanh.f32 %v5606_v6 }
 0x8b7   :  { %v3985_v21 = vpop.eup %3984 }
 0x8b8   :  { %v1951_v0 = vmul.f32 %v3985_v21, %v3983_v56 }
 0x8ba   :  { %v1952_v7 = vpack.c.bf16 %v1951_v0, %v1951_v0 }
 0x8bc   :  { %1986 = vmatmul.mubr.bf16.vlgmr.msra.gmra.mxu0 %v1952_v7  ;;  %2027 = vmatmul.mubr.bf16.vlgmr.msra.gmra.mxu1 %v1952_v7 }
 0x8bd   :  { %2048 = vmatpush1.bf16.msra.mxu0 %v5139_v42  ;;  %2089 = vmatpush1.bf16.msra.mxu1 %v5142_v61  ;;  %v6853_v42 = vld [vmem:[#allocation35_spill] sm:$0xff]  ;;  %v6854_v61 = vld [vmem:[#allocation36_spill] sm:$0xff] }
 0x8be   :  { %2049 = vmatprep.subr.bf16.mxu0 %v5145_v46  ;;  %2090 = vmatprep.subr.bf16.mxu1 %v5148_v28  ;;  %v6855_v46 = vld [vmem:[#allocation37_spill] sm:$0xff]  ;;  %v6856_v28 = vld [vmem:[#allocation38_spill] sm:$0xff] }
 0x8bf   :  { %2079 = vmatprep.mubr.bf16.mxu0 %v6634_v47  ;;  %2120 = vmatprep.mubr.bf16.mxu1 %v6634_v47 }
 0x8c1   :  { %2050 = vmatpush1.bf16.msra.mxu0 %v5153_v30  ;;  %2091 = vmatpush1.bf16.msra.mxu1 %v5156_v32  ;;  %v6857_v30 = vld [vmem:[#allocation39_spill] sm:$0xff]  ;;  %v6858_v32 = vld [vmem:[#allocation40_spill] sm:$0xff] }
 0x8c2   :  { %2051 = vmatprep.subr.bf16.mxu0 %v5159_v53  ;;  %2092 = vmatprep.subr.bf16.mxu1 %v5162_v43  ;;  %v6859_v53 = vld [vmem:[#allocation41_spill] sm:$0xff]  ;;  %v6860_v43 = vld [vmem:[#allocation42_spill] sm:$0xff] }
 0x8c5   :  { %2052 = vmatpush1.bf16.msra.mxu0 %v5165_v26  ;;  %2093 = vmatpush1.bf16.msra.mxu1 %v5168_v48  ;;  %v6861_v26 = vld [vmem:[#allocation43_spill] sm:$0xff]  ;;  %v6862_v48 = vld [vmem:[#allocation44_spill] sm:$0xff] }
 0x8c6   :  { %2053 = vmatprep.subr.bf16.mxu0 %v5171_v49  ;;  %2094 = vmatprep.subr.bf16.mxu1 %v5174_v54  ;;  %v6863_v49 = vld [vmem:[#allocation45_spill] sm:$0xff] }
 0x8c7   :  { %v6864_v54 = vld [vmem:[#allocation53_spill] sm:$0xff] }
 0x8c9   :  { %2054 = vmatpush1.bf16.msra.mxu0 %v5177_v27  ;;  %2095 = vmatpush1.bf16.msra.mxu1 %v5180_v55  ;;  %v6865_v27 = vld [vmem:[#allocation54_spill] sm:$0xff]  ;;  %v6866_v55 = vld [vmem:[#allocation57_spill] sm:$0xff] }
 0x8ca   :  { %2055 = vmatprep.subr.bf16.mxu0 %v5183_v62  ;;  %2096 = vmatprep.subr.bf16.mxu1 %v6787_v51  ;;  %v6867_v62 = vld [vmem:[#allocation58_spill] sm:$0xff]  ;;  %v6871_v51 = vld [vmem:[#allocation48_spill] sm:$0xff] }
 0x8cd   :  { %2056 = vmatpush1.bf16.msra.mxu0 %v6788_v34  ;;  %2097 = vmatpush1.bf16.msra.mxu1 %v6789_v59  ;;  %v6872_v34 = vld [vmem:[#allocation55_spill] sm:$0xff]  ;;  %v6873_v59 = vld [vmem:[#allocation56_spill] sm:$0xff] }
 0x8ce   :  { %2057 = vmatprep.subr.bf16.mxu0 %v6790_v35  ;;  %2098 = vmatprep.subr.bf16.mxu1 %v6791_v39  ;;  %v6874_v35 = vld [vmem:[#allocation50_spill] sm:$0xff]  ;;  %v6875_v39 = vld [vmem:[#allocation60_spill] sm:$0xff] }
 0x8d1   :  { %2058 = vmatpush1.bf16.msra.mxu0 %v6792_v10  ;;  %2099 = vmatpush1.bf16.msra.mxu1 %v6793_v20  ;;  %v6876_v10 = vld [vmem:[#allocation61_spill] sm:$0xff]  ;;  %v6877_v20 = vld [vmem:[#allocation62_spill] sm:$0xff] }
 0x8d2   :  { %2059 = vmatprep.subr.bf16.mxu0 %v6794_v4  ;;  %2100 = vmatprep.subr.bf16.mxu1 %v6795_v36  ;;  %v6878_v4 = vld [vmem:[#allocation63_spill] sm:$0xff]  ;;  %v6879_v36 = vld [vmem:[#allocation64_spill] sm:$0xff] }
 0x8d5   :  { %2060 = vmatpush1.bf16.msra.mxu0 %v5213_v29  ;;  %2101 = vmatpush1.bf16.msra.mxu1 %v6853_v42  ;;  %v6868_v29 = vld [vmem:[#allocation59_spill] sm:$0xff]  ;;  %v2037_v42 = vpop.permute.xlu1 %2036 }
 0x8d6   :  { %2061 = vmatprep.subr.bf16.mxu0 %v6854_v61  ;;  %2102 = vmatprep.subr.bf16.mxu1 %v6855_v46  ;;  %v6892_v61 = vld [vmem:[#allocation49_spill] sm:$0xff] }
 0x8d7   :  { %v2039_v46 = vmul.f32 %v2037_v42, %v6892_v61 }
 0x8d9   :  { %2062 = vmatpush1.bf16.msra.mxu0 %v6856_v28  ;;  %2103 = vmatpush1.bf16.msra.mxu1 %v6857_v30  ;;  %v2040_v28 = vmul.f32 %v2037_v42, %v6753_v13  ;;  %v6893_v30 = vld [vmem:[#allocation51_spill] sm:$0xff] }
 0x8da   :  { %2158 = vmatprep.subr.bf16.mxu0 %v6858_v32  ;;  %2199 = vmatprep.subr.bf16.mxu1 %v6859_v53 }
 0x8dc   :  { %2080 = vmatmul.mubr.bf16.vlgmr.msra.gmra.mxu0 %v5498_v44  ;;  %2121 = vmatmul.mubr.bf16.vlgmr.msra.gmra.mxu1 %v5498_v44  ;;  %v6880_v44 = vld [vmem:[#allocation65_spill] sm:$0xff] }
 0x8dd   :  { %2159 = vmatpush1.bf16.msra.mxu0 %v6860_v43  ;;  %2200 = vmatpush1.bf16.msra.mxu1 %v6861_v26 }
 0x8de   :  { %2160 = vmatprep.subr.bf16.mxu0 %v6862_v48  ;;  %2201 = vmatprep.subr.bf16.mxu1 %v6863_v49 }
 0x8df   :  { %2190 = vmatprep.mubr.bf16.mxu0 %v6634_v47  ;;  %2231 = vmatprep.mubr.bf16.mxu1 %v6634_v47 }
 0x8e1   :  { %2161 = vmatpush1.bf16.msra.mxu0 %v6864_v54  ;;  %2202 = vmatpush1.bf16.msra.mxu1 %v6865_v27 }
 0x8e2   :  { %2162 = vmatprep.subr.bf16.mxu0 %v6866_v55  ;;  %2203 = vmatprep.subr.bf16.mxu1 %v6867_v62 }
 0x8e5   :  { %2163 = vmatpush1.bf16.msra.mxu0 %v6868_v29  ;;  %2204 = vmatpush1.bf16.msra.mxu1 %v6869_v12 }
 0x8e6   :  { %2164 = vmatprep.subr.bf16.mxu0 %v6870_v22  ;;  %2205 = vmatprep.subr.bf16.mxu1 %v6871_v51 }
 0x8e9   :  { %2165 = vmatpush1.bf16.msra.mxu0 %v6872_v34  ;;  %2206 = vmatpush1.bf16.msra.mxu1 %v6873_v59 }
 0x8ea   :  { %2166 = vmatprep.subr.bf16.mxu0 %v6874_v35  ;;  %2207 = vmatprep.subr.bf16.mxu1 %v6875_v39 }
 0x8ed   :  { %2167 = vmatpush1.bf16.msra.mxu0 %v6876_v10  ;;  %2208 = vmatpush1.bf16.msra.mxu1 %v6877_v20 }
 0x8ee   :  { %2168 = vmatprep.subr.bf16.mxu0 %v6878_v4  ;;  %2209 = vmatprep.subr.bf16.mxu1 %v6879_v36 }
 0x8f1   :  { %2169 = vmatpush1.bf16.msra.mxu0 %v6880_v44  ;;  %2210 = vmatpush1.bf16.msra.mxu1 %v6881_v16 }
 0x8f2   :  { %2170 = vmatprep.subr.bf16.mxu0 %v6882_v9  ;;  %2211 = vmatprep.subr.bf16.mxu1 %v6883_v5 }
 0x8f5   :  { %2171 = vmatpush1.bf16.msra.mxu0 %v6884_v19  ;;  %2212 = vmatpush1.bf16.msra.mxu1 %v6885_v3 }
 0x8f6   :  { %2172 = vmatprep.subr.bf16.mxu0 %v6886_v40  ;;  %2213 = vmatprep.subr.bf16.mxu1 %v6887_v60 }
 0x8f9   :  { %2173 = vmatpush1.bf16.msra.mxu0 %v6888_v38  ;;  %2214 = vmatpush1.bf16.msra.mxu1 %v6889_v33 }
 0x8fa   :  { %2265 = vmatprep.subr.bf16.mxu0 %v6890_v25  ;;  %2306 = vmatprep.subr.bf16.mxu1 %v6891_v11  ;;  %v2043_v25 = vadd.f32 %v2039_v46, %v6893_v30  ;;  %v6894_v11 = vld [vmem:[#allocation52_spill] sm:$0xff] }
 0x8fb   :  { %v2044_v33 = vadd.f32 %v2040_v28, %v6894_v11  ;;  %v2041_v28 = vmul.f32 %v2037_v42, %v6699_v2 }
 0x97c   :  { %v5679_v15 = vpop.f32.mrf.mxu0  ;;  %v5681_v17 = vpop.f32.mrf.mxu1 }
 0x97e   :  { %v5683_v18 = vpop.f32.mrf.mxu0  ;;  %v5685_v1 = vpop.f32.mrf.mxu1 }
 0x980   :  { %v1991_v56 = vpop.f32.mrf.mxu0  ;;  %v2032_v21 = vpop.f32.mrf.mxu1 }
 0x981   :  { %v2042_v56 = vmul.f32 %v2037_v42, %v6698_v50 }
 0x982   :  { %v1992_v0 = vpop.f32.mrf.mxu0  ;;  %v2033_v7 = vpop.f32.mrf.mxu1 }
 0x983   :  { %v2046_v46 = vadd.f32 %v2042_v56, %v4854_v41 }
 0x99c   :  { %v2081_v38 = vpop.f32.mrf.mxu0  ;;  %v2122_v60 = vpop.f32.mrf.mxu1 }
 0x99d   :  { %v2129_v40 = vadd.f32 %v2081_v38, %v2043_v25  ;;  %v2045_v38 = vadd.f32 %v2041_v28, %v4862_v45  ;;  %v6897_v28 = vld [vmem:[#allocation79_spill] sm:$0xff] }
 0x99e   :  { %v2083_v3 = vpop.f32.mrf.mxu0  ;;  %v2124_v19 = vpop.f32.mrf.mxu1 }
 0x99f   :  { %v3566_v5 = vmul.f32 -1.442695, %v2129_v40  ;;  %v2130_v9 = vadd.f32 %v2083_v3, %v2044_v33  ;;  %v2132_v11 = vadd.f32 %v2124_v19, %v2046_v46  ;;  %v2131_v40 = vadd.f32 %v2122_v60, %v2045_v38  ;;  %v6896_v46 = vld [vmem:[#allocation78_spill] sm:$0xff]  ;;  %v6898_v38 = vld [vmem:[#allocation80_spill] sm:$0xff] }
 0x9a0   :  { %v2085_v21 = vpop.f32.mrf.mxu0  ;;  %v2126_v0 = vpop.f32.mrf.mxu1 }
 0x9a1   :  { %3986 = vpow2.f32 %v3566_v5  ;;  %v3567_v7 = vmul.f32 -1.442695, %v2130_v9  ;;  %v3568_v25 = vmul.f32 -1.442695, %v2132_v11 }
 0x9a2   :  { %v2086_v61 = vpop.f32.mrf.mxu0  ;;  %v2127_v16 = vpop.f32.mrf.mxu1 }
 0x9a3   :  { %3988 = vpow2.f32 %v3567_v7 }
 0x9a4   :  { %3990 = vpow2.f32 %v3568_v25  ;;  %v6899_v25 = vld [vmem:[#allocation81_spill] sm:$0xff] }
 0x9ae   :  { %v3987_v30 = vpop.eup %3986 }
 0x9af   :  { %v2136_v3 = vadd.f32 1.0, %v3987_v30 }
 0x9b0   :  { %v3989_v33 = vpop.eup %3988 }
 0x9b1   :  { %3992 = vrcp.f32 %v2136_v3  ;;  %v2142_v21 = vadd.f32 1.0, %v3989_v33  ;;  %v3991_v9 = vpop.eup %3990  ;;  %v6901_v3 = vld [vmem:[#allocation83_spill] sm:$0xff]  ;;  %v6902_v33 = vld [vmem:[#allocation84_spill] sm:$0xff] }
 0x9b2   :  { %3994 = vtanh.f32 %v2131_v40  ;;  %v2149_v56 = vadd.f32 1.0, %v3991_v9  ;;  %v6900_v40 = vld [vmem:[#allocation82_spill] sm:$0xff]  ;;  %v6904_v9 = vld [vmem:[#allocation23_spill] sm:$0xff] }
 0x9b3   :  { %3996 = vrcp.f32 %v2142_v21  ;;  %v6903_v21 = vld [vmem:[#allocation85_spill] sm:$0xff] }
 0x9b4   :  { %3998 = vrcp.f32 %v2149_v56  ;;  %v6908_v56 = vld [vmem:[#allocation27_spill] sm:$0xff] }
 0x9be   :  { %v3993_v16 = vpop.eup %3992 }
 0x9bf   :  { %v3995_v5 = vpop.eup %3994 }
 0x9c0   :  { %v3997_v61 = vpop.eup %3996  ;;  %v2153_v0 = vmul.f32 %v3995_v5, %v3993_v16  ;;  %v6905_v16 = vld [vmem:[#allocation24_spill] sm:$0xff]  ;;  %v6906_v5 = vld [vmem:[#allocation25_spill] sm:$0xff] }
 0x9c1   :  { %v2152_v19 = vmul.f32 %v3997_v61, %v5495_v14  ;;  %v3999_v60 = vpop.eup %3998  ;;  %v6895_v14 = vld [vmem:[#allocation77_spill] sm:$0xff]  ;;  %v6907_v61 = vld [vmem:[#allocation26_spill] sm:$0xff] }
 0x9c3   :  { %v5696_v42 = vadd.f32 %v2153_v0, %v2152_v19  ;;  %v6909_v0 = vld [vmem:[#allocation28_spill] sm:$0xff]  ;;  %v6910_v19 = vld [vmem:[#allocation29_spill] sm:$0xff] }
 0x9c5   :  { %4000 = vtanh.f32 %v5696_v42 }
 0x9d2   :  { %v4001_v11 = vpop.eup %4000 }
 0x9d3   :  { %v2156_v30 = vmul.f32 %v4001_v11, %v3999_v60  ;;  %v6911_v60 = vld [vmem:[#allocation30_spill] sm:$0xff]  ;;  %v6912_v11 = vld [vmem:[#allocation31_spill] sm:$0xff] }
 0x9d5   :  { %v5699_v7 = vpack.c.bf16 %v2156_v30, %v2156_v30  ;;  %v6913_v30 = vld [vmem:[#allocation32_spill] sm:$0xff] }
 0x9d7   :  { %2191 = vmatmul.mubr.bf16.vlgmr.msra.gmra.mxu0 %v5699_v7  ;;  %2232 = vmatmul.mubr.bf16.vlgmr.msra.gmra.mxu1 %v5699_v7 }
 0x9d8   :  { %2266 = vmatpush1.bf16.msra.mxu0 %v5502_v52  ;;  %2307 = vmatpush1.bf16.msra.mxu1 %v5505_v24 }
 0x9d9   :  { %2267 = vmatprep.subr.bf16.mxu0 %v5508_v23  ;;  %2308 = vmatprep.subr.bf16.mxu1 %v5511_v8 }
 0x9da   :  { %2297 = vmatprep.mubr.bf16.mxu0 %v6634_v47  ;;  %2338 = vmatprep.mubr.bf16.mxu1 %v6634_v47 }
 0x9dc   :  { %2268 = vmatpush1.bf16.msra.mxu0 %v5516_v63  ;;  %2309 = vmatpush1.bf16.msra.mxu1 %v5519_v37 }
 0x9dd   :  { %2269 = vmatprep.subr.bf16.mxu0 %v5522_v31  ;;  %2310 = vmatprep.subr.bf16.mxu1 %v6895_v14 }
 0x9e0   :  { %2270 = vmatpush1.bf16.msra.mxu0 %v6896_v46  ;;  %2311 = vmatpush1.bf16.msra.mxu1 %v6897_v28 }
 0x9e1   :  { %2271 = vmatprep.subr.bf16.mxu0 %v6898_v38  ;;  %2312 = vmatprep.subr.bf16.mxu1 %v6899_v25 }
 0x9e4   :  { %2272 = vmatpush1.bf16.msra.mxu0 %v6900_v40  ;;  %2313 = vmatpush1.bf16.msra.mxu1 %v6901_v3 }
 0x9e5   :  { %2273 = vmatprep.subr.bf16.mxu0 %v6902_v33  ;;  %2314 = vmatprep.subr.bf16.mxu1 %v6903_v21  ;;  %v6914_v21 = vld [vmem:[#allocation33_spill] sm:$0xff] }
 0x9e8   :  { %2274 = vmatpush1.bf16.msra.mxu0 %v6904_v9  ;;  %2315 = vmatpush1.bf16.msra.mxu1 %v6905_v16  ;;  %v6915_v9 = vld [vmem:[#allocation34_spill] sm:$0xff]  ;;  %v6916_v16 = vld [vmem:[#allocation88_spill] sm:$0xff] }
 0x9e9   :  { %2275 = vmatprep.subr.bf16.mxu0 %v6906_v5  ;;  %2316 = vmatprep.subr.bf16.mxu1 %v6907_v61  ;;  %v6917_v5 = vld [vmem:[#allocation89_spill] sm:$0xff]  ;;  %v5735_v61 = vld [vmem:[#allocation5 + $0xe4] ss:$16 sps:$4 sm:$0xff]  }
 0x9ea   :  { %6918 = vst [vmem:[#allocation35_spill] sm:$0xff] %v5735_v61 }
 0x9ec   :  { %2276 = vmatpush1.bf16.msra.mxu0 %v6908_v56  ;;  %2317 = vmatpush1.bf16.msra.mxu1 %v6909_v0  ;;  %v5738_v0 = vld [vmem:[#allocation5 + $0xec] ss:$16 sps:$4 sm:$0xff]  }
 0x9ed   :  { %2277 = vmatprep.subr.bf16.mxu0 %v6910_v19  ;;  %2318 = vmatprep.subr.bf16.mxu1 %v6911_v60  ;;  %6919 = vst [vmem:[#allocation36_spill] sm:$0xff] %v5738_v0  ;;  %v4521_v60 = vmov 5  }
 0x9ee   :  { %3694 = vset.pattern.permute.xlu0 %v4521_v60 }
 0x9f0   :  { %2278 = vmatpush1.bf16.msra.mxu0 %v6912_v11  ;;  %2319 = vmatpush1.bf16.msra.mxu1 %v6913_v30  ;;  %v5741_v11 = vld [vmem:[#allocation2] sm:$0x3] }
 0x9f1   :  { %2279 = vmatprep.subr.bf16.mxu0 %v6914_v21  ;;  %2320 = vmatprep.subr.bf16.mxu1 %v6915_v9  ;;  %6920 = vst [vmem:[#allocation37_spill] sm:$0xff] %v5741_v11  ;;  %v6921_v21 = vld [vmem:[#allocation86_spill] sm:$0xff] }
 0x9f2   :  { %2348 = vperm.xlu0 %3694, %v5741_v11   ;;  %v1988_v9 = vadd.f32 %v5679_v15, %v6921_v21  ;;  %v2031_v15 = vadd.f32 %v5685_v1, %v4982_v57  ;;  %v2029_v11 = vadd.f32 %v5681_v17, %v4986_v58 }
 0x9f4   :  { %2280 = vmatpush1.bf16.msra.mxu0 %v6916_v16  ;;  %2321 = vmatpush1.bf16.msra.mxu1 %v6917_v5  ;;  %v6922_v5 = vld [vmem:[#allocation87_spill] sm:$0xff] }
 0x9f5   :  { %2359 = vmatprep.subr.bf16.mxu0 %v5735_v61  ;;  %2400 = vmatprep.subr.bf16.mxu1 %v5738_v0  ;;  %v1990_v19 = vadd.f32 %v5683_v18, %v6922_v5 }
 0xa97   :  { %v2192_v16 = vpop.f32.mrf.mxu0  ;;  %v2233_v30 = vpop.f32.mrf.mxu1 }
 0xa98   :  { %v2193_v56 = vadd.f32 %v2192_v16, %v1988_v9  ;;  %v2234_v18 = vadd.f32 %v2233_v30, %v2029_v11  ;;  %v5759_v30 = vld [vmem:[#allocation5 + $0xe8] ss:$16 sps:$4 sm:$0xff]  }
 0xa99   :  { %v2194_v61 = vpop.f32.mrf.mxu0  ;;  %v2235_v33 = vpop.f32.mrf.mxu1 }
 0xa9a   :  { %v3569_v3 = vmul.f32 -1.442695, %v2193_v56  ;;  %v2195_v40 = vadd.f32 %v2194_v61, %v1990_v19  ;;  %v2236_v21 = vadd.f32 %v2235_v33, %v2031_v15  ;;  %v5770_v15 = vld [vmem:[#allocation5 + $0xc0] ss:$16 sps:$4 sm:$0xff]  }
 0xa9b   :  { %v2196_v0 = vpop.f32.mrf.mxu0  ;;  %v2237_v25 = vpop.f32.mrf.mxu1 }
 0xa9c   :  { %4002 = vpow2.f32 %v3569_v3  ;;  %v3570_v60 = vmul.f32 -1.442695, %v2195_v40  ;;  %v3571_v9 = vmul.f32 -1.442695, %v2236_v21 }
 0xa9d   :  { %v2197_v38 = vpop.f32.mrf.mxu0  ;;  %v2238_v28 = vpop.f32.mrf.mxu1 }
 0xa9e   :  { %4004 = vpow2.f32 %v3570_v60  ;;  %v5765_v60 = vld [vmem:[#allocation5 + $0xcc] ss:$16 sps:$4 sm:$0xff]  }
 0xa9f   :  { %4006 = vtanh.f32 %v2234_v18  ;;  %v5773_v18 = vld [vmem:[#allocation5 + $0xc8] ss:$16 sps:$4 sm:$0xff]  }
 0xaa0   :  { %4008 = vpow2.f32 %v3571_v9  ;;  %v5776_v9 = vld [vmem:[#allocation5 + $0xa4] ss:$16 sps:$4 sm:$0xff]  }
 0xaa9   :  { %v4003_v16 = vpop.eup %4002 }
 0xaaa   :  { %v2243_v5 = vadd.f32 1.0, %v4003_v16  ;;  %v5779_v16 = vld [vmem:[#allocation5 + $0xac] ss:$16 sps:$4 sm:$0xff]  }
 0xaab   :  { %v4005_v61 = vpop.eup %4004 }
 0xaac   :  { %4010 = vrcp.f32 %v2243_v5  ;;  %v2249_v25 = vadd.f32 1.0, %v4005_v61  ;;  %v4007_v38 = vpop.eup %4006  ;;  %v5756_v5 = vld [vmem:[#allocation5 + $0xe0] ss:$16 sps:$4 sm:$0xff]  }
 0xaad   :  { %v4009_v28 = vpop.eup %4008  ;;  %v5782_v61 = vld [vmem:[#allocation5 + $0xa0] ss:$16 sps:$4 sm:$0xff]  }
 0xaae   :  { %4012 = vrcp.f32 %v2249_v25  ;;  %v2256_v1 = vadd.f32 1.0, %v4009_v28  ;;  %v5785_v25 = vld [vmem:[#allocation5 + $0xa8] ss:$16 sps:$4 sm:$0xff]   ;;  %v5791_v28 = vld [vmem:[#allocation5 + $0x8c] ss:$16 sps:$4 sm:$0xff]  }
 0xab0   :  { %4014 = vrcp.f32 %v2256_v1  ;;  %v5803_v1 = vld [vmem:[#allocation5 + $0x6c] ss:$16 sps:$4 sm:$0xff]  }
 0xab1   :  { %6923 = vst [vmem:[#allocation38_spill] sm:$0xff] %v5803_v1 }
 0xab9   :  { %v4011_v40 = vpop.eup %4010 }
 0xaba   :  { %v2260_v3 = vmul.f32 %v4011_v40, %v4007_v38  ;;  %v5788_v38 = vld [vmem:[#allocation5 + $0x84] ss:$16 sps:$4 sm:$0xff]   ;;  %v5794_v40 = vld [vmem:[#allocation5 + $0x80] ss:$16 sps:$4 sm:$0xff]  }
 0xabb   :  { %v4013_v56 = vpop.eup %4012 }
 0xabc   :  { %v2259_v33 = vmul.f32 %v4013_v56, %v5606_v6  ;;  %v5762_v6 = vld [vmem:[#allocation5 + $0xc4] ss:$16 sps:$4 sm:$0xff]  }
 0xabd   :  { %v4015_v17 = vpop.eup %4014  ;;  %v5800_v56 = vld [vmem:[#allocation5 + $0x64] ss:$16 sps:$4 sm:$0xff]  }
 0xabe   :  { %v5753_v0 = vadd.f32 %v2260_v3, %v2259_v33  ;;  %v5797_v3 = vld [vmem:[#allocation5 + $0x88] ss:$16 sps:$4 sm:$0xff]   ;;  %v5806_v33 = vld [vmem:[#allocation5 + $0x60] ss:$16 sps:$4 sm:$0xff]  }
 0xabf   :  { %6924 = vst [vmem:[#allocation39_spill] sm:$0xff] %v5806_v33 }
 0xac0   :  { %4016 = vtanh.f32 %v5753_v0 }
 0xacd   :  { %v4017_v21 = vpop.eup %4016 }
 0xace   :  { %v2263_v19 = vmul.f32 %v4017_v21, %v4015_v17  ;;  %v5809_v17 = vld [vmem:[#allocation5 + $0x68] ss:$16 sps:$4 sm:$0xff]   ;;  %v5812_v21 = vld [vmem:[#allocation5 + $0x44] ss:$16 sps:$4 sm:$0xff]  }
 0xacf   :  { %6925 = vst [vmem:[#allocation40_spill] sm:$0xff] %v5809_v17  ;;  %6926 = vst [vmem:[#allocation41_spill] sm:$0xff] %v5812_v21 }
 0xad0   :  { %v2264_v11 = vpack.c.bf16 %v2263_v19, %v2263_v19  ;;  %v5815_v19 = vld [vmem:[#allocation5 + $0x4c] ss:$16 sps:$4 sm:$0xff]  }
 0xad1   :  { %6927 = vst [vmem:[#allocation42_spill] sm:$0xff] %v5815_v19 }
 0xad2   :  { %2298 = vmatmul.mubr.bf16.vlgmr.msra.gmra.mxu0 %v2264_v11  ;;  %2339 = vmatmul.mubr.bf16.vlgmr.msra.gmra.mxu1 %v2264_v11  ;;  %v5818_v11 = vld [vmem:[#allocation5 + $0x40] ss:$16 sps:$4 sm:$0xff]  }
 0xad3   :  { %2360 = vmatpush1.bf16.msra.mxu0 %v5756_v5  ;;  %2401 = vmatpush1.bf16.msra.mxu1 %v5759_v30  ;;  %6928 = vst [vmem:[#allocation43_spill] sm:$0xff] %v5818_v11 }
 0xad4   :  { %2361 = vmatprep.subr.bf16.mxu0 %v5762_v6  ;;  %2402 = vmatprep.subr.bf16.mxu1 %v5765_v60 }
 0xad5   :  { %2391 = vmatprep.mubr.bf16.mxu0 %v6634_v47  ;;  %2432 = vmatprep.mubr.bf16.mxu1 %v6634_v47 }
 0xad7   :  { %2362 = vmatpush1.bf16.msra.mxu0 %v5770_v15  ;;  %2403 = vmatpush1.bf16.msra.mxu1 %v5773_v18 }
 0xad8   :  { %2363 = vmatprep.subr.bf16.mxu0 %v5776_v9  ;;  %2404 = vmatprep.subr.bf16.mxu1 %v5779_v16 }
 0xadb   :  { %2364 = vmatpush1.bf16.msra.mxu0 %v5782_v61  ;;  %2405 = vmatpush1.bf16.msra.mxu1 %v5785_v25 }
 0xadc   :  { %2365 = vmatprep.subr.bf16.mxu0 %v5788_v38  ;;  %2406 = vmatprep.subr.bf16.mxu1 %v5791_v28 }
 0xadf   :  { %2366 = vmatpush1.bf16.msra.mxu0 %v5794_v40  ;;  %2407 = vmatpush1.bf16.msra.mxu1 %v5797_v3 }
 0xae0   :  { %2367 = vmatprep.subr.bf16.mxu0 %v5800_v56  ;;  %2408 = vmatprep.subr.bf16.mxu1 %v5803_v1  ;;  %v5821_v1 = vld [vmem:[#allocation5 + $0x48] ss:$16 sps:$4 sm:$0xff]  }
 0xae1   :  { %6929 = vst [vmem:[#allocation44_spill] sm:$0xff] %v5821_v1 }
 0xae3   :  { %2368 = vmatpush1.bf16.msra.mxu0 %v5806_v33  ;;  %2409 = vmatpush1.bf16.msra.mxu1 %v5809_v17  ;;  %v5824_v33 = vld [vmem:[#allocation5 + $0x24] ss:$16 sps:$4 sm:$0xff]   ;;  %v5827_v17 = vld [vmem:[#allocation5 + $0x2c] ss:$16 sps:$4 sm:$0xff]  }
 0xae4   :  { %2369 = vmatprep.subr.bf16.mxu0 %v5812_v21  ;;  %2410 = vmatprep.subr.bf16.mxu1 %v5815_v19  ;;  %6930 = vst [vmem:[#allocation45_spill] sm:$0xff] %v5824_v33  ;;  %6931 = vst [vmem:[#allocation53_spill] sm:$0xff] %v5827_v17  ;;  %v5830_v21 = vld [vmem:[#allocation5 + $0x20] ss:$16 sps:$4 sm:$0xff]   ;;  %v5833_v19 = vld [vmem:[#allocation5 + $0x28] ss:$16 sps:$4 sm:$0xff]  }
 0xae5   :  { %6932 = vst [vmem:[#allocation54_spill] sm:$0xff] %v5833_v19 }
 0xae7   :  { %2370 = vmatpush1.bf16.msra.mxu0 %v5818_v11  ;;  %2411 = vmatpush1.bf16.msra.mxu1 %v5821_v1  ;;  %v5836_v11 = vld [vmem:[#allocation5 + $0x4] ss:$16 sps:$4 sm:$0xff]   ;;  %v5839_v1 = vld [vmem:[#allocation5 + $0xc] ss:$16 sps:$4 sm:$0xff]  }
 0xae8   :  { %2371 = vmatprep.subr.bf16.mxu0 %v5824_v33  ;;  %2412 = vmatprep.subr.bf16.mxu1 %v5827_v17  ;;  %6933 = vst [vmem:[#allocation57_spill] sm:$0xff] %v5836_v11  ;;  %6934 = vst [vmem:[#allocation58_spill] sm:$0xff] %v5839_v1  ;;  %v5842_v33 = vld [vmem:[#allocation5] ss:$16 sps:$4 sm:$0xff]   ;;  %v5845_v17 = vld [vmem:[#allocation5 + $0x8] ss:$16 sps:$4 sm:$0xff]  }
 0xae9   :  { %6935 = vst [vmem:[#allocation59_spill] sm:$0xff] %v5842_v33  ;;  %6936 = vst [vmem:[#allocation46_spill] sm:$0xff] %v5845_v17 }
 0xaeb   :  { %2372 = vmatpush1.bf16.msra.mxu0 %v5830_v21  ;;  %2413 = vmatpush1.bf16.msra.mxu1 %v5833_v19 }
 0xaec   :  { %2373 = vmatprep.subr.bf16.mxu0 %v5836_v11  ;;  %2414 = vmatprep.subr.bf16.mxu1 %v5839_v1 }
 0xaef   :  { %2374 = vmatpush1.bf16.msra.mxu0 %v5842_v33  ;;  %2415 = vmatpush1.bf16.msra.mxu1 %v5845_v17 }
 0xaf0   :  { %2470 = vmatprep.subr.bf16.mxu0 %v6858_v32  ;;  %2511 = vmatprep.subr.bf16.mxu1 %v6859_v53  ;;  %v6937_v32 = vld [vmem:[#allocation66_spill] sm:$0xff]  ;;  %v6938_v53 = vld [vmem:[#allocation67_spill] sm:$0xff] }
 0xaf2   :  { %2392 = vmatmul.mubr.bf16.vlgmr.msra.gmra.mxu0 %v5699_v7  ;;  %2433 = vmatmul.mubr.bf16.vlgmr.msra.gmra.mxu1 %v5699_v7  ;;  %v6949_v7 = vld [vmem:[#allocation51_spill] sm:$0xff] }
 0xaf3   :  { %2471 = vmatpush1.bf16.msra.mxu0 %v6860_v43  ;;  %2512 = vmatpush1.bf16.msra.mxu1 %v6861_v26  ;;  %v6939_v43 = vld [vmem:[#allocation68_spill] sm:$0xff]  ;;  %v6940_v26 = vld [vmem:[#allocation69_spill] sm:$0xff] }
 0xaf4   :  { %2472 = vmatprep.subr.bf16.mxu0 %v6862_v48  ;;  %2513 = vmatprep.subr.bf16.mxu1 %v6863_v49  ;;  %v6941_v48 = vld [vmem:[#allocation70_spill] sm:$0xff]  ;;  %v6942_v49 = vld [vmem:[#allocation71_spill] sm:$0xff] }
 0xaf5   :  { %2502 = vmatprep.mubr.bf16.mxu0 %v6634_v47  ;;  %2543 = vmatprep.mubr.bf16.mxu1 %v6634_v47 }
 0xaf7   :  { %2473 = vmatpush1.bf16.msra.mxu0 %v6864_v54  ;;  %2514 = vmatpush1.bf16.msra.mxu1 %v6865_v27  ;;  %v6943_v54 = vld [vmem:[#allocation72_spill] sm:$0xff]  ;;  %v6944_v27 = vld [vmem:[#allocation73_spill] sm:$0xff] }
 0xaf8   :  { %2474 = vmatprep.subr.bf16.mxu0 %v6866_v55  ;;  %2515 = vmatprep.subr.bf16.mxu1 %v6867_v62  ;;  %v6945_v55 = vld [vmem:[#allocation74_spill] sm:$0xff]  ;;  %v6946_v62 = vld [vmem:[#allocation75_spill] sm:$0xff] }
 0xafb   :  { %2475 = vmatpush1.bf16.msra.mxu0 %v6868_v29  ;;  %2516 = vmatpush1.bf16.msra.mxu1 %v6869_v12  ;;  %v6947_v29 = vld [vmem:[#allocation76_spill] sm:$0xff] }
 0xafc   :  { %2476 = vmatprep.subr.bf16.mxu0 %v6870_v22  ;;  %2517 = vmatprep.subr.bf16.mxu1 %v6871_v51 }
 0xaff   :  { %2477 = vmatpush1.bf16.msra.mxu0 %v6872_v34  ;;  %2518 = vmatpush1.bf16.msra.mxu1 %v6873_v59 }
 0xb00   :  { %2478 = vmatprep.subr.bf16.mxu0 %v6874_v35  ;;  %2519 = vmatprep.subr.bf16.mxu1 %v6875_v39 }
 0xb03   :  { %2479 = vmatpush1.bf16.msra.mxu0 %v6876_v10  ;;  %2520 = vmatpush1.bf16.msra.mxu1 %v6877_v20  ;;  %v2349_v20 = vpop.permute.xlu0 %2348 }
 0xb04   :  { %2480 = vmatprep.subr.bf16.mxu0 %v6878_v4  ;;  %2521 = vmatprep.subr.bf16.mxu1 %v6879_v36  ;;  %v6948_v4 = vld [vmem:[#allocation49_spill] sm:$0xff] }
 0xb05   :  { %v2351_v36 = vmul.f32 %v2349_v20, %v6948_v4 }
 0xb07   :  { %2481 = vmatpush1.bf16.msra.mxu0 %v6880_v44  ;;  %2522 = vmatpush1.bf16.msra.mxu1 %v6937_v32  ;;  %v2352_v44 = vmul.f32 %v2349_v20, %v6753_v13  ;;  %v2355_v32 = vadd.f32 %v2351_v36, %v6949_v7 }
 0xb08   :  { %2482 = vmatprep.subr.bf16.mxu0 %v6938_v53  ;;  %2523 = vmatprep.subr.bf16.mxu1 %v6939_v43  ;;  %v6950_v53 = vld [vmem:[#allocation52_spill] sm:$0xff] }
 0xb09   :  { %v2356_v43 = vadd.f32 %v2352_v44, %v6950_v53  ;;  %v2353_v44 = vmul.f32 %v2349_v20, %v6699_v2 }
 0xb0b   :  { %2483 = vmatpush1.bf16.msra.mxu0 %v6940_v26  ;;  %2524 = vmatpush1.bf16.msra.mxu1 %v6941_v48 }
 0xb0c   :  { %2484 = vmatprep.subr.bf16.mxu0 %v6942_v49  ;;  %2525 = vmatprep.subr.bf16.mxu1 %v6943_v54 }
 0xb0f   :  { %2485 = vmatpush1.bf16.msra.mxu0 %v6944_v27  ;;  %2526 = vmatpush1.bf16.msra.mxu1 %v6945_v55 }
 0xb10   :  { %2577 = vmatprep.subr.bf16.mxu0 %v6946_v62  ;;  %2618 = vmatprep.subr.bf16.mxu1 %v6947_v29  ;;  %v2354_v29 = vmul.f32 %v2349_v20, %v6698_v50 }
 0xb12   :  { %v2358_v36 = vadd.f32 %v2354_v29, %v4854_v41 }
 0xb92   :  { %v5886_v12 = vpop.f32.mrf.mxu0  ;;  %v5888_v22 = vpop.f32.mrf.mxu1 }
 0xb94   :  { %v5890_v51 = vpop.f32.mrf.mxu0  ;;  %v5892_v34 = vpop.f32.mrf.mxu1 }
 0xb96   :  { %v2303_v59 = vpop.f32.mrf.mxu0  ;;  %v2344_v35 = vpop.f32.mrf.mxu1 }
 0xb98   :  { %v2304_v39 = vpop.f32.mrf.mxu0  ;;  %v2345_v10 = vpop.f32.mrf.mxu1 }
 0xbb2   :  { %v2393_v26 = vpop.f32.mrf.mxu0  ;;  %v2434_v48 = vpop.f32.mrf.mxu1 }
 0xbb3   :  { %v2441_v49 = vadd.f32 %v2393_v26, %v2355_v32  ;;  %v2357_v32 = vadd.f32 %v2353_v44, %v4862_v45  ;;  %v6962_v44 = vld [vmem:[#allocation27_spill] sm:$0xff] }
 0xbb4   :  { %v2395_v54 = vpop.f32.mrf.mxu0  ;;  %v2436_v27 = vpop.f32.mrf.mxu1 }
 0xbb5   :  { %v3572_v55 = vmul.f32 -1.442695, %v2441_v49  ;;  %v2442_v62 = vadd.f32 %v2395_v54, %v2356_v43  ;;  %v2444_v53 = vadd.f32 %v2436_v27, %v2358_v36  ;;  %v2443_v49 = vadd.f32 %v2434_v48, %v2357_v32  ;;  %v6956_v36 = vld [vmem:[#allocation84_spill] sm:$0xff] }
 0xbb6   :  { %v2397_v59 = vpop.f32.mrf.mxu0  ;;  %v2438_v35 = vpop.f32.mrf.mxu1  ;;  %v6963_v32 = vld [vmem:[#allocation28_spill] sm:$0xff] }
 0xbb7   :  { %4018 = vpow2.f32 %v3572_v55  ;;  %v3573_v39 = vmul.f32 -1.442695, %v2442_v62  ;;  %v3574_v26 = vmul.f32 -1.442695, %v2444_v53 }
 0xbb8   :  { %v2398_v10 = vpop.f32.mrf.mxu0  ;;  %v2439_v4 = vpop.f32.mrf.mxu1 }
 0xbb9   :  { %4020 = vpow2.f32 %v3573_v39 }
 0xbba   :  { %4022 = vpow2.f32 %v3574_v26  ;;  %v6964_v26 = vld [vmem:[#allocation29_spill] sm:$0xff] }
 0xbc4   :  { %v4019_v7 = vpop.eup %4018 }
 0xbc5   :  { %v2448_v43 = vadd.f32 1.0, %v4019_v7 }
 0xbc6   :  { %v4021_v54 = vpop.eup %4020 }
 0xbc7   :  { %4024 = vrcp.f32 %v2448_v43  ;;  %v2454_v59 = vadd.f32 1.0, %v4021_v54  ;;  %v4023_v55 = vpop.eup %4022  ;;  %v6966_v43 = vld [vmem:[#allocation31_spill] sm:$0xff]  ;;  %v6967_v54 = vld [vmem:[#allocation32_spill] sm:$0xff] }
 0xbc8   :  { %4026 = vtanh.f32 %v2443_v49  ;;  %v2461_v29 = vadd.f32 1.0, %v4023_v55  ;;  %v6965_v49 = vld [vmem:[#allocation30_spill] sm:$0xff] }
 0xbc9   :  { %4028 = vrcp.f32 %v2454_v59  ;;  %v6968_v59 = vld [vmem:[#allocation33_spill] sm:$0xff]  ;;  %v6969_v55 = vld [vmem:[#allocation34_spill] sm:$0xff] }
 0xbca   :  { %4030 = vrcp.f32 %v2461_v29  ;;  %v6973_v29 = vld [vmem:[#allocation36_spill] sm:$0xff] }
 0xbd4   :  { %v4025_v4 = vpop.eup %4024 }
 0xbd5   :  { %v4027_v62 = vpop.eup %4026 }
 0xbd6   :  { %v4029_v35 = vpop.eup %4028  ;;  %v2465_v39 = vmul.f32 %v4027_v62, %v4025_v4  ;;  %v6970_v4 = vld [vmem:[#allocation88_spill] sm:$0xff]  ;;  %v6971_v62 = vld [vmem:[#allocation89_spill] sm:$0xff] }
 0xbd7   :  { %v2464_v20 = vmul.f32 %v4029_v35, %v5696_v42  ;;  %v4031_v7 = vpop.eup %4030  ;;  %v6955_v42 = vld [vmem:[#allocation83_spill] sm:$0xff] }
 0xbd8   :  { %v6972_v35 = vld [vmem:[#allocation35_spill] sm:$0xff] }
 0xbd9   :  { %v5903_v27 = vadd.f32 %v2465_v39, %v2464_v20  ;;  %v4522_v39 = vmov 6   ;;  %v6974_v20 = vld [vmem:[#allocation37_spill] sm:$0xff] }
 0xbda   :  { %3695 = vset.pattern.permute.xlu1 %v4522_v39 }
 0xbdb   :  { %4032 = vtanh.f32 %v5903_v27  ;;  %2660 = vperm.xlu1 %3695, %v6974_v20  }
 0xbe8   :  { %v4033_v53 = vpop.eup %4032 }
 0xbe9   :  { %v2468_v48 = vmul.f32 %v4033_v53, %v4031_v7  ;;  %v6975_v7 = vld [vmem:[#allocation86_spill] sm:$0xff] }
 0xbea   :  { %v2300_v53 = vadd.f32 %v5886_v12, %v6975_v7  ;;  %v2343_v12 = vadd.f32 %v5892_v34, %v4982_v57 }
 0xbeb   :  { %v5906_v10 = vpack.c.bf16 %v2468_v48, %v2468_v48 }
 0xbed   :  { %2503 = vmatmul.mubr.bf16.vlgmr.msra.gmra.mxu0 %v5906_v10  ;;  %2544 = vmatmul.mubr.bf16.vlgmr.msra.gmra.mxu1 %v5906_v10 }
 0xbee   :  { %2578 = vmatpush1.bf16.msra.mxu0 %v5502_v52  ;;  %2619 = vmatpush1.bf16.msra.mxu1 %v5505_v24  ;;  %v6951_v52 = vld [vmem:[#allocation79_spill] sm:$0xff]  ;;  %v6952_v24 = vld [vmem:[#allocation80_spill] sm:$0xff] }
 0xbef   :  { %2579 = vmatprep.subr.bf16.mxu0 %v5508_v23  ;;  %2620 = vmatprep.subr.bf16.mxu1 %v5511_v8  ;;  %v6953_v23 = vld [vmem:[#allocation81_spill] sm:$0xff]  ;;  %v6954_v8 = vld [vmem:[#allocation82_spill] sm:$0xff] }
 0xbf0   :  { %2609 = vmatprep.mubr.bf16.mxu0 %v6634_v47  ;;  %2650 = vmatprep.mubr.bf16.mxu1 %v6634_v47 }
 0xbf2   :  { %2580 = vmatpush1.bf16.msra.mxu0 %v5516_v63  ;;  %2621 = vmatpush1.bf16.msra.mxu1 %v5519_v37  ;;  %v6957_v63 = vld [vmem:[#allocation85_spill] sm:$0xff]  ;;  %v6958_v37 = vld [vmem:[#allocation23_spill] sm:$0xff] }
 0xbf3   :  { %2581 = vmatprep.subr.bf16.mxu0 %v5522_v31  ;;  %2622 = vmatprep.subr.bf16.mxu1 %v6895_v14  ;;  %v6959_v31 = vld [vmem:[#allocation24_spill] sm:$0xff]  ;;  %v6960_v14 = vld [vmem:[#allocation25_spill] sm:$0xff] }
 0xbf6   :  { %2582 = vmatpush1.bf16.msra.mxu0 %v6896_v46  ;;  %2623 = vmatpush1.bf16.msra.mxu1 %v6951_v52  ;;  %v6961_v46 = vld [vmem:[#allocation26_spill] sm:$0xff] }
 0xbf7   :  { %2583 = vmatprep.subr.bf16.mxu0 %v6952_v24  ;;  %2624 = vmatprep.subr.bf16.mxu1 %v6953_v23  ;;  %v6976_v24 = vld [vmem:[#allocation87_spill] sm:$0xff] }
 0xbf8   :  { %v2302_v23 = vadd.f32 %v5890_v51, %v6976_v24 }
 0xbfa   :  { %2584 = vmatpush1.bf16.msra.mxu0 %v6954_v8  ;;  %2625 = vmatpush1.bf16.msra.mxu1 %v6955_v42 }
 0xbfb   :  { %2585 = vmatprep.subr.bf16.mxu0 %v6956_v36  ;;  %2626 = vmatprep.subr.bf16.mxu1 %v6957_v63 }
 0xbfe   :  { %2586 = vmatpush1.bf16.msra.mxu0 %v6958_v37  ;;  %2627 = vmatpush1.bf16.msra.mxu1 %v6959_v31 }
 0xbff   :  { %2587 = vmatprep.subr.bf16.mxu0 %v6960_v14  ;;  %2628 = vmatprep.subr.bf16.mxu1 %v6961_v46 }
 0xc02   :  { %2588 = vmatpush1.bf16.msra.mxu0 %v6962_v44  ;;  %2629 = vmatpush1.bf16.msra.mxu1 %v6963_v32 }
 0xc03   :  { %2589 = vmatprep.subr.bf16.mxu0 %v6964_v26  ;;  %2630 = vmatprep.subr.bf16.mxu1 %v6965_v49  ;;  %v2341_v49 = vadd.f32 %v5888_v22, %v4986_v58 }
 0xc06   :  { %2590 = vmatpush1.bf16.msra.mxu0 %v6966_v43  ;;  %2631 = vmatpush1.bf16.msra.mxu1 %v6967_v54 }
 0xc07   :  { %2591 = vmatprep.subr.bf16.mxu0 %v6968_v59  ;;  %2632 = vmatprep.subr.bf16.mxu1 %v6969_v55 }
 0xc0a   :  { %2592 = vmatpush1.bf16.msra.mxu0 %v6970_v4  ;;  %2633 = vmatpush1.bf16.msra.mxu1 %v6971_v62 }
 0xc0b   :  { %2671 = vmatprep.subr.bf16.mxu0 %v6972_v35  ;;  %2712 = vmatprep.subr.bf16.mxu1 %v6973_v29 }
 0xcad   :  { %v2504_v48 = vpop.f32.mrf.mxu0  ;;  %v2545_v52 = vpop.f32.mrf.mxu1 }
 0xcae   :  { %v2505_v8 = vadd.f32 %v2504_v48, %v2300_v53  ;;  %v2546_v51 = vadd.f32 %v2545_v52, %v2341_v49  ;;  %v5989_v49 = vld [vmem:[#allocation8 + $0xe4] ss:$16 sps:$4 sm:$0xff]  }
 0xcaf   :  { %v2506_v42 = vpop.f32.mrf.mxu0  ;;  %v2547_v36 = vpop.f32.mrf.mxu1  ;;  %6986 = vst [vmem:[#allocation47_spill] sm:$0xff] %v5989_v49 }
 0xcb0   :  { %v3575_v63 = vmul.f32 -1.442695, %v2505_v8  ;;  %v2507_v37 = vadd.f32 %v2506_v42, %v2302_v23  ;;  %v2548_v26 = vadd.f32 %v2547_v36, %v2343_v12  ;;  %v6984_v12 = vld [vmem:[#allocation45_spill] sm:$0xff] }
 0xcb1   :  { %v2508_v31 = vpop.f32.mrf.mxu0  ;;  %v2549_v14 = vpop.f32.mrf.mxu1 }
 0xcb2   :  { %4034 = vpow2.f32 %v3575_v63  ;;  %v3576_v46 = vmul.f32 -1.442695, %v2507_v37  ;;  %v3577_v43 = vmul.f32 -1.442695, %v2548_v26  ;;  %v6978_v37 = vld [vmem:[#allocation39_spill] sm:$0xff]  ;;  %v6979_v31 = vld [vmem:[#allocation40_spill] sm:$0xff] }
 0xcb3   :  { %v2509_v44 = vpop.f32.mrf.mxu0  ;;  %v2550_v32 = vpop.f32.mrf.mxu1  ;;  %v6980_v14 = vld [vmem:[#allocation41_spill] sm:$0xff] }
 0xcb4   :  { %4036 = vpow2.f32 %v3576_v46  ;;  %v6981_v46 = vld [vmem:[#allocation42_spill] sm:$0xff]  ;;  %v6982_v44 = vld [vmem:[#allocation43_spill] sm:$0xff]  ;;  %v6983_v32 = vld [vmem:[#allocation44_spill] sm:$0xff] }
 0xcb5   :  { %4038 = vtanh.f32 %v2546_v51  ;;  %v6985_v26 = vld [vmem:[#allocation53_spill] sm:$0xff] }
 0xcb6   :  { %4040 = vpow2.f32 %v3577_v43  ;;  %v5992_v51 = vld [vmem:[#allocation8 + $0xec] ss:$16 sps:$4 sm:$0xff]   ;;  %v5997_v43 = vld [vmem:[#allocation8 + $0xe0] ss:$16 sps:$4 sm:$0xff]  }
 0xcb7   :  { %6987 = vst [vmem:[#allocation48_spill] sm:$0xff] %v5992_v51  ;;  %6988 = vst [vmem:[#allocation55_spill] sm:$0xff] %v5997_v43 }
 0xcbf   :  { %v4035_v54 = vpop.eup %4034 }
 0xcc0   :  { %v2555_v59 = vadd.f32 1.0, %v4035_v54  ;;  %v6000_v54 = vld [vmem:[#allocation8 + $0xe8] ss:$16 sps:$4 sm:$0xff]  }
 0xcc1   :  { %v4037_v55 = vpop.eup %4036  ;;  %6989 = vst [vmem:[#allocation56_spill] sm:$0xff] %v6000_v54 }
 0xcc2   :  { %4042 = vrcp.f32 %v2555_v59  ;;  %v2561_v4 = vadd.f32 1.0, %v4037_v55  ;;  %v4039_v62 = vpop.eup %4038  ;;  %v6003_v59 = vld [vmem:[#allocation8 + $0xc4] ss:$16 sps:$4 sm:$0xff]   ;;  %v6006_v55 = vld [vmem:[#allocation8 + $0xcc] ss:$16 sps:$4 sm:$0xff]  }
 0xcc3   :  { %v4041_v39 = vpop.eup %4040  ;;  %6990 = vst [vmem:[#allocation50_spill] sm:$0xff] %v6003_v59  ;;  %6991 = vst [vmem:[#allocation60_spill] sm:$0xff] %v6006_v55 }
 0xcc4   :  { %4044 = vrcp.f32 %v2561_v4  ;;  %v2568_v34 = vadd.f32 1.0, %v4041_v39  ;;  %v6014_v4 = vld [vmem:[#allocation8 + $0xc8] ss:$16 sps:$4 sm:$0xff]   ;;  %v6020_v39 = vld [vmem:[#allocation8 + $0xac] ss:$16 sps:$4 sm:$0xff]  }
 0xcc5   :  { %6993 = vst [vmem:[#allocation62_spill] sm:$0xff] %v6014_v4  ;;  %6995 = vst [vmem:[#allocation64_spill] sm:$0xff] %v6020_v39 }
 0xcc6   :  { %4046 = vrcp.f32 %v2568_v34  ;;  %v6032_v34 = vld [vmem:[#allocation8 + $0x8c] ss:$16 sps:$4 sm:$0xff]  }
 0xcc7   :  { %6999 = vst [vmem:[#allocation66_spill] sm:$0xff] %v6032_v34 }
 0xccf   :  { %v4043_v53 = vpop.eup %4042 }
 0xcd0   :  { %v2572_v48 = vmul.f32 %v4043_v53, %v4039_v62  ;;  %v6017_v62 = vld [vmem:[#allocation8 + $0xa4] ss:$16 sps:$4 sm:$0xff]   ;;  %v6023_v53 = vld [vmem:[#allocation8 + $0xa0] ss:$16 sps:$4 sm:$0xff]  }
 0xcd1   :  { %v4045_v23 = vpop.eup %4044  ;;  %6994 = vst [vmem:[#allocation63_spill] sm:$0xff] %v6017_v62  ;;  %6996 = vst [vmem:[#allocation65_spill] sm:$0xff] %v6023_v53 }
 0xcd2   :  { %v2571_v8 = vmul.f32 %v4045_v23, %v5753_v0  ;;  %v6977_v0 = vld [vmem:[#allocation38_spill] sm:$0xff] }
 0xcd3   :  { %v4047_v22 = vpop.eup %4046  ;;  %v6029_v23 = vld [vmem:[#allocation8 + $0x84] ss:$16 sps:$4 sm:$0xff]  }
 0xcd4   :  { %v5954_v42 = vadd.f32 %v2572_v48, %v2571_v8  ;;  %v6026_v48 = vld [vmem:[#allocation8 + $0xa8] ss:$16 sps:$4 sm:$0xff]   ;;  %6998 = vst [vmem:[#allocation78_spill] sm:$0xff] %v6029_v23  ;;  %v6035_v8 = vld [vmem:[#allocation8 + $0x80] ss:$16 sps:$4 sm:$0xff]  }
 0xcd5   :  { %6997 = vst [vmem:[#allocation77_spill] sm:$0xff] %v6026_v48  ;;  %7000 = vst [vmem:[#allocation67_spill] sm:$0xff] %v6035_v8 }
 0xcd6   :  { %4048 = vtanh.f32 %v5954_v42 }
 0xce3   :  { %v4049_v52 = vpop.eup %4048 }
 0xce4   :  { %v2575_v36 = vmul.f32 %v4049_v52, %v4047_v22  ;;  %v6038_v22 = vld [vmem:[#allocation8 + $0x88] ss:$16 sps:$4 sm:$0xff]   ;;  %v6041_v52 = vld [vmem:[#allocation8 + $0x64] ss:$16 sps:$4 sm:$0xff]  }
 0xce5   :  { %7001 = vst [vmem:[#allocation68_spill] sm:$0xff] %v6038_v22  ;;  %7002 = vst [vmem:[#allocation69_spill] sm:$0xff] %v6041_v52 }
 0xce6   :  { %v2576_v63 = vpack.c.bf16 %v2575_v36, %v2575_v36  ;;  %v6044_v36 = vld [vmem:[#allocation8 + $0x6c] ss:$16 sps:$4 sm:$0xff]  }
 0xce7   :  { %7003 = vst [vmem:[#allocation70_spill] sm:$0xff] %v6044_v36 }
 0xce8   :  { %2610 = vmatmul.mubr.bf16.vlgmr.msra.gmra.mxu0 %v2576_v63  ;;  %2651 = vmatmul.mubr.bf16.vlgmr.msra.gmra.mxu1 %v2576_v63  ;;  %v6047_v63 = vld [vmem:[#allocation8 + $0x60] ss:$16 sps:$4 sm:$0xff]  }
 0xce9   :  { %2672 = vmatpush1.bf16.msra.mxu0 %v5756_v5  ;;  %2713 = vmatpush1.bf16.msra.mxu1 %v5759_v30  ;;  %7004 = vst [vmem:[#allocation71_spill] sm:$0xff] %v6047_v63 }
 0xcea   :  { %2673 = vmatprep.subr.bf16.mxu0 %v5762_v6  ;;  %2714 = vmatprep.subr.bf16.mxu1 %v5765_v60 }
 0xceb   :  { %2703 = vmatprep.mubr.bf16.mxu0 %v6634_v47  ;;  %2744 = vmatprep.mubr.bf16.mxu1 %v6634_v47 }
 0xced   :  { %2674 = vmatpush1.bf16.msra.mxu0 %v5770_v15  ;;  %2715 = vmatpush1.bf16.msra.mxu1 %v5773_v18 }
 0xcee   :  { %2675 = vmatprep.subr.bf16.mxu0 %v5776_v9  ;;  %2716 = vmatprep.subr.bf16.mxu1 %v5779_v16 }
 0xcf1   :  { %2676 = vmatpush1.bf16.msra.mxu0 %v5782_v61  ;;  %2717 = vmatpush1.bf16.msra.mxu1 %v5785_v25 }
 0xcf2   :  { %2677 = vmatprep.subr.bf16.mxu0 %v5788_v38  ;;  %2718 = vmatprep.subr.bf16.mxu1 %v5791_v28 }
 0xcf5   :  { %2678 = vmatpush1.bf16.msra.mxu0 %v5794_v40  ;;  %2719 = vmatpush1.bf16.msra.mxu1 %v5797_v3 }
 0xcf6   :  { %2679 = vmatprep.subr.bf16.mxu0 %v5800_v56  ;;  %2720 = vmatprep.subr.bf16.mxu1 %v6977_v0 }
 0xcf9   :  { %2680 = vmatpush1.bf16.msra.mxu0 %v6978_v37  ;;  %2721 = vmatpush1.bf16.msra.mxu1 %v6979_v31 }
 0xcfa   :  { %2681 = vmatprep.subr.bf16.mxu0 %v6980_v14  ;;  %2722 = vmatprep.subr.bf16.mxu1 %v6981_v46 }
 0xcfd   :  { %2682 = vmatpush1.bf16.msra.mxu0 %v6982_v44  ;;  %2723 = vmatpush1.bf16.msra.mxu1 %v6983_v32 }
 0xcfe   :  { %2683 = vmatprep.subr.bf16.mxu0 %v6984_v12  ;;  %2724 = vmatprep.subr.bf16.mxu1 %v6985_v26 }
 0xd01   :  { %2684 = vmatpush1.bf16.msra.mxu0 %v5830_v21  ;;  %2725 = vmatpush1.bf16.msra.mxu1 %v5833_v19 }
 0xd02   :  { %2685 = vmatprep.subr.bf16.mxu0 %v5836_v11  ;;  %2726 = vmatprep.subr.bf16.mxu1 %v5839_v1 }
 0xd05   :  { %2686 = vmatpush1.bf16.msra.mxu0 %v5842_v33  ;;  %2727 = vmatpush1.bf16.msra.mxu1 %v5845_v17 }
 0xd06   :  { %2782 = vmatprep.subr.bf16.mxu0 %v5989_v49  ;;  %2823 = vmatprep.subr.bf16.mxu1 %v5992_v51 }
 0xd08   :  { %2704 = vmatmul.mubr.bf16.vlgmr.msra.gmra.mxu0 %v5906_v10  ;;  %2745 = vmatmul.mubr.bf16.vlgmr.msra.gmra.mxu1 %v5906_v10  ;;  %v6011_v10 = vld [vmem:[#allocation8 + $0xc0] ss:$16 sps:$4 sm:$0xff]  }
 0xd09   :  { %2783 = vmatpush1.bf16.msra.mxu0 %v5997_v43  ;;  %2824 = vmatpush1.bf16.msra.mxu1 %v6000_v54  ;;  %6992 = vst [vmem:[#allocation61_spill] sm:$0xff] %v6011_v10 }
 0xd0a   :  { %2784 = vmatprep.subr.bf16.mxu0 %v6003_v59  ;;  %2825 = vmatprep.subr.bf16.mxu1 %v6006_v55 }
 0xd0b   :  { %2814 = vmatprep.mubr.bf16.mxu0 %v6634_v47  ;;  %2855 = vmatprep.mubr.bf16.mxu1 %v6634_v47 }
 0xd0d   :  { %2785 = vmatpush1.bf16.msra.mxu0 %v6011_v10  ;;  %2826 = vmatpush1.bf16.msra.mxu1 %v6014_v4  ;;  %v2661_v4 = vpop.permute.xlu1 %2660  ;;  %v7018_v10 = vld [vmem:[#allocation49_spill] sm:$0xff] }
 0xd0e   :  { %2786 = vmatprep.subr.bf16.mxu0 %v6017_v62  ;;  %2827 = vmatprep.subr.bf16.mxu1 %v6020_v39  ;;  %v2663_v55 = vmul.f32 %v2661_v4, %v7018_v10 }
 0xd11   :  { %2787 = vmatpush1.bf16.msra.mxu0 %v6023_v53  ;;  %2828 = vmatpush1.bf16.msra.mxu1 %v6026_v48 }
 0xd12   :  { %2788 = vmatprep.subr.bf16.mxu0 %v6029_v23  ;;  %2829 = vmatprep.subr.bf16.mxu1 %v6032_v34  ;;  %v6050_v34 = vld [vmem:[#allocation8 + $0x68] ss:$16 sps:$4 sm:$0xff]   ;;  %v4281_v23 = vld [vmem:[#allocation10 + $0xec] ss:$16 sps:$4 sm:$0xff]  }
 0xd13   :  { %7005 = vst [vmem:[#allocation72_spill] sm:$0xff] %v6050_v34 }
 0xd15   :  { %2789 = vmatpush1.bf16.msra.mxu0 %v6035_v8  ;;  %2830 = vmatpush1.bf16.msra.mxu1 %v6038_v22  ;;  %v6053_v8 = vld [vmem:[#allocation8 + $0x44] ss:$16 sps:$4 sm:$0xff]   ;;  %v6056_v22 = vld [vmem:[#allocation8 + $0x4c] ss:$16 sps:$4 sm:$0xff]  }
 0xd16   :  { %2790 = vmatprep.subr.bf16.mxu0 %v6041_v52  ;;  %2831 = vmatprep.subr.bf16.mxu1 %v6044_v36  ;;  %7006 = vst [vmem:[#allocation73_spill] sm:$0xff] %v6053_v8  ;;  %7007 = vst [vmem:[#allocation74_spill] sm:$0xff] %v6056_v22  ;;  %v6059_v52 = vld [vmem:[#allocation8 + $0x40] ss:$16 sps:$4 sm:$0xff]   ;;  %v6062_v36 = vld [vmem:[#allocation8 + $0x48] ss:$16 sps:$4 sm:$0xff]  }
 0xd17   :  { %7008 = vst [vmem:[#allocation75_spill] sm:$0xff] %v6059_v52  ;;  %7009 = vst [vmem:[#allocation76_spill] sm:$0xff] %v6062_v36 }
 0xd19   :  { %2791 = vmatpush1.bf16.msra.mxu0 %v6047_v63  ;;  %2832 = vmatpush1.bf16.msra.mxu1 %v6050_v34  ;;  %v6065_v63 = vld [vmem:[#allocation8 + $0x24] ss:$16 sps:$4 sm:$0xff]   ;;  %v6068_v34 = vld [vmem:[#allocation8 + $0x2c] ss:$16 sps:$4 sm:$0xff]  }
 0xd1a   :  { %2792 = vmatprep.subr.bf16.mxu0 %v6053_v8  ;;  %2833 = vmatprep.subr.bf16.mxu1 %v6056_v22  ;;  %7010 = vst [vmem:[#allocation79_spill] sm:$0xff] %v6065_v63  ;;  %7011 = vst [vmem:[#allocation80_spill] sm:$0xff] %v6068_v34  ;;  %v6071_v8 = vld [vmem:[#allocation8 + $0x20] ss:$16 sps:$4 sm:$0xff]   ;;  %v6074_v22 = vld [vmem:[#allocation8 + $0x28] ss:$16 sps:$4 sm:$0xff]  }
 0xd1b   :  { %7012 = vst [vmem:[#allocation81_spill] sm:$0xff] %v6071_v8  ;;  %7013 = vst [vmem:[#allocation82_spill] sm:$0xff] %v6074_v22 }
 0xd1d   :  { %2793 = vmatpush1.bf16.msra.mxu0 %v6059_v52  ;;  %2834 = vmatpush1.bf16.msra.mxu1 %v6062_v36  ;;  %v6077_v52 = vld [vmem:[#allocation8 + $0x4] ss:$16 sps:$4 sm:$0xff]   ;;  %v6080_v36 = vld [vmem:[#allocation8 + $0xc] ss:$16 sps:$4 sm:$0xff]  }
 0xd1e   :  { %2794 = vmatprep.subr.bf16.mxu0 %v6065_v63  ;;  %2835 = vmatprep.subr.bf16.mxu1 %v6068_v34  ;;  %7014 = vst [vmem:[#allocation83_spill] sm:$0xff] %v6077_v52  ;;  %7015 = vst [vmem:[#allocation84_spill] sm:$0xff] %v6080_v36  ;;  %v6083_v63 = vld [vmem:[#allocation8] ss:$16 sps:$4 sm:$0xff]   ;;  %v6086_v34 = vld [vmem:[#allocation8 + $0x8] ss:$16 sps:$4 sm:$0xff]  }
 0xd1f   :  { %7016 = vst [vmem:[#allocation85_spill] sm:$0xff] %v6083_v63  ;;  %7017 = vst [vmem:[#allocation23_spill] sm:$0xff] %v6086_v34 }
 0xd21   :  { %2795 = vmatpush1.bf16.msra.mxu0 %v6071_v8  ;;  %2836 = vmatpush1.bf16.msra.mxu1 %v6074_v22  ;;  %v4280_v8 = vld [vmem:[#allocation10 + $0xe4] ss:$16 sps:$4 sm:$0xff]  }
 0xd22   :  { %2796 = vmatprep.subr.bf16.mxu0 %v6077_v52  ;;  %2837 = vmatprep.subr.bf16.mxu1 %v6080_v36 }
 0xd25   :  { %2797 = vmatpush1.bf16.msra.mxu0 %v6083_v63  ;;  %2838 = vmatpush1.bf16.msra.mxu1 %v6086_v34  ;;  %v2664_v34 = vmul.f32 %v2661_v4, %v6753_v13 }
 0xd26   :  { %2889 = vmatprep.subr.bf16.mxu0 %v4280_v8  ;;  %2930 = vmatprep.subr.bf16.mxu1 %v4281_v23  ;;  %v7019_v8 = vld [vmem:[#allocation51_spill] sm:$0xff]  ;;  %v7020_v23 = vld [vmem:[#allocation52_spill] sm:$0xff] }
 0xd27   :  { %v2667_v59 = vadd.f32 %v2663_v55, %v7019_v8  ;;  %v2668_v54 = vadd.f32 %v2664_v34, %v7020_v23  ;;  %v2665_v34 = vmul.f32 %v2661_v4, %v6699_v2 }
 0xda8   :  { %v6089_v22 = vpop.f32.mrf.mxu0  ;;  %v6091_v48 = vpop.f32.mrf.mxu1 }
 0xdaa   :  { %v6093_v52 = vpop.f32.mrf.mxu0  ;;  %v6095_v53 = vpop.f32.mrf.mxu1 }
 0xdac   :  { %v2615_v36 = vpop.f32.mrf.mxu0  ;;  %v2656_v39 = vpop.f32.mrf.mxu1 }
 0xdad   :  { %v2666_v39 = vmul.f32 %v2661_v4, %v6698_v50 }
 0xdae   :  { %v2616_v62 = vpop.f32.mrf.mxu0  ;;  %v2657_v63 = vpop.f32.mrf.mxu1 }
 0xdaf   :  { %v2670_v55 = vadd.f32 %v2666_v39, %v4854_v41 }
 0xdc8   :  { %v2705_v43 = vpop.f32.mrf.mxu0  ;;  %v2746_v51 = vpop.f32.mrf.mxu1 }
 0xdc9   :  { %v2753_v49 = vadd.f32 %v2705_v43, %v2667_v59  ;;  %v2669_v43 = vadd.f32 %v2665_v34, %v4862_v45  ;;  %v4283_v34 = vld [vmem:[#allocation10 + $0xe8] ss:$16 sps:$4 sm:$0xff]  }
 0xdca   :  { %v2707_v17 = vpop.f32.mrf.mxu0  ;;  %v2748_v33 = vpop.f32.mrf.mxu1 }
 0xdcb   :  { %v3578_v1 = vmul.f32 -1.442695, %v2753_v49  ;;  %v2754_v11 = vadd.f32 %v2707_v17, %v2668_v54  ;;  %v2756_v23 = vadd.f32 %v2748_v33, %v2670_v55  ;;  %v2755_v49 = vadd.f32 %v2746_v51, %v2669_v43  ;;  %v4282_v55 = vld [vmem:[#allocation10 + $0xe0] ss:$16 sps:$4 sm:$0xff]   ;;  %v4284_v43 = vld [vmem:[#allocation10 + $0xc4] ss:$16 sps:$4 sm:$0xff]  }
 0xdcc   :  { %v2709_v62 = vpop.f32.mrf.mxu0  ;;  %v2750_v36 = vpop.f32.mrf.mxu1 }
 0xdcd   :  { %4050 = vpow2.f32 %v3578_v1  ;;  %v3579_v63 = vmul.f32 -1.442695, %v2754_v11  ;;  %v3580_v59 = vmul.f32 -1.442695, %v2756_v23 }
 0xdce   :  { %v2710_v10 = vpop.f32.mrf.mxu0  ;;  %v2751_v19 = vpop.f32.mrf.mxu1 }
 0xdcf   :  { %4052 = vpow2.f32 %v3579_v63 }
 0xdd0   :  { %4054 = vpow2.f32 %v3580_v59  ;;  %v4286_v59 = vld [vmem:[#allocation10 + $0xc0] ss:$16 sps:$4 sm:$0xff]  }
 0xdda   :  { %v4051_v8 = vpop.eup %4050 }
 0xddb   :  { %v2760_v17 = vadd.f32 1.0, %v4051_v8 }
 0xddc   :  { %v4053_v54 = vpop.eup %4052 }
 0xddd   :  { %4056 = vrcp.f32 %v2760_v17  ;;  %v2766_v62 = vadd.f32 1.0, %v4053_v54  ;;  %v4055_v1 = vpop.eup %4054  ;;  %v4288_v17 = vld [vmem:[#allocation10 + $0xa4] ss:$16 sps:$4 sm:$0xff]   ;;  %v4289_v54 = vld [vmem:[#allocation10 + $0xac] ss:$16 sps:$4 sm:$0xff]  }
 0xdde   :  { %4058 = vtanh.f32 %v2755_v49  ;;  %v2773_v39 = vadd.f32 1.0, %v4055_v1  ;;  %v4287_v49 = vld [vmem:[#allocation10 + $0xc8] ss:$16 sps:$4 sm:$0xff]  }
 0xddf   :  { %4060 = vrcp.f32 %v2766_v62  ;;  %v4290_v62 = vld [vmem:[#allocation10 + $0xa0] ss:$16 sps:$4 sm:$0xff]   ;;  %v4291_v1 = vld [vmem:[#allocation10 + $0xa8] ss:$16 sps:$4 sm:$0xff]  }
 0xde0   :  { %4062 = vrcp.f32 %v2773_v39  ;;  %v4295_v39 = vld [vmem:[#allocation10 + $0x88] ss:$16 sps:$4 sm:$0xff]  }
 0xdea   :  { %v4057_v19 = vpop.eup %4056 }
 0xdeb   :  { %v4059_v11 = vpop.eup %4058 }
 0xdec   :  { %v4061_v10 = vpop.eup %4060  ;;  %v2777_v36 = vmul.f32 %v4059_v11, %v4057_v19  ;;  %v4292_v19 = vld [vmem:[#allocation10 + $0x84] ss:$16 sps:$4 sm:$0xff]   ;;  %v4293_v11 = vld [vmem:[#allocation10 + $0x8c] ss:$16 sps:$4 sm:$0xff]  }
 0xded   :  { %v2776_v33 = vmul.f32 %v4061_v10, %v5903_v27  ;;  %v4063_v51 = vpop.eup %4062  ;;  %v4285_v27 = vld [vmem:[#allocation10 + $0xcc] ss:$16 sps:$4 sm:$0xff]   ;;  %v4294_v10 = vld [vmem:[#allocation10 + $0x80] ss:$16 sps:$4 sm:$0xff]  }
 0xdef   :  { %v6106_v4 = vadd.f32 %v2777_v36, %v2776_v33  ;;  %v4296_v36 = vld [vmem:[#allocation10 + $0x64] ss:$16 sps:$4 sm:$0xff]   ;;  %v4297_v33 = vld [vmem:[#allocation10 + $0x6c] ss:$16 sps:$4 sm:$0xff]  }
 0xdf1   :  { %4064 = vtanh.f32 %v6106_v4 }
 0xdfe   :  { %v4065_v8 = vpop.eup %4064 }
 0xdff   :  { %v2780_v23 = vmul.f32 %v4065_v8, %v4063_v51  ;;  %v4298_v51 = vld [vmem:[#allocation10 + $0x60] ss:$16 sps:$4 sm:$0xff]   ;;  %v4299_v8 = vld [vmem:[#allocation10 + $0x68] ss:$16 sps:$4 sm:$0xff]  }
 0xe01   :  { %v6109_v63 = vpack.c.bf16 %v2780_v23, %v2780_v23  ;;  %v4300_v23 = vld [vmem:[#allocation10 + $0x44] ss:$16 sps:$4 sm:$0xff]  }
 0xe03   :  { %2815 = vmatmul.mubr.bf16.vlgmr.msra.gmra.mxu0 %v6109_v63  ;;  %2856 = vmatmul.mubr.bf16.vlgmr.msra.gmra.mxu1 %v6109_v63 }
 0xe04   :  { %2890 = vmatpush1.bf16.msra.mxu0 %v4282_v55  ;;  %2931 = vmatpush1.bf16.msra.mxu1 %v4283_v34  ;;  %v4301_v55 = vld [vmem:[#allocation10 + $0x4c] ss:$16 sps:$4 sm:$0xff]   ;;  %v4302_v34 = vld [vmem:[#allocation10 + $0x40] ss:$16 sps:$4 sm:$0xff]  }
 0xe05   :  { %2891 = vmatprep.subr.bf16.mxu0 %v4284_v43  ;;  %2932 = vmatprep.subr.bf16.mxu1 %v4285_v27  ;;  %v4303_v43 = vld [vmem:[#allocation10 + $0x48] ss:$16 sps:$4 sm:$0xff]   ;;  %v4304_v27 = vld [vmem:[#allocation10 + $0x24] ss:$16 sps:$4 sm:$0xff]  }
 0xe06   :  { %2921 = vmatprep.mubr.bf16.mxu0 %v6634_v47  ;;  %2962 = vmatprep.mubr.bf16.mxu1 %v6634_v47 }
 0xe08   :  { %2892 = vmatpush1.bf16.msra.mxu0 %v4286_v59  ;;  %2933 = vmatpush1.bf16.msra.mxu1 %v4287_v49  ;;  %v4305_v59 = vld [vmem:[#allocation10 + $0x2c] ss:$16 sps:$4 sm:$0xff]   ;;  %v4306_v49 = vld [vmem:[#allocation10 + $0x20] ss:$16 sps:$4 sm:$0xff]  }
 0xe09   :  { %2893 = vmatprep.subr.bf16.mxu0 %v4288_v17  ;;  %2934 = vmatprep.subr.bf16.mxu1 %v4289_v54  ;;  %v4307_v17 = vld [vmem:[#allocation10 + $0x28] ss:$16 sps:$4 sm:$0xff]   ;;  %v4308_v54 = vld [vmem:[#allocation10 + $0x4] ss:$16 sps:$4 sm:$0xff]  }
 0xe0c   :  { %2894 = vmatpush1.bf16.msra.mxu0 %v4290_v62  ;;  %2935 = vmatpush1.bf16.msra.mxu1 %v4291_v1  ;;  %v4309_v62 = vld [vmem:[#allocation10 + $0xc] ss:$16 sps:$4 sm:$0xff]   ;;  %v4310_v1 = vld [vmem:[#allocation10] ss:$16 sps:$4 sm:$0xff]  }
 0xe0d   :  { %2895 = vmatprep.subr.bf16.mxu0 %v4292_v19  ;;  %2936 = vmatprep.subr.bf16.mxu1 %v4293_v11  ;;  %v4311_v19 = vld [vmem:[#allocation10 + $0x8] ss:$16 sps:$4 sm:$0xff]   ;;  %v4523_v11 = vmov 7  }
 0xe0e   :  { %3696 = vset.pattern.permute.xlu1 %v4523_v11  ;;  %3697 = vset.pattern.permute.xlu0 %v4523_v11 }
 0xe0f   :  { %2972 = vperm.xlu1 %3696, %v6974_v20   ;;  %v2655_v20 = vadd.f32 %v6095_v53, %v4982_v57 }
 0xe10   :  { %2896 = vmatpush1.bf16.msra.mxu0 %v4294_v10  ;;  %2937 = vmatpush1.bf16.msra.mxu1 %v4295_v39  ;;  %v2612_v10 = vadd.f32 %v6089_v22, %v6975_v7 }
 0xe11   :  { %2897 = vmatprep.subr.bf16.mxu0 %v4296_v36  ;;  %2938 = vmatprep.subr.bf16.mxu1 %v4297_v33  ;;  %v2614_v33 = vadd.f32 %v6093_v52, %v6976_v24 }
 0xe14   :  { %2898 = vmatpush1.bf16.msra.mxu0 %v4298_v51  ;;  %2939 = vmatpush1.bf16.msra.mxu1 %v4299_v8 }
 0xe15   :  { %2899 = vmatprep.subr.bf16.mxu0 %v4300_v23  ;;  %2940 = vmatprep.subr.bf16.mxu1 %v4301_v55 }
 0xe18   :  { %2900 = vmatpush1.bf16.msra.mxu0 %v4302_v34  ;;  %2941 = vmatpush1.bf16.msra.mxu1 %v4303_v43 }
 0xe19   :  { %2901 = vmatprep.subr.bf16.mxu0 %v4304_v27  ;;  %2942 = vmatprep.subr.bf16.mxu1 %v4305_v59 }
 0xe1c   :  { %2902 = vmatpush1.bf16.msra.mxu0 %v4306_v49  ;;  %2943 = vmatpush1.bf16.msra.mxu1 %v4307_v17  ;;  %v2653_v49 = vadd.f32 %v6091_v48, %v4986_v58 }
 0xe1d   :  { %2903 = vmatprep.subr.bf16.mxu0 %v4308_v54  ;;  %2944 = vmatprep.subr.bf16.mxu1 %v4309_v62 }
 0xe20   :  { %2904 = vmatpush1.bf16.msra.mxu0 %v4310_v1  ;;  %2945 = vmatpush1.bf16.msra.mxu1 %v4311_v19 }
 0xe21   :  { %2983 = vmatprep.subr.bf16.mxu0 %v6972_v35  ;;  %3024 = vmatprep.subr.bf16.mxu1 %v6973_v29 }
 0xec3   :  { %v2816_v39 = vpop.f32.mrf.mxu0  ;;  %v2857_v36 = vpop.f32.mrf.mxu1 }
 0xec4   :  { %v2817_v51 = vadd.f32 %v2816_v39, %v2612_v10  ;;  %v2858_v52 = vadd.f32 %v2857_v36, %v2653_v49  ;;  %v7056_v49 = vld [vmem:[#allocation85_spill] sm:$0xff] }
 0xec5   :  { %v2818_v8 = vpop.f32.mrf.mxu0  ;;  %v2859_v23 = vpop.f32.mrf.mxu1 }
 0xec6   :  { %v3581_v55 = vmul.f32 -1.442695, %v2817_v51  ;;  %v2819_v35 = vadd.f32 %v2818_v8, %v2614_v33  ;;  %v2860_v22 = vadd.f32 %v2859_v23, %v2655_v20  ;;  %v7054_v20 = vld [vmem:[#allocation83_spill] sm:$0xff] }
 0xec7   :  { %v2820_v34 = vpop.f32.mrf.mxu0  ;;  %v2861_v29 = vpop.f32.mrf.mxu1 }
 0xec8   :  { %4066 = vpow2.f32 %v3581_v55  ;;  %v3582_v43 = vmul.f32 -1.442695, %v2819_v35  ;;  %v3583_v17 = vmul.f32 -1.442695, %v2860_v22  ;;  %v7049_v34 = vld [vmem:[#allocation76_spill] sm:$0xff]  ;;  %v7050_v29 = vld [vmem:[#allocation79_spill] sm:$0xff] }
 0xec9   :  { %v2821_v27 = vpop.f32.mrf.mxu0  ;;  %v2862_v59 = vpop.f32.mrf.mxu1  ;;  %v7055_v22 = vld [vmem:[#allocation84_spill] sm:$0xff] }
 0xeca   :  { %4068 = vpow2.f32 %v3582_v43  ;;  %v7051_v43 = vld [vmem:[#allocation80_spill] sm:$0xff]  ;;  %v7052_v27 = vld [vmem:[#allocation81_spill] sm:$0xff]  ;;  %v7053_v59 = vld [vmem:[#allocation82_spill] sm:$0xff] }
 0xecb   :  { %4070 = vtanh.f32 %v2858_v52  ;;  %v7057_v52 = vld [vmem:[#allocation23_spill] sm:$0xff] }
 0xecc   :  { %4072 = vpow2.f32 %v3583_v17 }
 0xed5   :  { %v4067_v54 = vpop.eup %4066 }
 0xed6   :  { %v2867_v62 = vadd.f32 1.0, %v4067_v54 }
 0xed7   :  { %v4069_v1 = vpop.eup %4068 }
 0xed8   :  { %4074 = vrcp.f32 %v2867_v62  ;;  %v2873_v19 = vadd.f32 1.0, %v4069_v1  ;;  %v4071_v11 = vpop.eup %4070 }
 0xed9   :  { %v4073_v10 = vpop.eup %4072 }
 0xeda   :  { %4076 = vrcp.f32 %v2873_v19  ;;  %v2880_v53 = vadd.f32 1.0, %v4073_v10 }
 0xedc   :  { %4078 = vrcp.f32 %v2880_v53 }
 0xee5   :  { %v4075_v39 = vpop.eup %4074 }
 0xee6   :  { %v2884_v33 = vmul.f32 %v4075_v39, %v4071_v11 }
 0xee7   :  { %v4077_v51 = vpop.eup %4076 }
 0xee8   :  { %v2883_v8 = vmul.f32 %v4077_v51, %v5954_v42  ;;  %v7037_v42 = vld [vmem:[#allocation77_spill] sm:$0xff] }
 0xee9   :  { %v4079_v48 = vpop.eup %4078  ;;  %v7058_v51 = vld [vmem:[#allocation49_spill] sm:$0xff] }
 0xeea   :  { %v6127_v23 = vadd.f32 %v2884_v33, %v2883_v8  ;;  %v2973_v33 = vpop.permute.xlu1 %2972 }
 0xeeb   :  { %v2975_v53 = vmul.f32 %v2973_v33, %v7058_v51  ;;  %v2976_v8 = vmul.f32 %v2973_v33, %v6753_v13 }
 0xeec   :  { %4080 = vtanh.f32 %v6127_v23 }
 0xef9   :  { %v4081_v36 = vpop.eup %4080 }
 0xefa   :  { %v2887_v55 = vmul.f32 %v4081_v36, %v4079_v48  ;;  %v7059_v48 = vld [vmem:[#allocation51_spill] sm:$0xff] }
 0xefb   :  { %v2979_v36 = vadd.f32 %v2975_v53, %v7059_v48 }
 0xefc   :  { %v2888_v35 = vpack.c.bf16 %v2887_v55, %v2887_v55  ;;  %v7060_v55 = vld [vmem:[#allocation52_spill] sm:$0xff] }
 0xefe   :  { %2922 = vmatmul.mubr.bf16.vlgmr.msra.gmra.mxu0 %v2888_v35  ;;  %2963 = vmatmul.mubr.bf16.vlgmr.msra.gmra.mxu1 %v2888_v35  ;;  %v2980_v35 = vadd.f32 %v2976_v8, %v7060_v55 }
 0xeff   :  { %2984 = vmatpush1.bf16.msra.mxu0 %v5756_v5  ;;  %3025 = vmatpush1.bf16.msra.mxu1 %v5759_v30  ;;  %v7021_v5 = vld [vmem:[#allocation54_spill] sm:$0xff]  ;;  %v7022_v30 = vld [vmem:[#allocation57_spill] sm:$0xff] }
 0xf00   :  { %2985 = vmatprep.subr.bf16.mxu0 %v5762_v6  ;;  %3026 = vmatprep.subr.bf16.mxu1 %v5765_v60  ;;  %v7023_v6 = vld [vmem:[#allocation58_spill] sm:$0xff]  ;;  %v7024_v60 = vld [vmem:[#allocation59_spill] sm:$0xff] }
 0xf01   :  { %3015 = vmatprep.mubr.bf16.mxu0 %v6634_v47  ;;  %3056 = vmatprep.mubr.bf16.mxu1 %v6634_v47 }
 0xf03   :  { %2986 = vmatpush1.bf16.msra.mxu0 %v5770_v15  ;;  %3027 = vmatpush1.bf16.msra.mxu1 %v5773_v18  ;;  %v7025_v15 = vld [vmem:[#allocation46_spill] sm:$0xff]  ;;  %v7026_v18 = vld [vmem:[#allocation47_spill] sm:$0xff] }
 0xf04   :  { %2987 = vmatprep.subr.bf16.mxu0 %v5776_v9  ;;  %3028 = vmatprep.subr.bf16.mxu1 %v5779_v16  ;;  %v7027_v9 = vld [vmem:[#allocation48_spill] sm:$0xff]  ;;  %v7028_v16 = vld [vmem:[#allocation55_spill] sm:$0xff] }
 0xf07   :  { %2988 = vmatpush1.bf16.msra.mxu0 %v5782_v61  ;;  %3029 = vmatpush1.bf16.msra.mxu1 %v5785_v25  ;;  %v7029_v61 = vld [vmem:[#allocation56_spill] sm:$0xff]  ;;  %v7030_v25 = vld [vmem:[#allocation50_spill] sm:$0xff] }
 0xf08   :  { %2989 = vmatprep.subr.bf16.mxu0 %v5788_v38  ;;  %3030 = vmatprep.subr.bf16.mxu1 %v5791_v28  ;;  %v7031_v38 = vld [vmem:[#allocation60_spill] sm:$0xff]  ;;  %v7032_v28 = vld [vmem:[#allocation61_spill] sm:$0xff] }
 0xf0b   :  { %2990 = vmatpush1.bf16.msra.mxu0 %v5794_v40  ;;  %3031 = vmatpush1.bf16.msra.mxu1 %v5797_v3  ;;  %v7033_v40 = vld [vmem:[#allocation62_spill] sm:$0xff]  ;;  %v7034_v3 = vld [vmem:[#allocation63_spill] sm:$0xff] }
 0xf0c   :  { %2991 = vmatprep.subr.bf16.mxu0 %v5800_v56  ;;  %3032 = vmatprep.subr.bf16.mxu1 %v6977_v0  ;;  %v7035_v56 = vld [vmem:[#allocation64_spill] sm:$0xff]  ;;  %v7038_v0 = vld [vmem:[#allocation78_spill] sm:$0xff] }
 0xf0f   :  { %2992 = vmatpush1.bf16.msra.mxu0 %v6978_v37  ;;  %3033 = vmatpush1.bf16.msra.mxu1 %v6979_v31  ;;  %v7039_v37 = vld [vmem:[#allocation66_spill] sm:$0xff]  ;;  %v7040_v31 = vld [vmem:[#allocation67_spill] sm:$0xff] }
 0xf10   :  { %2993 = vmatprep.subr.bf16.mxu0 %v6980_v14  ;;  %3034 = vmatprep.subr.bf16.mxu1 %v6981_v46  ;;  %v7041_v14 = vld [vmem:[#allocation68_spill] sm:$0xff]  ;;  %v7043_v46 = vld [vmem:[#allocation70_spill] sm:$0xff] }
 0xf13   :  { %2994 = vmatpush1.bf16.msra.mxu0 %v6982_v44  ;;  %3035 = vmatpush1.bf16.msra.mxu1 %v6983_v32  ;;  %v7044_v44 = vld [vmem:[#allocation71_spill] sm:$0xff]  ;;  %v7045_v32 = vld [vmem:[#allocation72_spill] sm:$0xff] }
 0xf14   :  { %2995 = vmatprep.subr.bf16.mxu0 %v6984_v12  ;;  %3036 = vmatprep.subr.bf16.mxu1 %v6985_v26  ;;  %v7046_v12 = vld [vmem:[#allocation73_spill] sm:$0xff]  ;;  %v7047_v26 = vld [vmem:[#allocation74_spill] sm:$0xff] }
 0xf17   :  { %2996 = vmatpush1.bf16.msra.mxu0 %v5830_v21  ;;  %3037 = vmatpush1.bf16.msra.mxu1 %v7021_v5  ;;  %v7036_v21 = vld [vmem:[#allocation65_spill] sm:$0xff] }
 0xf18   :  { %2997 = vmatprep.subr.bf16.mxu0 %v7022_v30  ;;  %3038 = vmatprep.subr.bf16.mxu1 %v7023_v6 }
 0xf1b   :  { %2998 = vmatpush1.bf16.msra.mxu0 %v7024_v60  ;;  %3039 = vmatpush1.bf16.msra.mxu1 %v7025_v15 }
 0xf1c   :  { %3094 = vmatprep.subr.bf16.mxu0 %v7026_v18  ;;  %3135 = vmatprep.subr.bf16.mxu1 %v7027_v9 }
 0xf1e   :  { %3016 = vmatmul.mubr.bf16.vlgmr.msra.gmra.mxu0 %v6109_v63  ;;  %3057 = vmatmul.mubr.bf16.vlgmr.msra.gmra.mxu1 %v6109_v63  ;;  %v7048_v63 = vld [vmem:[#allocation75_spill] sm:$0xff] }
 0xf1f   :  { %3095 = vmatpush1.bf16.msra.mxu0 %v7028_v16  ;;  %3136 = vmatpush1.bf16.msra.mxu1 %v7029_v61  ;;  %v2978_v16 = vmul.f32 %v2973_v33, %v6698_v50 }
 0xf20   :  { %3096 = vmatprep.subr.bf16.mxu0 %v7030_v25  ;;  %3137 = vmatprep.subr.bf16.mxu1 %v7031_v38 }
 0xf21   :  { %3126 = vmatprep.mubr.bf16.mxu0 %v6634_v47  ;;  %3167 = vmatprep.mubr.bf16.mxu1 %v6634_v47  ;;  %v7042_v47 = vld [vmem:[#allocation69_spill] sm:$0xff]  ;;  %v2982_v13 = vadd.f32 %v2978_v16, %v4854_v41 }
 0xf23   :  { %3097 = vmatpush1.bf16.msra.mxu0 %v7032_v28  ;;  %3138 = vmatpush1.bf16.msra.mxu1 %v7033_v40 }
 0xf24   :  { %3098 = vmatprep.subr.bf16.mxu0 %v7034_v3  ;;  %3139 = vmatprep.subr.bf16.mxu1 %v7035_v56  ;;  %v2977_v3 = vmul.f32 %v2973_v33, %v6699_v2 }
 0xf27   :  { %3099 = vmatpush1.bf16.msra.mxu0 %v7036_v21  ;;  %3140 = vmatpush1.bf16.msra.mxu1 %v7037_v42  ;;  %v2981_v21 = vadd.f32 %v2977_v3, %v4862_v45 }
 0xf28   :  { %3100 = vmatprep.subr.bf16.mxu0 %v7038_v0  ;;  %3141 = vmatprep.subr.bf16.mxu1 %v7039_v37 }
 0xf2b   :  { %3101 = vmatpush1.bf16.msra.mxu0 %v7040_v31  ;;  %3142 = vmatpush1.bf16.msra.mxu1 %v7041_v14 }
 0xf2c   :  { %3102 = vmatprep.subr.bf16.mxu0 %v7042_v47  ;;  %3143 = vmatprep.subr.bf16.mxu1 %v7043_v46 }
 0xf2f   :  { %3103 = vmatpush1.bf16.msra.mxu0 %v7044_v44  ;;  %3144 = vmatpush1.bf16.msra.mxu1 %v7045_v32 }
 0xf30   :  { %3104 = vmatprep.subr.bf16.mxu0 %v7046_v12  ;;  %3145 = vmatprep.subr.bf16.mxu1 %v7047_v26 }
 0xf33   :  { %3105 = vmatpush1.bf16.msra.mxu0 %v7048_v63  ;;  %3146 = vmatpush1.bf16.msra.mxu1 %v7049_v34 }
 0xf34   :  { %3106 = vmatprep.subr.bf16.mxu0 %v7050_v29  ;;  %3147 = vmatprep.subr.bf16.mxu1 %v7051_v43  ;;  %v3842_v43 = vld [vmem:[#allocation13 + $0x38] sm:$0xff]  }
 0xf37   :  { %3107 = vmatpush1.bf16.msra.mxu0 %v7052_v27  ;;  %3148 = vmatpush1.bf16.msra.mxu1 %v7053_v59  ;;  %v4524_v27 = vmov 0.0   ;;  %v3843_v59 = vld [vmem:[#allocation13 + $0x30] sm:$0xff]  }
 0xf38   :  { %3108 = vmatprep.subr.bf16.mxu0 %v7054_v20  ;;  %3149 = vmatprep.subr.bf16.mxu1 %v7055_v22  ;;  %v3845_v20 = vld [vmem:[#allocation13 + $0x20] sm:$0xff]   ;;  %v3846_v22 = vld [vmem:[#allocation13 + $0x18] sm:$0xff]  }
 0xf3b   :  { %3109 = vmatpush1.bf16.msra.mxu0 %v7056_v49  ;;  %3150 = vmatpush1.bf16.msra.mxu1 %v7057_v52  ;;  %v3847_v49 = vld [vmem:[#allocation13 + $0x10] sm:$0xff]   ;;  %v3848_v52 = vld [vmem:[#allocation13 + $0x8] sm:$0xff]  }
 0xf3c   :  { %3626 = vmatprep.subr.bf16.mxu0 %v4524_v27  ;;  %3646 = vmatprep.subr.bf16.mxu1 %v4524_v27 }
 0xfbe   :  { %v6198_v17 = vpop.f32.mrf.mxu0  ;;  %v6200_v54 = vpop.f32.mrf.mxu1 }
 0xfbf   :  { %v2924_v33 = vadd.f32 %v6198_v17, %v6975_v7 }
 0xfc0   :  { %v6202_v62 = vpop.f32.mrf.mxu0  ;;  %v6204_v1 = vpop.f32.mrf.mxu1 }
 0xfc1   :  { %v2926_v8 = vadd.f32 %v6202_v62, %v6976_v24  ;;  %v2967_v7 = vadd.f32 %v6204_v1, %v4982_v57 }
 0xfc2   :  { %v2927_v19 = vpop.f32.mrf.mxu0  ;;  %v2968_v11 = vpop.f32.mrf.mxu1 }
 0xfc3   :  { %v3849_v19 = vld [vmem:[#allocation13] sm:$0xff]   ;;  %v3850_v11 = vld [vmem:[#allocation14 + $0x38] sm:$0xff]  }
 0xfc4   :  { %v2928_v10 = vpop.f32.mrf.mxu0  ;;  %v2969_v39 = vpop.f32.mrf.mxu1 }
 0xfc5   :  { %v3851_v10 = vld [vmem:[#allocation14 + $0x30] sm:$0xff]   ;;  %v3852_v39 = vld [vmem:[#allocation14 + $0x28] sm:$0xff]  }
 0xfde   :  { %v3017_v5 = vpop.f32.mrf.mxu0  ;;  %v3058_v30 = vpop.f32.mrf.mxu1 }
 0xfdf   :  { %v3065_v6 = vadd.f32 %v3017_v5, %v2979_v36  ;;  %v3067_v37 = vadd.f32 %v3058_v30, %v2981_v21 }
 0xfe0   :  { %v3019_v60 = vpop.f32.mrf.mxu0  ;;  %v3060_v15 = vpop.f32.mrf.mxu1 }
 0xfe1   :  { %v3584_v18 = vmul.f32 -1.442695, %v3065_v6  ;;  %v3066_v9 = vadd.f32 %v3019_v60, %v2980_v35  ;;  %v3068_v56 = vadd.f32 %v3060_v15, %v2982_v13 }
 0xfe2   :  { %v3021_v61 = vpop.f32.mrf.mxu0  ;;  %v3062_v25 = vpop.f32.mrf.mxu1 }
 0xfe3   :  { %4082 = vpow2.f32 %v3584_v18  ;;  %v3585_v38 = vmul.f32 -1.442695, %v3066_v9  ;;  %v3586_v42 = vmul.f32 -1.442695, %v3068_v56  ;;  %v2965_v9 = vadd.f32 %v6200_v54, %v4986_v58 }
 0xfe4   :  { %v3022_v28 = vpop.f32.mrf.mxu0  ;;  %v3063_v40 = vpop.f32.mrf.mxu1 }
 0xfe5   :  { %4084 = vpow2.f32 %v3585_v38 }
 0xfe6   :  { %4086 = vpow2.f32 %v3586_v42 }
 0xff0   :  { %v4083_v0 = vpop.eup %4082 }
 0xff1   :  { %v3072_v31 = vadd.f32 1.0, %v4083_v0 }
 0xff2   :  { %v4085_v14 = vpop.eup %4084 }
 0xff3   :  { %4088 = vrcp.f32 %v3072_v31  ;;  %v3078_v50 = vadd.f32 1.0, %v4085_v14  ;;  %v4087_v47 = vpop.eup %4086  ;;  %v3854_v31 = vld [vmem:[#allocation14 + $0x18] sm:$0xff]   ;;  %v3855_v14 = vld [vmem:[#allocation14 + $0x10] sm:$0xff]  }
 0xff4   :  { %4090 = vtanh.f32 %v3067_v37  ;;  %v3085_v41 = vadd.f32 1.0, %v4087_v47  ;;  %v3853_v37 = vld [vmem:[#allocation14 + $0x20] sm:$0xff]   ;;  %v3590_v47 = vld [vmem:[%s6259_s8] ss:$0 sm:$0xff]  ;;  %s4526_s8 = smov [#allocation16]  }
 0xff5   :  { %4092 = vrcp.f32 %v3078_v50  ;;  %v3857_v50 = vld [vmem:[#allocation14] sm:$0xff]   ;;  %s3433_s4 = sshll.u32 %s4526_s8, 4  ;;  %s3434_s4 = int_to_ptr.vmem [resolvable:$true] %s3433_s4 }
 0xff6   :  { %4094 = vrcp.f32 %v3085_v41  ;;  %s4472_s19 = scalar_lea.vmem %s3434_s4, 32  ;;  %p4477_p13 = scmp.lt.s32.totalorder %s3434_s4, %s3434_s4 }
 0xff7   :  { %p4473_p12 = scmp.ne.s32.totalorder %s3434_s4, %s4472_s19  ;;  %p4478_p0 = scmp.lt.s32.totalorder %s4472_s19, %s4472_s19 }
 0xff9   :  { %p4479_p1 = por %p4478_p0, %p4477_p13 }
 0xffb   :  { %p4480_p2 = pnand %p4479_p1, %p4473_p12 }
0x1000   :  { %v4089_v46 = vpop.eup %4088 }
0x1001   :  { %v4091_v44 = vpop.eup %4090 }
0x1002   :  { %v4093_v32 = vpop.eup %4092  ;;  %v3089_v12 = vmul.f32 %v4091_v44, %v4089_v46 }
0x1003   :  { %v3088_v2 = vmul.f32 %v4093_v32, %v6106_v4  ;;  %v4095_v45 = vpop.eup %4094  ;;  %v3844_v4 = vld [vmem:[#allocation13 + $0x28] sm:$0xff]  }
0x1005   :  { %v3090_v26 = vadd.f32 %v3089_v12, %v3088_v2 }
0x1007   :  { %4096 = vtanh.f32 %v3090_v26 }
0x1014   :  { %v4097_v63 = vpop.eup %4096 }
0x1015   :  { %v3092_v34 = vmul.f32 %v4097_v63, %v4095_v45  ;;  %v3599_v45 = vld [vmem:[%s6261_s10] ss:$0 sm:$0xff] }
0x1017   :  { %v3093_v29 = vpack.c.bf16 %v3092_v34, %v3092_v34 }
0x1019   :  { %3127 = vmatmul.mubr.bf16.vlgmr.msra.gmra.mxu0 %v3093_v29  ;;  %3168 = vmatmul.mubr.bf16.vlgmr.msra.gmra.mxu1 %v3093_v29 }
0x101a   :  { %3627 = vmatpush3.bf16.msra.mxu0 %v3842_v43  ;;  %3642 = vmatprep.mubr.msk.bf16.mxu0 %vm4525_vm0, %v4524_v27 }
0x101b   :  { %3628 = vmatprep.subr.bf16.mxu0 %v4524_v27  ;;  %3662 = vmatprep.mubr.msk.bf16.mxu1 %vm4525_vm0, %v4524_v27 }
0x101c   :  { %3647 = vmatpush3.bf16.msra.mxu1 %v3850_v11 }
0x101d   :  { %3648 = vmatprep.subr.bf16.mxu1 %v4524_v27 }
0x101e   :  { %3629 = vmatpush3.bf16.msra.mxu0 %v3843_v59 }
0x101f   :  { %3630 = vmatprep.subr.bf16.mxu0 %v4524_v27 }
0x1020   :  { %3649 = vmatpush3.bf16.msra.mxu1 %v3851_v10 }
0x1021   :  { %3650 = vmatprep.subr.bf16.mxu1 %v4524_v27 }
0x1022   :  { %3631 = vmatpush3.bf16.msra.mxu0 %v3844_v4 }
0x1023   :  { %3632 = vmatprep.subr.bf16.mxu0 %v4524_v27 }
0x1024   :  { %3651 = vmatpush3.bf16.msra.mxu1 %v3852_v39 }
0x1025   :  { %3652 = vmatprep.subr.bf16.mxu1 %v4524_v27 }
0x1026   :  { %3633 = vmatpush3.bf16.msra.mxu0 %v3845_v20 }
0x1027   :  { %3634 = vmatprep.subr.bf16.mxu0 %v4524_v27 }
0x1028   :  { %3653 = vmatpush3.bf16.msra.mxu1 %v3853_v37 }
0x1029   :  { %3654 = vmatprep.subr.bf16.mxu1 %v4524_v27 }
0x102a   :  { %3635 = vmatpush3.bf16.msra.mxu0 %v3846_v22 }
0x102b   :  { %3636 = vmatprep.subr.bf16.mxu0 %v4524_v27 }
0x102c   :  { %3655 = vmatpush3.bf16.msra.mxu1 %v3854_v31 }
0x102d   :  { %3656 = vmatprep.subr.bf16.mxu1 %v4524_v27 }
0x102e   :  { %3637 = vmatpush3.bf16.msra.mxu0 %v3847_v49 }
0x102f   :  { %3638 = vmatprep.subr.bf16.mxu0 %v4524_v27 }
0x1030   :  { %3657 = vmatpush3.bf16.msra.mxu1 %v3855_v14 }
0x1031   :  { %3658 = vmatprep.subr.bf16.mxu1 %v4524_v27 }
0x1032   :  { %3639 = vmatpush3.bf16.msra.mxu0 %v3848_v52 }
0x1033   :  { %3640 = vmatprep.subr.bf16.mxu0 %v4524_v27 }
0x1036   :  { %3641 = vmatpush3.bf16.msra.mxu0 %v3849_v19 }
0x10d9   :  { %v3128_v51 = vpop.f32.mrf.mxu0  ;;  %v3169_v53 = vpop.f32.mrf.mxu1 }
0x10da   :  { %v3129_v48 = vadd.f32 %v3128_v51, %v2924_v33  ;;  %v3170_v24 = vadd.f32 %v3169_v53, %v2965_v9 }
0x10db   :  { %v3130_v36 = vpop.f32.mrf.mxu0  ;;  %v3171_v55 = vpop.f32.mrf.mxu1 }
0x10dc   :  { %v3587_v35 = vmul.f32 -1.442695, %v3129_v48  ;;  %v3131_v5 = vadd.f32 %v3130_v36, %v2926_v8  ;;  %v3172_v17 = vadd.f32 %v3171_v55, %v2967_v7 }
0x10dd   :  { %v3132_v30 = vpop.f32.mrf.mxu0  ;;  %v3173_v6 = vpop.f32.mrf.mxu1 }
0x10de   :  { %4098 = vpow2.f32 %v3587_v35  ;;  %v3588_v60 = vmul.f32 -1.442695, %v3131_v5  ;;  %v3589_v62 = vmul.f32 -1.442695, %v3172_v17 }
0x10df   :  { %v3133_v15 = vpop.f32.mrf.mxu0  ;;  %v3174_v18 = vpop.f32.mrf.mxu1 }
0x10e0   :  { %4100 = vpow2.f32 %v3588_v60 }
0x10e1   :  { %4102 = vtanh.f32 %v3170_v24 }
0x10e2   :  { %4104 = vpow2.f32 %v3589_v62 }
0x10eb   :  { %v4099_v16 = vpop.eup %4098 }
0x10ec   :  { %v3179_v61 = vadd.f32 1.0, %v4099_v16 }
0x10ed   :  { %v4101_v25 = vpop.eup %4100 }
0x10ee   :  { %4106 = vrcp.f32 %v3179_v61  ;;  %v3185_v38 = vadd.f32 1.0, %v4101_v25  ;;  %v4103_v28 = vpop.eup %4102 }
0x10ef   :  { %v4105_v40 = vpop.eup %4104 }
0x10f0   :  { %4108 = vrcp.f32 %v3185_v38  ;;  %v3192_v57 = vadd.f32 1.0, %v4105_v40 }
0x10f2   :  { %4110 = vrcp.f32 %v3192_v57 }
0x10fb   :  { %v4107_v13 = vpop.eup %4106 }
0x10fc   :  { %v3196_v3 = vmul.f32 %v4107_v13, %v4103_v28 }
0x10fd   :  { %v4109_v56 = vpop.eup %4108 }
0x10fe   :  { %v3195_v1 = vmul.f32 %v4109_v56, %v6127_v23  ;;  %v3856_v23 = vld [vmem:[#allocation14 + $0x8] sm:$0xff]  }
0x10ff   :  { %v4111_v58 = vpop.eup %4110  ;;  %3659 = vmatpush3.bf16.msra.mxu1 %v3856_v23 }
0x1100   :  { %v3197_v21 = vadd.f32 %v3196_v3, %v3195_v1  ;;  %3660 = vmatprep.subr.bf16.mxu1 %v4524_v27 }
0x1102   :  { %4112 = vtanh.f32 %v3197_v21 }
0x1103   :  { %3661 = vmatpush3.bf16.msra.mxu1 %v3857_v50 }
0x110f   :  { %v4113_v54 = vpop.eup %4112 }
0x1110   :  { %v3199_v42 = vmul.f32 %v4113_v54, %v4111_v58 }
0x1112   :  { %v3200_v0 = vpack.c.bf16 %v3199_v42, %v3199_v42 }
0x1114   :  { %3643 = vmatmul.mubr.bf16.vlgmr.msra.gmra.mxu0 %v3200_v0 }
0x11d4   :  { %v3306_v46 = vpop.f32.mrf.mxu0 }
0x11d5   :  { %v3307_v44 = vadd.f32 %v3590_v47, %v3306_v46 }
0x11d6   :  { %v3644_v32 = vpop.f32.mrf.mxu0 }
0x11d7   :  { %4114 = vtanh.f32 %v3307_v44 }
0x11d8   :  { %v3309_v41 = vpop.f32.mrf.mxu0 }
0x11da   :  { %v3645_v12 = vpop.f32.mrf.mxu0 }
0x11e4   :  { %v4115_v2 = vpop.eup %4114 }
0x11e5   :  { %v3313_v26 = vpack.c.bf16 %v4115_v2, %v4115_v2 }
0x11e7   :  { %3663 = vmatmul.mubr.bf16.vlgmr.msra.gmra.mxu1 %v3313_v26 }
0x12a7   :  { %v3419_v63 = vpop.f32.mrf.mxu1 }
0x12a8   :  { %v3420_v34 = vadd.f32 %v3599_v45, %v3419_v63 }
0x12a9   :  { %v3664_v29 = vpop.f32.mrf.mxu1 }
0x12aa   :  { %4116 = vtanh.f32 %v3420_v34 }
0x12ab   :  { %v3422_v43 = vpop.f32.mrf.mxu1 }
0x12ad   :  { %v3665_v27 = vpop.f32.mrf.mxu1 }
0x12b7   :  { %v4117_v59 = vpop.eup %4116 }
0x12b8   :  { %3426 = vst [vmem:[#allocation16] sm:$0x3] %v4117_v59 }
0x12b9   :  { %4483 = shalt.err (!%p4480_p2)
}
0x12ba   :  { %3436 = dma.vmem_to_hbm [thread:$0]  %s3434_s4, 32, %s6262_s11, [#allocation4]  }
0x12bb   :  { %4502 = dma.done.wait [#allocation4], 32  }
0x12bc   :  { %4503 = vsyncadd [#allocation4], 4294967264 }
0x12bd   :  { %3440 = vsyncpa [#allocation3], 1 }
0x12be   :  { %3441 = vsyncpa [#allocation6], 1 }
0x12bf   :  { %3442 = vsyncpa [#allocation9], 1 }
0x12c0   :  { %3443 = vsyncpa [#allocation12], 1 }
0x12c1   :  { %3444 = vsyncpa [#allocation15], 1 }
0x12c2   :  { %3445 = vsyncpa [#allocation4], 1 }

</bundles_post_ra>
